<compile_context>
chip_gen: v6e
topology: v6e:2x2x1
jax: 0.10.0
libtpu: 0.0.40
codegen_flags: <defaults>
</compile_context>

<pallas_src>
import functools

import numpy as np
import jax
import jax.numpy as jnp
from jax.experimental import pallas as pl
from jax.experimental.pallas import tpu as pltpu


# ----------------------------------------------------------------------------- helpers
def _ln(x, g, b, eps=1e-6):
    """LayerNorm over last axis (biased variance; eps=1e-6 matches the reference repo)."""
    mu = jnp.mean(x, axis=-1, keepdims=True)
    var = jnp.mean(jnp.square(x - mu), axis=-1, keepdims=True)
    return (x - mu) * jax.lax.rsqrt(var + eps) * g + b


def sinusoid_table(n_position, d_hid):
    pos = np.arange(n_position, dtype=np.float64)[:, None]
    hid = np.arange(d_hid)[None, :]
    angle = pos / np.power(10000.0, 2.0 * (hid // 2) / d_hid)
    table = np.zeros((n_position, d_hid), dtype=np.float64)
    table[:, 0::2] = np.sin(angle[:, 0::2])
    table[:, 1::2] = np.cos(angle[:, 1::2])
    return jnp.asarray(table, dtype=jnp.float32)


# ----------------------------------------------------------------------------- kernel
def decoder_stack_kernel(
    x0_ref, enc_ref,
    wqkv_s_ref, wo_s_ref,
    wq_c_ref, wkv_c_ref, wo_c_ref,
    w1_ref, b1_ref, w2_ref, vec_ref,
    o_ref, acc_ref,
    *, n_head, d_k, d_v, bt, l_q, l_k):
    layer = pl.program_id(1)
    d_qk = n_head * d_k
    inv_temp = jnp.float32(1.0 / (d_k ** 0.5))
    f32, bf16 = jnp.float32, jnp.bfloat16

    # Seed the VMEM-resident carry from the (already LayerNorm'd) embeddings at layer 0.
    @pl.when(layer == 0)
    def _seed():
        o_ref[...] = x0_ref[...]

    x = o_ref[...]                       # (bt*l_q, D) f32, resident across layers

    # Packed per-layer vectors: rows = [g_slf, b_slf, g_enc, b_enc, b2, g_ffn, b_ffn, pad]
    vec = vec_ref[0]                     # (8, D) f32
    g_slf, b_slf = vec[0:1, :], vec[1:2, :]
    g_enc, b_enc = vec[2:3, :], vec[3:4, :]
    b2, g_ffn, b_ffn = vec[4:5, :], vec[5:6, :], vec[6:7, :]

    def attend(x_res, q, k, v, w_o, g, b, kv_len):
        """Unmasked MHA.  No concatenations: each head's context is folded directly into
        its Wo row-slice and accumulated; per-batch rows are stored into VMEM scratch."""
        D = x_res.shape[-1]
        for bi in range(bt):                               # static, tiny trip count
            qb = q[bi * l_q:(bi + 1) * l_q, :]
            kb = k[bi * kv_len:(bi + 1) * kv_len, :]
            vb = v[bi * kv_len:(bi + 1) * kv_len, :]
            y_b = jnp.zeros((l_q, D), f32)
            for h in range(n_head):
                # TODO(synk): 32-lane head slices; head-batched dot_general at prod shapes.
                qh = qb[:, h * d_k:(h + 1) * d_k]
                kh = kb[:, h * d_k:(h + 1) * d_k]
                vh = vb[:, h * d_v:(h + 1) * d_v]
                s = jax.lax.dot_general(qh, kh, (((1,), (1,)), ((), ())),
                                        preferred_element_type=f32) * inv_temp
                s = s - jnp.max(s, axis=-1, keepdims=True)
                p = jnp.exp(s)
                p = p * pl.reciprocal(jnp.sum(p, axis=-1, keepdims=True), approx=True)
                ctx = jnp.dot(p.astype(bf16), vh.astype(bf16),
                              preferred_element_type=f32)                 # (l_q, d_v)
                y_b = y_b + jnp.dot(ctx.astype(bf16),
                                    w_o[h * d_v:(h + 1) * d_v, :],        # lane-dense out
                                    preferred_element_type=f32)
            acc_ref[bi * l_q:(bi + 1) * l_q, :] = y_b      # bounded live range
        return _ln(x_res + acc_ref[...], g, b)

    # -------------------- self attention (fused Wq|Wk|Wv) -----------------------------
    qkv = jnp.dot(x.astype(bf16), wqkv_s_ref[0], preferred_element_type=f32)
    x = attend(x, qkv[:, :d_qk], qkv[:, d_qk:2 * d_qk], qkv[:, 2 * d_qk:],
               wo_s_ref[0], g_slf, b_slf, l_q)

    # -------------------- encoder-decoder attention (fused Wk|Wv) ---------------------
    q_c = jnp.dot(x.astype(bf16), wq_c_ref[0], preferred_element_type=f32)
    kv_c = jnp.dot(enc_ref[...], wkv_c_ref[0], preferred_element_type=f32)
    x = attend(x, q_c, kv_c[:, :d_qk], kv_c[:, d_qk:],
               wo_c_ref[0], g_enc, b_enc, l_k)

    # -------------------- position-wise feed-forward ----------------------------------
    h1 = jnp.dot(x.astype(bf16), w1_ref[0], preferred_element_type=f32) + b1_ref[0]
    h1 = jnp.maximum(h1, 0.0)
    y = jnp.dot(h1.astype(bf16), w2_ref[0], preferred_element_type=f32) + b2 + x
    o_ref[...] = _ln(y, g_ffn, b_ffn)    # carry for next layer; written to HBM at the end


# ----------------------------------------------------------------------------- params
def init_decoder_params(key, *, n_trg_vocab, d_word_vec, n_layers, n_head, d_k, d_v,
                        d_model, d_inner, pad_idx, n_position):
    d_qk, d_vv = n_head * d_k, n_head * d_v
    ki = iter(jax.random.split(key, 16))

    def nrm(shape, dtype=jnp.bfloat16, scale=0.05):
        return (scale * jax.random.normal(next(ki), shape)).astype(dtype)

    emb = nrm((n_trg_vocab, d_word_vec), dtype=jnp.float32)
    emb = emb.at[pad_idx].set(0.0)              # nn.Embedding padding_idx row is zero

    ones = jnp.ones((n_layers, 1, d_model), jnp.float32)
    zeros = jnp.zeros((n_layers, 1, d_model), jnp.float32)
    b2 = nrm((n_layers, 1, d_model), dtype=jnp.float32)
    # Pack the 7 small per-layer vectors into one (n_layers, 8, D) block (row 7 is pad).
    ln_vecs = jnp.concatenate([ones, zeros, ones, zeros, b2, ones, zeros, zeros], axis=1)

    return {
        "emb": emb,
        "pos_table": sinusoid_table(n_position, d_word_vec),
        "ln_g": jnp.ones((1, d_model), jnp.float32),        # decoder-input LN (XLA prologue)
        "ln_b": jnp.zeros((1, d_model), jnp.float32),
        # Per-layer weights stacked along a leading layer axis; MXU operands in bf16.
        "w_qkv_slf": nrm((n_layers, d_model, 2 * d_qk + d_vv)),   # Wq|Wk|Wv fused
        "wo_slf":    nrm((n_layers, d_vv, d_model)),
        "wq_enc":    nrm((n_layers, d_model, d_qk)),
        "w_kv_enc":  nrm((n_layers, d_model, d_qk + d_vv)),       # Wk|Wv fused
        "wo_enc":    nrm((n_layers, d_vv, d_model)),
        "w1": nrm((n_layers, d_model, d_inner)),
        "b1": nrm((n_layers, 1, d_inner), dtype=jnp.float32),
        "w2": nrm((n_layers, d_inner, d_model)),
        "ln_vecs": ln_vecs,
    }


# ----------------------------------------------------------------------------- forward
def decoder_forward(trg_seq, trg_mask, enc_output, params, *, n_head, d_k, d_v,
                    d_model, scale_emb=False):
    # trg_mask accepted for API parity; the reference Decoder never forwards it into
    # DecoderLayer, so it is intentionally unused (attention is unmasked).
    del trg_mask
    B, L = trg_seq.shape
    Lk = enc_output.shape[1]
    D = d_model
    n_layers = params["w_qkv_slf"].shape[0]
    d_inner = params["w1"].shape[2]
    d_qk, d_vv = n_head * d_k, n_head * d_v

    # XLA prologue: embedding gather (+ optional scale) + sinusoid pos-enc + input LN.
    x = jnp.take(params["emb"], trg_seq.astype(jnp.int32), axis=0)
    if scale_emb:
        x = x * (d_model ** 0.5)
    x = x + params["pos_table"][None, :L, :]
    x0 = _ln(x.reshape(B * L, D).astype(jnp.float32), params["ln_g"], params["ln_b"])
    enc2 = enc_output.reshape(B * Lk, D).astype(jnp.bfloat16)

    # TODO(synk): on v7x use bt = B // 2 so the 'parallel' axis feeds both TensorCores;
    # here B*L is tiny so the whole batch goes through in one grid step.
    bt = B
    grid = (B // bt, n_layers)

    kernel = functools.partial(decoder_stack_kernel, n_head=n_head, d_k=d_k, d_v=d_v,
                               bt=bt, l_q=L, l_k=Lk)

    def wspec(shape):                        # stacked per-layer weight: pick layer block
        return pl.BlockSpec(shape, lambda i, l: (l, 0, 0))

    weights = (params["w_qkv_slf"], params["wo_slf"], params["wq_enc"],
               params["w_kv_enc"], params["wo_enc"], params["w1"], params["b1"],
               params["w2"], params["ln_vecs"])

    # Cost estimate so XLA schedules the fused stack realistically vs. surrounding ops.
    rows = B * L
    fl = (2 * rows * D * (2 * d_qk + d_vv) + 2 * B * n_head * L * L * (d_k + d_v)
          + 2 * rows * d_vv * D + 2 * rows * D * d_qk
          + 2 * B * Lk * D * (d_qk + d_vv) + 2 * B * n_head * L * Lk * (d_k + d_v)
          + 2 * rows * d_vv * D + 4 * rows * D * d_inner)
    w_bytes = sum(int(np.prod(w.shape)) * w.dtype.itemsize for w in weights)
    act_bytes = 2 * rows * D * 4 + B * Lk * D * 2
    ce = pl.CostEstimate(flops=int(n_layers * fl),
                         transcendentals=int(n_layers * B * n_head * (L * L + L * Lk)),
                         bytes_accessed=int(w_bytes * (B // bt) + act_bytes))

    out = pl.pallas_call(
        kernel,
        out_shape=jax.ShapeDtypeStruct((B * L, D), jnp.float32),
        grid=grid,
        in_specs=[
            pl.BlockSpec((bt * L, D), lambda i, l: (i, 0)),    # x0 (LN'd emb+pos), aliased
            pl.BlockSpec((bt * Lk, D), lambda i, l: (i, 0)),   # encoder output (bf16)
            wspec((1, D, 2 * d_qk + d_vv)),                    # self-attn fused Wq|Wk|Wv
            wspec((1, d_vv, D)),                               # self-attn Wo
            wspec((1, D, d_qk)),                               # cross-attn Wq
            wspec((1, D, d_qk + d_vv)),                        # cross-attn fused Wk|Wv
            wspec((1, d_vv, D)),                               # cross-attn Wo
            wspec((1, D, d_inner)), wspec((1, 1, d_inner)),    # FFN W1, b1
            wspec((1, d_inner, D)),                            # FFN W2
            wspec((1, 8, D)),                                  # packed LN gammas/betas + b2
        ],
        out_specs=pl.BlockSpec((bt * L, D), lambda i, l: (i, 0)),
        scratch_shapes=[pltpu.VMEM((bt * L, D), jnp.float32)], # attention accumulator
        input_output_aliases={0: 0},                           # x0 buffer reused as output
        cost_estimate=ce,
        compiler_params=pltpu.CompilerParams(
            dimension_semantics=("parallel", "arbitrary"),
            vmem_limit_bytes=48 * 1024 * 1024),                # re-derive per generation
    )(x0, enc2, *weights)

    return out.reshape(B, L, D)


# ----------------------------------------------------------------------------- main
if __name__ == "__main__":
    # Small, lane-dense shapes (d_model = 128 fills all 128 lanes of every vreg/store).
    n_trg_vocab, d_model, d_word_vec = 24, 128, 128
    n_layers, n_head, d_k, d_v, d_inner = 2, 4, 32, 32, 256
    pad_idx, n_position = 0, 200
    B, trg_len, src_len = 2, 8, 16

    root = jax.random.PRNGKey(0)
    k_par, k_seq, k_enc = jax.random.split(root, 3)

    params = init_decoder_params(
        k_par, n_trg_vocab=n_trg_vocab, d_word_vec=d_word_vec, n_layers=n_layers,
        n_head=n_head, d_k=d_k, d_v=d_v, d_model=d_model, d_inner=d_inner,
        pad_idx=pad_idx, n_position=n_position)

    trg_seq = jax.random.randint(k_seq, (B, trg_len), 0, n_trg_vocab, dtype=jnp.int32)
    trg_mask = jnp.tril(jnp.ones((B, 1, trg_len, trg_len), jnp.float32))  # unused (ref semantics)
    enc_output = jax.random.normal(k_enc, (B, src_len, d_model), dtype=jnp.float32)

    fwd = jax.jit(functools.partial(decoder_forward, n_head=n_head, d_k=d_k, d_v=d_v,
                                    d_model=d_model, scale_emb=False))
    out = jax.block_until_ready(fwd(trg_seq, trg_mask, enc_output, params))
    assert out.shape == (B, trg_len, d_model) and out.dtype == jnp.float32
    assert bool(jnp.all(jnp.isfinite(out)))
    print("KERNEL_OK")
</pallas_src>

<mosaic_0001>
module attributes {stable_mosaic.version = 11 : i64} {
  func.func @decoder_stack_kernel(%arg0: i32, %arg1: i32, %arg2: memref<16x128xf32, #tpu.memory_space<vmem>>, %arg3: memref<32x128xbf16, #tpu.memory_space<vmem>>, %arg4: memref<1x128x384xbf16, #tpu.memory_space<vmem>>, %arg5: memref<1x128x128xbf16, #tpu.memory_space<vmem>>, %arg6: memref<1x128x128xbf16, #tpu.memory_space<vmem>>, %arg7: memref<1x128x256xbf16, #tpu.memory_space<vmem>>, %arg8: memref<1x128x128xbf16, #tpu.memory_space<vmem>>, %arg9: memref<1x128x256xbf16, #tpu.memory_space<vmem>>, %arg10: memref<1x1x256xf32, #tpu.memory_space<vmem>>, %arg11: memref<1x256x128xbf16, #tpu.memory_space<vmem>>, %arg12: memref<1x8x128xf32, #tpu.memory_space<vmem>>, %arg13: memref<16x128xf32, #tpu.memory_space<vmem>>, %arg14: memref<16x128xf32, #tpu.memory_space<vmem>>) attributes {dimension_semantics = [#tpu.dimension_semantics<parallel>, #tpu.dimension_semantics<arbitrary>], iteration_bounds = array<i64: 1, 2>, scalar_prefetch = 0 : i64, scratch_operands = 1 : i64, tpu.core_type = #tpu.core_type<tc>, window_params = [{transform_indices = @transform_0, window_bounds = array<i64: 16, 128>}, {transform_indices = @transform_1, window_bounds = array<i64: 32, 128>}, {transform_indices = @transform_2, window_bounds = array<i64: 1, 128, 384>}, {transform_indices = @transform_3, window_bounds = array<i64: 1, 128, 128>}, {transform_indices = @transform_4, window_bounds = array<i64: 1, 128, 128>}, {transform_indices = @transform_5, window_bounds = array<i64: 1, 128, 256>}, {transform_indices = @transform_6, window_bounds = array<i64: 1, 128, 128>}, {transform_indices = @transform_7, window_bounds = array<i64: 1, 128, 256>}, {transform_indices = @transform_8, window_bounds = array<i64: 1, 1, 256>}, {transform_indices = @transform_9, window_bounds = array<i64: 1, 256, 128>}, {transform_indices = @transform_10, window_bounds = array<i64: 1, 8, 128>}, {transform_indices = @transform_11, window_bounds = array<i64: 16, 128>}]} {
    %c0_i32 = arith.constant 0 : i32
    %0 = arith.cmpi eq, %arg1, %c0_i32 : i32
    %1 = arith.extui %0 : i1 to i32
    %c0_i32_0 = arith.constant 0 : i32
    %2 = arith.cmpi ne, %1, %c0_i32_0 : i32
    scf.if %2 {
      %c0_164 = arith.constant 0 : index
      %c0_165 = arith.constant 0 : index
      %510 = vector.load %arg2[%c0_164, %c0_165] : memref<16x128xf32, #tpu.memory_space<vmem>>, vector<16x128xf32>
      %c0_166 = arith.constant 0 : index
      %c0_167 = arith.constant 0 : index
      %511 = vector.load %arg13[%c0_166, %c0_167] : memref<16x128xf32, #tpu.memory_space<vmem>>, vector<16x128xf32>
      tpu.vector_store %arg13[%c0_166, %c0_167], %510 {strides = array<i32>} : memref<16x128xf32, #tpu.memory_space<vmem>>, vector<16x128xf32>,
    } else {
    }
    %c0 = arith.constant 0 : index
    %c0_1 = arith.constant 0 : index
    %3 = vector.load %arg13[%c0, %c0_1] : memref<16x128xf32, #tpu.memory_space<vmem>>, vector<16x128xf32>
    %c0_2 = arith.constant 0 : index
    %c0_3 = arith.constant 0 : index
    %c0_4 = arith.constant 0 : index
    %4 = vector.load %arg12[%c0_2, %c0_3, %c0_4] : memref<1x8x128xf32, #tpu.memory_space<vmem>>, vector<1x8x128xf32>
    %5 = vector.shape_cast %4 : vector<1x8x128xf32> to vector<8x128xf32>
    %6 = vector.extract_strided_slice %5 {offsets = [0, 0], sizes = [1, 128], strides = [1, 1]} : vector<8x128xf32> to vector<1x128xf32>
    %7 = vector.extract_strided_slice %5 {offsets = [1, 0], sizes = [1, 128], strides = [1, 1]} : vector<8x128xf32> to vector<1x128xf32>
    %8 = vector.extract_strided_slice %5 {offsets = [2, 0], sizes = [1, 128], strides = [1, 1]} : vector<8x128xf32> to vector<1x128xf32>
    %9 = vector.extract_strided_slice %5 {offsets = [3, 0], sizes = [1, 128], strides = [1, 1]} : vector<8x128xf32> to vector<1x128xf32>
    %10 = vector.extract_strided_slice %5 {offsets = [4, 0], sizes = [1, 128], strides = [1, 1]} : vector<8x128xf32> to vector<1x128xf32>
    %11 = vector.extract_strided_slice %5 {offsets = [5, 0], sizes = [1, 128], strides = [1, 1]} : vector<8x128xf32> to vector<1x128xf32>
    %12 = vector.extract_strided_slice %5 {offsets = [6, 0], sizes = [1, 128], strides = [1, 1]} : vector<8x128xf32> to vector<1x128xf32>
    %13 = arith.truncf %3 : vector<16x128xf32> to vector<16x128xbf16>
    %c0_5 = arith.constant 0 : index
    %c0_6 = arith.constant 0 : index
    %c0_7 = arith.constant 0 : index
    %14 = vector.load %arg4[%c0_5, %c0_6, %c0_7] : memref<1x128x384xbf16, #tpu.memory_space<vmem>>, vector<1x128x384xbf16>
    %15 = vector.shape_cast %14 : vector<1x128x384xbf16> to vector<128x384xbf16>
    %cst = arith.constant dense<0.000000e+00> : vector<16x384xf32>
    %16 = tpu.matmul %13, %15, %cst {dimension_numbers = #tpu.dot_dimension_numbers<[1], [0], [0], [1], [0, 0, 1, 1], [], []>} : vector<16x128xbf16>, vector<128x384xbf16>, vector<16x384xf32> -> vector<16x384xf32>
    %17 = vector.extract_strided_slice %16 {offsets = [0, 0], sizes = [16, 128], strides = [1, 1]} : vector<16x384xf32> to vector<16x128xf32>
    %18 = vector.extract_strided_slice %16 {offsets = [0, 128], sizes = [16, 128], strides = [1, 1]} : vector<16x384xf32> to vector<16x128xf32>
    %19 = vector.extract_strided_slice %16 {offsets = [0, 256], sizes = [16, 128], strides = [1, 1]} : vector<16x384xf32> to vector<16x128xf32>
    %c0_8 = arith.constant 0 : index
    %c0_9 = arith.constant 0 : index
    %c0_10 = arith.constant 0 : index
    %20 = vector.load %arg5[%c0_8, %c0_9, %c0_10] : memref<1x128x128xbf16, #tpu.memory_space<vmem>>, vector<1x128x128xbf16>
    %21 = vector.shape_cast %20 : vector<1x128x128xbf16> to vector<128x128xbf16>
    %22 = vector.extract_strided_slice %17 {offsets = [0, 0], sizes = [8, 128], strides = [1, 1]} : vector<16x128xf32> to vector<8x128xf32>
    %23 = vector.extract_strided_slice %18 {offsets = [0, 0], sizes = [8, 128], strides = [1, 1]} : vector<16x128xf32> to vector<8x128xf32>
    %24 = vector.extract_strided_slice %19 {offsets = [0, 0], sizes = [8, 128], strides = [1, 1]} : vector<16x128xf32> to vector<8x128xf32>
    %cst_11 = arith.constant 0.000000e+00 : f32
    %25 = vector.broadcast %cst_11 : f32 to vector<8x128xf32>
    %26 = vector.extract_strided_slice %22 {offsets = [0, 0], sizes = [8, 32], strides = [1, 1]} : vector<8x128xf32> to vector<8x32xf32>
    %27 = vector.extract_strided_slice %23 {offsets = [0, 0], sizes = [8, 32], strides = [1, 1]} : vector<8x128xf32> to vector<8x32xf32>
    %28 = vector.extract_strided_slice %24 {offsets = [0, 0], sizes = [8, 32], strides = [1, 1]} : vector<8x128xf32> to vector<8x32xf32>
    %cst_12 = arith.constant dense<0.000000e+00> : vector<8x8xf32>
    %29 = tpu.matmul %26, %27, %cst_12 {dimension_numbers = #tpu.dot_dimension_numbers<[1], [1], [0], [0], [0, 0, 1, 0], [], []>} : vector<8x32xf32>, vector<8x32xf32>, vector<8x8xf32> -> vector<8x8xf32>
    %cst_13 = arith.constant 0.176776692 : f32
    %30 = vector.broadcast %cst_13 : f32 to vector<8x8xf32>
    %31 = arith.mulf %29, %30 : vector<8x8xf32>
    %cst_14 = arith.constant dense<0xFF800000> : vector<8xf32>
    %32 = vector.multi_reduction <maximumf>, %31, %cst_14 [1] : vector<8x8xf32> to vector<8xf32>
    %33 = vector.shape_cast %32 : vector<8xf32> to vector<8x1xf32>
    %34 = vector.broadcast %33 : vector<8x1xf32> to vector<8x8xf32>
    %35 = arith.subf %31, %34 : vector<8x8xf32>
    %36 = math.exp %35 : vector<8x8xf32>
    %cst_15 = arith.constant dense<0.000000e+00> : vector<8xf32>
    %37 = vector.multi_reduction <add>, %36, %cst_15 [1] : vector<8x8xf32> to vector<8xf32>
    %38 = vector.shape_cast %37 : vector<8xf32> to vector<8x1xf32>
    %39 = tpu.reciprocal %38 {approx = true} : vector<8x1xf32> -> vector<8x1xf32>
    %40 = vector.broadcast %39 : vector<8x1xf32> to vector<8x8xf32>
    %41 = arith.mulf %36, %40 : vector<8x8xf32>
    %42 = arith.truncf %41 : vector<8x8xf32> to vector<8x8xbf16>
    %43 = arith.truncf %28 : vector<8x32xf32> to vector<8x32xbf16>
    %cst_16 = arith.constant dense<0.000000e+00> : vector<8x32xf32>
    %44 = tpu.matmul %42, %43, %cst_16 {dimension_numbers = #tpu.dot_dimension_numbers<[1], [0], [0], [1], [0, 0, 1, 1], [], []>} : vector<8x8xbf16>, vector<8x32xbf16>, vector<8x32xf32> -> vector<8x32xf32>
    %45 = arith.truncf %44 : vector<8x32xf32> to vector<8x32xbf16>
    %46 = vector.extract_strided_slice %21 {offsets = [0, 0], sizes = [32, 128], strides = [1, 1]} : vector<128x128xbf16> to vector<32x128xbf16>
    %cst_17 = arith.constant dense<0.000000e+00> : vector<8x128xf32>
    %47 = tpu.matmul %45, %46, %cst_17 {dimension_numbers = #tpu.dot_dimension_numbers<[1], [0], [0], [1], [0, 0, 1, 1], [], []>} : vector<8x32xbf16>, vector<32x128xbf16>, vector<8x128xf32> -> vector<8x128xf32>
    %48 = arith.addf %25, %47 : vector<8x128xf32>
    %49 = vector.extract_strided_slice %22 {offsets = [0, 32], sizes = [8, 32], strides = [1, 1]} : vector<8x128xf32> to vector<8x32xf32>
    %50 = vector.extract_strided_slice %23 {offsets = [0, 32], sizes = [8, 32], strides = [1, 1]} : vector<8x128xf32> to vector<8x32xf32>
    %51 = vector.extract_strided_slice %24 {offsets = [0, 32], sizes = [8, 32], strides = [1, 1]} : vector<8x128xf32> to vector<8x32xf32>
    %cst_18 = arith.constant dense<0.000000e+00> : vector<8x8xf32>
    %52 = tpu.matmul %49, %50, %cst_18 {dimension_numbers = #tpu.dot_dimension_numbers<[1], [1], [0], [0], [0, 0, 1, 0], [], []>} : vector<8x32xf32>, vector<8x32xf32>, vector<8x8xf32> -> vector<8x8xf32>
    %cst_19 = arith.constant 0.176776692 : f32
    %53 = vector.broadcast %cst_19 : f32 to vector<8x8xf32>
    %54 = arith.mulf %52, %53 : vector<8x8xf32>
    %cst_20 = arith.constant dense<0xFF800000> : vector<8xf32>
    %55 = vector.multi_reduction <maximumf>, %54, %cst_20 [1] : vector<8x8xf32> to vector<8xf32>
    %56 = vector.shape_cast %55 : vector<8xf32> to vector<8x1xf32>
    %57 = vector.broadcast %56 : vector<8x1xf32> to vector<8x8xf32>
    %58 = arith.subf %54, %57 : vector<8x8xf32>
    %59 = math.exp %58 : vector<8x8xf32>
    %cst_21 = arith.constant dense<0.000000e+00> : vector<8xf32>
    %60 = vector.multi_reduction <add>, %59, %cst_21 [1] : vector<8x8xf32> to vector<8xf32>
    %61 = vector.shape_cast %60 : vector<8xf32> to vector<8x1xf32>
    %62 = tpu.reciprocal %61 {approx = true} : vector<8x1xf32> -> vector<8x1xf32>
    %63 = vector.broadcast %62 : vector<8x1xf32> to vector<8x8xf32>
    %64 = arith.mulf %59, %63 : vector<8x8xf32>
    %65 = arith.truncf %64 : vector<8x8xf32> to vector<8x8xbf16>
    %66 = arith.truncf %51 : vector<8x32xf32> to vector<8x32xbf16>
    %cst_22 = arith.constant dense<0.000000e+00> : vector<8x32xf32>
    %67 = tpu.matmul %65, %66, %cst_22 {dimension_numbers = #tpu.dot_dimension_numbers<[1], [0], [0], [1], [0, 0, 1, 1], [], []>} : vector<8x8xbf16>, vector<8x32xbf16>, vector<8x32xf32> -> vector<8x32xf32>
    %68 = arith.truncf %67 : vector<8x32xf32> to vector<8x32xbf16>
    %69 = vector.extract_strided_slice %21 {offsets = [32, 0], sizes = [32, 128], strides = [1, 1]} : vector<128x128xbf16> to vector<32x128xbf16>
    %cst_23 = arith.constant dense<0.000000e+00> : vector<8x128xf32>
    %70 = tpu.matmul %68, %69, %cst_23 {dimension_numbers = #tpu.dot_dimension_numbers<[1], [0], [0], [1], [0, 0, 1, 1], [], []>} : vector<8x32xbf16>, vector<32x128xbf16>, vector<8x128xf32> -> vector<8x128xf32>
    %71 = arith.addf %48, %70 : vector<8x128xf32>
    %72 = vector.extract_strided_slice %22 {offsets = [0, 64], sizes = [8, 32], strides = [1, 1]} : vector<8x128xf32> to vector<8x32xf32>
    %73 = vector.extract_strided_slice %23 {offsets = [0, 64], sizes = [8, 32], strides = [1, 1]} : vector<8x128xf32> to vector<8x32xf32>
    %74 = vector.extract_strided_slice %24 {offsets = [0, 64], sizes = [8, 32], strides = [1, 1]} : vector<8x128xf32> to vector<8x32xf32>
    %cst_24 = arith.constant dense<0.000000e+00> : vector<8x8xf32>
    %75 = tpu.matmul %72, %73, %cst_24 {dimension_numbers = #tpu.dot_dimension_numbers<[1], [1], [0], [0], [0, 0, 1, 0], [], []>} : vector<8x32xf32>, vector<8x32xf32>, vector<8x8xf32> -> vector<8x8xf32>
    %cst_25 = arith.constant 0.176776692 : f32
    %76 = vector.broadcast %cst_25 : f32 to vector<8x8xf32>
    %77 = arith.mulf %75, %76 : vector<8x8xf32>
    %cst_26 = arith.constant dense<0xFF800000> : vector<8xf32>
    %78 = vector.multi_reduction <maximumf>, %77, %cst_26 [1] : vector<8x8xf32> to vector<8xf32>
    %79 = vector.shape_cast %78 : vector<8xf32> to vector<8x1xf32>
    %80 = vector.broadcast %79 : vector<8x1xf32> to vector<8x8xf32>
    %81 = arith.subf %77, %80 : vector<8x8xf32>
    %82 = math.exp %81 : vector<8x8xf32>
    %cst_27 = arith.constant dense<0.000000e+00> : vector<8xf32>
    %83 = vector.multi_reduction <add>, %82, %cst_27 [1] : vector<8x8xf32> to vector<8xf32>
    %84 = vector.shape_cast %83 : vector<8xf32> to vector<8x1xf32>
    %85 = tpu.reciprocal %84 {approx = true} : vector<8x1xf32> -> vector<8x1xf32>
    %86 = vector.broadcast %85 : vector<8x1xf32> to vector<8x8xf32>
    %87 = arith.mulf %82, %86 : vector<8x8xf32>
    %88 = arith.truncf %87 : vector<8x8xf32> to vector<8x8xbf16>
    %89 = arith.truncf %74 : vector<8x32xf32> to vector<8x32xbf16>
    %cst_28 = arith.constant dense<0.000000e+00> : vector<8x32xf32>
    %90 = tpu.matmul %88, %89, %cst_28 {dimension_numbers = #tpu.dot_dimension_numbers<[1], [0], [0], [1], [0, 0, 1, 1], [], []>} : vector<8x8xbf16>, vector<8x32xbf16>, vector<8x32xf32> -> vector<8x32xf32>
    %91 = arith.truncf %90 : vector<8x32xf32> to vector<8x32xbf16>
    %92 = vector.extract_strided_slice %21 {offsets = [64, 0], sizes = [32, 128], strides = [1, 1]} : vector<128x128xbf16> to vector<32x128xbf16>
    %cst_29 = arith.constant dense<0.000000e+00> : vector<8x128xf32>
    %93 = tpu.matmul %91, %92, %cst_29 {dimension_numbers = #tpu.dot_dimension_numbers<[1], [0], [0], [1], [0, 0, 1, 1], [], []>} : vector<8x32xbf16>, vector<32x128xbf16>, vector<8x128xf32> -> vector<8x128xf32>
    %94 = arith.addf %71, %93 : vector<8x128xf32>
    %95 = vector.extract_strided_slice %22 {offsets = [0, 96], sizes = [8, 32], strides = [1, 1]} : vector<8x128xf32> to vector<8x32xf32>
    %96 = vector.extract_strided_slice %23 {offsets = [0, 96], sizes = [8, 32], strides = [1, 1]} : vector<8x128xf32> to vector<8x32xf32>
    %97 = vector.extract_strided_slice %24 {offsets = [0, 96], sizes = [8, 32], strides = [1, 1]} : vector<8x128xf32> to vector<8x32xf32>
    %cst_30 = arith.constant dense<0.000000e+00> : vector<8x8xf32>
    %98 = tpu.matmul %95, %96, %cst_30 {dimension_numbers = #tpu.dot_dimension_numbers<[1], [1], [0], [0], [0, 0, 1, 0], [], []>} : vector<8x32xf32>, vector<8x32xf32>, vector<8x8xf32> -> vector<8x8xf32>
    %cst_31 = arith.constant 0.176776692 : f32
    %99 = vector.broadcast %cst_31 : f32 to vector<8x8xf32>
    %100 = arith.mulf %98, %99 : vector<8x8xf32>
    %cst_32 = arith.constant dense<0xFF800000> : vector<8xf32>
    %101 = vector.multi_reduction <maximumf>, %100, %cst_32 [1] : vector<8x8xf32> to vector<8xf32>
    %102 = vector.shape_cast %101 : vector<8xf32> to vector<8x1xf32>
    %103 = vector.broadcast %102 : vector<8x1xf32> to vector<8x8xf32>
    %104 = arith.subf %100, %103 : vector<8x8xf32>
    %105 = math.exp %104 : vector<8x8xf32>
    %cst_33 = arith.constant dense<0.000000e+00> : vector<8xf32>
    %106 = vector.multi_reduction <add>, %105, %cst_33 [1] : vector<8x8xf32> to vector<8xf32>
    %107 = vector.shape_cast %106 : vector<8xf32> to vector<8x1xf32>
    %108 = tpu.reciprocal %107 {approx = true} : vector<8x1xf32> -> vector<8x1xf32>
    %109 = vector.broadcast %108 : vector<8x1xf32> to vector<8x8xf32>
    %110 = arith.mulf %105, %109 : vector<8x8xf32>
    %111 = arith.truncf %110 : vector<8x8xf32> to vector<8x8xbf16>
    %112 = arith.truncf %97 : vector<8x32xf32> to vector<8x32xbf16>
    %cst_34 = arith.constant dense<0.000000e+00> : vector<8x32xf32>
    %113 = tpu.matmul %111, %112, %cst_34 {dimension_numbers = #tpu.dot_dimension_numbers<[1], [0], [0], [1], [0, 0, 1, 1], [], []>} : vector<8x8xbf16>, vector<8x32xbf16>, vector<8x32xf32> -> vector<8x32xf32>
    %114 = arith.truncf %113 : vector<8x32xf32> to vector<8x32xbf16>
    %115 = vector.extract_strided_slice %21 {offsets = [96, 0], sizes = [32, 128], strides = [1, 1]} : vector<128x128xbf16> to vector<32x128xbf16>
    %cst_35 = arith.constant dense<0.000000e+00> : vector<8x128xf32>
    %116 = tpu.matmul %114, %115, %cst_35 {dimension_numbers = #tpu.dot_dimension_numbers<[1], [0], [0], [1], [0, 0, 1, 1], [], []>} : vector<8x32xbf16>, vector<32x128xbf16>, vector<8x128xf32> -> vector<8x128xf32>
    %117 = arith.addf %94, %116 : vector<8x128xf32>
    %c0_36 = arith.constant 0 : index
    %c0_37 = arith.constant 0 : index
    %118 = vector.load %arg14[%c0_36, %c0_37] : memref<16x128xf32, #tpu.memory_space<vmem>>, vector<8x128xf32>
    tpu.vector_store %arg14[%c0_36, %c0_37], %117 {strides = array<i32>} : memref<16x128xf32, #tpu.memory_space<vmem>>, vector<8x128xf32>,
    %119 = vector.extract_strided_slice %17 {offsets = [8, 0], sizes = [8, 128], strides = [1, 1]} : vector<16x128xf32> to vector<8x128xf32>
    %120 = vector.extract_strided_slice %18 {offsets = [8, 0], sizes = [8, 128], strides = [1, 1]} : vector<16x128xf32> to vector<8x128xf32>
    %121 = vector.extract_strided_slice %19 {offsets = [8, 0], sizes = [8, 128], strides = [1, 1]} : vector<16x128xf32> to vector<8x128xf32>
    %cst_38 = arith.constant 0.000000e+00 : f32
    %122 = vector.broadcast %cst_38 : f32 to vector<8x128xf32>
    %123 = vector.extract_strided_slice %119 {offsets = [0, 0], sizes = [8, 32], strides = [1, 1]} : vector<8x128xf32> to vector<8x32xf32>
    %124 = vector.extract_strided_slice %120 {offsets = [0, 0], sizes = [8, 32], strides = [1, 1]} : vector<8x128xf32> to vector<8x32xf32>
    %125 = vector.extract_strided_slice %121 {offsets = [0, 0], sizes = [8, 32], strides = [1, 1]} : vector<8x128xf32> to vector<8x32xf32>
    %cst_39 = arith.constant dense<0.000000e+00> : vector<8x8xf32>
    %126 = tpu.matmul %123, %124, %cst_39 {dimension_numbers = #tpu.dot_dimension_numbers<[1], [1], [0], [0], [0, 0, 1, 0], [], []>} : vector<8x32xf32>, vector<8x32xf32>, vector<8x8xf32> -> vector<8x8xf32>
    %cst_40 = arith.constant 0.176776692 : f32
    %127 = vector.broadcast %cst_40 : f32 to vector<8x8xf32>
    %128 = arith.mulf %126, %127 : vector<8x8xf32>
    %cst_41 = arith.constant dense<0xFF800000> : vector<8xf32>
    %129 = vector.multi_reduction <maximumf>, %128, %cst_41 [1] : vector<8x8xf32> to vector<8xf32>
    %130 = vector.shape_cast %129 : vector<8xf32> to vector<8x1xf32>
    %131 = vector.broadcast %130 : vector<8x1xf32> to vector<8x8xf32>
    %132 = arith.subf %128, %131 : vector<8x8xf32>
    %133 = math.exp %132 : vector<8x8xf32>
    %cst_42 = arith.constant dense<0.000000e+00> : vector<8xf32>
    %134 = vector.multi_reduction <add>, %133, %cst_42 [1] : vector<8x8xf32> to vector<8xf32>
    %135 = vector.shape_cast %134 : vector<8xf32> to vector<8x1xf32>
    %136 = tpu.reciprocal %135 {approx = true} : vector<8x1xf32> -> vector<8x1xf32>
    %137 = vector.broadcast %136 : vector<8x1xf32> to vector<8x8xf32>
    %138 = arith.mulf %133, %137 : vector<8x8xf32>
    %139 = arith.truncf %138 : vector<8x8xf32> to vector<8x8xbf16>
    %140 = arith.truncf %125 : vector<8x32xf32> to vector<8x32xbf16>
    %cst_43 = arith.constant dense<0.000000e+00> : vector<8x32xf32>
    %141 = tpu.matmul %139, %140, %cst_43 {dimension_numbers = #tpu.dot_dimension_numbers<[1], [0], [0], [1], [0, 0, 1, 1], [], []>} : vector<8x8xbf16>, vector<8x32xbf16>, vector<8x32xf32> -> vector<8x32xf32>
    %142 = arith.truncf %141 : vector<8x32xf32> to vector<8x32xbf16>
    %143 = vector.extract_strided_slice %21 {offsets = [0, 0], sizes = [32, 128], strides = [1, 1]} : vector<128x128xbf16> to vector<32x128xbf16>
    %cst_44 = arith.constant dense<0.000000e+00> : vector<8x128xf32>
    %144 = tpu.matmul %142, %143, %cst_44 {dimension_numbers = #tpu.dot_dimension_numbers<[1], [0], [0], [1], [0, 0, 1, 1], [], []>} : vector<8x32xbf16>, vector<32x128xbf16>, vector<8x128xf32> -> vector<8x128xf32>
    %145 = arith.addf %122, %144 : vector<8x128xf32>
    %146 = vector.extract_strided_slice %119 {offsets = [0, 32], sizes = [8, 32], strides = [1, 1]} : vector<8x128xf32> to vector<8x32xf32>
    %147 = vector.extract_strided_slice %120 {offsets = [0, 32], sizes = [8, 32], strides = [1, 1]} : vector<8x128xf32> to vector<8x32xf32>
    %148 = vector.extract_strided_slice %121 {offsets = [0, 32], sizes = [8, 32], strides = [1, 1]} : vector<8x128xf32> to vector<8x32xf32>
    %cst_45 = arith.constant dense<0.000000e+00> : vector<8x8xf32>
    %149 = tpu.matmul %146, %147, %cst_45 {dimension_numbers = #tpu.dot_dimension_numbers<[1], [1], [0], [0], [0, 0, 1, 0], [], []>} : vector<8x32xf32>, vector<8x32xf32>, vector<8x8xf32> -> vector<8x8xf32>
    %cst_46 = arith.constant 0.176776692 : f32
    %150 = vector.broadcast %cst_46 : f32 to vector<8x8xf32>
    %151 = arith.mulf %149, %150 : vector<8x8xf32>
    %cst_47 = arith.constant dense<0xFF800000> : vector<8xf32>
    %152 = vector.multi_reduction <maximumf>, %151, %cst_47 [1] : vector<8x8xf32> to vector<8xf32>
    %153 = vector.shape_cast %152 : vector<8xf32> to vector<8x1xf32>
    %154 = vector.broadcast %153 : vector<8x1xf32> to vector<8x8xf32>
    %155 = arith.subf %151, %154 : vector<8x8xf32>
    %156 = math.exp %155 : vector<8x8xf32>
    %cst_48 = arith.constant dense<0.000000e+00> : vector<8xf32>
    %157 = vector.multi_reduction <add>, %156, %cst_48 [1] : vector<8x8xf32> to vector<8xf32>
    %158 = vector.shape_cast %157 : vector<8xf32> to vector<8x1xf32>
    %159 = tpu.reciprocal %158 {approx = true} : vector<8x1xf32> -> vector<8x1xf32>
    %160 = vector.broadcast %159 : vector<8x1xf32> to vector<8x8xf32>
    %161 = arith.mulf %156, %160 : vector<8x8xf32>
    %162 = arith.truncf %161 : vector<8x8xf32> to vector<8x8xbf16>
    %163 = arith.truncf %148 : vector<8x32xf32> to vector<8x32xbf16>
    %cst_49 = arith.constant dense<0.000000e+00> : vector<8x32xf32>
    %164 = tpu.matmul %162, %163, %cst_49 {dimension_numbers = #tpu.dot_dimension_numbers<[1], [0], [0], [1], [0, 0, 1, 1], [], []>} : vector<8x8xbf16>, vector<8x32xbf16>, vector<8x32xf32> -> vector<8x32xf32>
    %165 = arith.truncf %164 : vector<8x32xf32> to vector<8x32xbf16>
    %166 = vector.extract_strided_slice %21 {offsets = [32, 0], sizes = [32, 128], strides = [1, 1]} : vector<128x128xbf16> to vector<32x128xbf16>
    %cst_50 = arith.constant dense<0.000000e+00> : vector<8x128xf32>
    %167 = tpu.matmul %165, %166, %cst_50 {dimension_numbers = #tpu.dot_dimension_numbers<[1], [0], [0], [1], [0, 0, 1, 1], [], []>} : vector<8x32xbf16>, vector<32x128xbf16>, vector<8x128xf32> -> vector<8x128xf32>
    %168 = arith.addf %145, %167 : vector<8x128xf32>
    %169 = vector.extract_strided_slice %119 {offsets = [0, 64], sizes = [8, 32], strides = [1, 1]} : vector<8x128xf32> to vector<8x32xf32>
    %170 = vector.extract_strided_slice %120 {offsets = [0, 64], sizes = [8, 32], strides = [1, 1]} : vector<8x128xf32> to vector<8x32xf32>
    %171 = vector.extract_strided_slice %121 {offsets = [0, 64], sizes = [8, 32], strides = [1, 1]} : vector<8x128xf32> to vector<8x32xf32>
    %cst_51 = arith.constant dense<0.000000e+00> : vector<8x8xf32>
    %172 = tpu.matmul %169, %170, %cst_51 {dimension_numbers = #tpu.dot_dimension_numbers<[1], [1], [0], [0], [0, 0, 1, 0], [], []>} : vector<8x32xf32>, vector<8x32xf32>, vector<8x8xf32> -> vector<8x8xf32>
    %cst_52 = arith.constant 0.176776692 : f32
    %173 = vector.broadcast %cst_52 : f32 to vector<8x8xf32>
    %174 = arith.mulf %172, %173 : vector<8x8xf32>
    %cst_53 = arith.constant dense<0xFF800000> : vector<8xf32>
    %175 = vector.multi_reduction <maximumf>, %174, %cst_53 [1] : vector<8x8xf32> to vector<8xf32>
    %176 = vector.shape_cast %175 : vector<8xf32> to vector<8x1xf32>
    %177 = vector.broadcast %176 : vector<8x1xf32> to vector<8x8xf32>
    %178 = arith.subf %174, %177 : vector<8x8xf32>
    %179 = math.exp %178 : vector<8x8xf32>
    %cst_54 = arith.constant dense<0.000000e+00> : vector<8xf32>
    %180 = vector.multi_reduction <add>, %179, %cst_54 [1] : vector<8x8xf32> to vector<8xf32>
    %181 = vector.shape_cast %180 : vector<8xf32> to vector<8x1xf32>
    %182 = tpu.reciprocal %181 {approx = true} : vector<8x1xf32> -> vector<8x1xf32>
    %183 = vector.broadcast %182 : vector<8x1xf32> to vector<8x8xf32>
    %184 = arith.mulf %179, %183 : vector<8x8xf32>
    %185 = arith.truncf %184 : vector<8x8xf32> to vector<8x8xbf16>
    %186 = arith.truncf %171 : vector<8x32xf32> to vector<8x32xbf16>
    %cst_55 = arith.constant dense<0.000000e+00> : vector<8x32xf32>
    %187 = tpu.matmul %185, %186, %cst_55 {dimension_numbers = #tpu.dot_dimension_numbers<[1], [0], [0], [1], [0, 0, 1, 1], [], []>} : vector<8x8xbf16>, vector<8x32xbf16>, vector<8x32xf32> -> vector<8x32xf32>
    %188 = arith.truncf %187 : vector<8x32xf32> to vector<8x32xbf16>
    %189 = vector.extract_strided_slice %21 {offsets = [64, 0], sizes = [32, 128], strides = [1, 1]} : vector<128x128xbf16> to vector<32x128xbf16>
    %cst_56 = arith.constant dense<0.000000e+00> : vector<8x128xf32>
    %190 = tpu.matmul %188, %189, %cst_56 {dimension_numbers = #tpu.dot_dimension_numbers<[1], [0], [0], [1], [0, 0, 1, 1], [], []>} : vector<8x32xbf16>, vector<32x128xbf16>, vector<8x128xf32> -> vector<8x128xf32>
    %191 = arith.addf %168, %190 : vector<8x128xf32>
    %192 = vector.extract_strided_slice %119 {offsets = [0, 96], sizes = [8, 32], strides = [1, 1]} : vector<8x128xf32> to vector<8x32xf32>
    %193 = vector.extract_strided_slice %120 {offsets = [0, 96], sizes = [8, 32], strides = [1, 1]} : vector<8x128xf32> to vector<8x32xf32>
    %194 = vector.extract_strided_slice %121 {offsets = [0, 96], sizes = [8, 32], strides = [1, 1]} : vector<8x128xf32> to vector<8x32xf32>
    %cst_57 = arith.constant dense<0.000000e+00> : vector<8x8xf32>
    %195 = tpu.matmul %192, %193, %cst_57 {dimension_numbers = #tpu.dot_dimension_numbers<[1], [1], [0], [0], [0, 0, 1, 0], [], []>} : vector<8x32xf32>, vector<8x32xf32>, vector<8x8xf32> -> vector<8x8xf32>
    %cst_58 = arith.constant 0.176776692 : f32
    %196 = vector.broadcast %cst_58 : f32 to vector<8x8xf32>
    %197 = arith.mulf %195, %196 : vector<8x8xf32>
    %cst_59 = arith.constant dense<0xFF800000> : vector<8xf32>
    %198 = vector.multi_reduction <maximumf>, %197, %cst_59 [1] : vector<8x8xf32> to vector<8xf32>
    %199 = vector.shape_cast %198 : vector<8xf32> to vector<8x1xf32>
    %200 = vector.broadcast %199 : vector<8x1xf32> to vector<8x8xf32>
    %201 = arith.subf %197, %200 : vector<8x8xf32>
    %202 = math.exp %201 : vector<8x8xf32>
    %cst_60 = arith.constant dense<0.000000e+00> : vector<8xf32>
    %203 = vector.multi_reduction <add>, %202, %cst_60 [1] : vector<8x8xf32> to vector<8xf32>
    %204 = vector.shape_cast %203 : vector<8xf32> to vector<8x1xf32>
    %205 = tpu.reciprocal %204 {approx = true} : vector<8x1xf32> -> vector<8x1xf32>
    %206 = vector.broadcast %205 : vector<8x1xf32> to vector<8x8xf32>
    %207 = arith.mulf %202, %206 : vector<8x8xf32>
    %208 = arith.truncf %207 : vector<8x8xf32> to vector<8x8xbf16>
    %209 = arith.truncf %194 : vector<8x32xf32> to vector<8x32xbf16>
    %cst_61 = arith.constant dense<0.000000e+00> : vector<8x32xf32>
    %210 = tpu.matmul %208, %209, %cst_61 {dimension_numbers = #tpu.dot_dimension_numbers<[1], [0], [0], [1], [0, 0, 1, 1], [], []>} : vector<8x8xbf16>, vector<8x32xbf16>, vector<8x32xf32> -> vector<8x32xf32>
    %211 = arith.truncf %210 : vector<8x32xf32> to vector<8x32xbf16>
    %212 = vector.extract_strided_slice %21 {offsets = [96, 0], sizes = [32, 128], strides = [1, 1]} : vector<128x128xbf16> to vector<32x128xbf16>
    %cst_62 = arith.constant dense<0.000000e+00> : vector<8x128xf32>
    %213 = tpu.matmul %211, %212, %cst_62 {dimension_numbers = #tpu.dot_dimension_numbers<[1], [0], [0], [1], [0, 0, 1, 1], [], []>} : vector<8x32xbf16>, vector<32x128xbf16>, vector<8x128xf32> -> vector<8x128xf32>
    %214 = arith.addf %191, %213 : vector<8x128xf32>
    %c8 = arith.constant 8 : index
    %c0_63 = arith.constant 0 : index
    %215 = vector.load %arg14[%c8, %c0_63] : memref<16x128xf32, #tpu.memory_space<vmem>>, vector<8x128xf32>
    tpu.vector_store %arg14[%c8, %c0_63], %214 {strides = array<i32>} : memref<16x128xf32, #tpu.memory_space<vmem>>, vector<8x128xf32>,
    %c0_64 = arith.constant 0 : index
    %c0_65 = arith.constant 0 : index
    %216 = vector.load %arg14[%c0_64, %c0_65] : memref<16x128xf32, #tpu.memory_space<vmem>>, vector<16x128xf32>
    %217 = arith.addf %3, %216 : vector<16x128xf32>
    %cst_66 = arith.constant dense<0.000000e+00> : vector<16xf32>
    %218 = vector.multi_reduction <add>, %217, %cst_66 [1] : vector<16x128xf32> to vector<16xf32>
    %219 = vector.shape_cast %218 : vector<16xf32> to vector<16x1xf32>
    %cst_67 = arith.constant 1.280000e+02 : f32
    %220 = vector.broadcast %cst_67 : f32 to vector<16x1xf32>
    %221 = arith.divf %219, %220 : vector<16x1xf32>
    %222 = vector.broadcast %221 : vector<16x1xf32> to vector<16x128xf32>
    %223 = arith.subf %217, %222 : vector<16x128xf32>
    %224 = arith.mulf %223, %223 : vector<16x128xf32>
    %cst_68 = arith.constant dense<0.000000e+00> : vector<16xf32>
    %225 = vector.multi_reduction <add>, %224, %cst_68 [1] : vector<16x128xf32> to vector<16xf32>
    %226 = vector.shape_cast %225 : vector<16xf32> to vector<16x1xf32>
    %cst_69 = arith.constant 1.280000e+02 : f32
    %227 = vector.broadcast %cst_69 : f32 to vector<16x1xf32>
    %228 = arith.divf %226, %227 : vector<16x1xf32>
    %229 = vector.broadcast %221 : vector<16x1xf32> to vector<16x128xf32>
    %230 = arith.subf %217, %229 : vector<16x128xf32>
    %cst_70 = arith.constant 9.99999997E-7 : f32
    %231 = vector.broadcast %cst_70 : f32 to vector<16x1xf32>
    %232 = arith.addf %228, %231 : vector<16x1xf32>
    %233 = math.rsqrt %232 : vector<16x1xf32>
    %234 = vector.broadcast %233 : vector<16x1xf32> to vector<16x128xf32>
    %235 = arith.mulf %230, %234 : vector<16x128xf32>
    %236 = vector.broadcast %6 : vector<1x128xf32> to vector<16x128xf32>
    %237 = arith.mulf %235, %236 : vector<16x128xf32>
    %238 = vector.broadcast %7 : vector<1x128xf32> to vector<16x128xf32>
    %239 = arith.addf %237, %238 : vector<16x128xf32>
    %240 = arith.truncf %239 : vector<16x128xf32> to vector<16x128xbf16>
    %c0_71 = arith.constant 0 : index
    %c0_72 = arith.constant 0 : index
    %c0_73 = arith.constant 0 : index
    %241 = vector.load %arg6[%c0_71, %c0_72, %c0_73] : memref<1x128x128xbf16, #tpu.memory_space<vmem>>, vector<1x128x128xbf16>
    %242 = vector.shape_cast %241 : vector<1x128x128xbf16> to vector<128x128xbf16>
    %cst_74 = arith.constant dense<0.000000e+00> : vector<16x128xf32>
    %243 = tpu.matmul %240, %242, %cst_74 {dimension_numbers = #tpu.dot_dimension_numbers<[1], [0], [0], [1], [0, 0, 1, 1], [], []>} : vector<16x128xbf16>, vector<128x128xbf16>, vector<16x128xf32> -> vector<16x128xf32>
    %c0_75 = arith.constant 0 : index
    %c0_76 = arith.constant 0 : index
    %244 = vector.load %arg3[%c0_75, %c0_76] : memref<32x128xbf16, #tpu.memory_space<vmem>>, vector<32x128xbf16>
    %c0_77 = arith.constant 0 : index
    %c0_78 = arith.constant 0 : index
    %c0_79 = arith.constant 0 : index
    %245 = vector.load %arg7[%c0_77, %c0_78, %c0_79] : memref<1x128x256xbf16, #tpu.memory_space<vmem>>, vector<1x128x256xbf16>
    %246 = vector.shape_cast %245 : vector<1x128x256xbf16> to vector<128x256xbf16>
    %cst_80 = arith.constant dense<0.000000e+00> : vector<32x256xf32>
    %247 = tpu.matmul %244, %246, %cst_80 {dimension_numbers = #tpu.dot_dimension_numbers<[1], [0], [0], [1], [0, 0, 1, 1], [], []>} : vector<32x128xbf16>, vector<128x256xbf16>, vector<32x256xf32> -> vector<32x256xf32>
    %248 = vector.extract_strided_slice %247 {offsets = [0, 0], sizes = [32, 128], strides = [1, 1]} : vector<32x256xf32> to vector<32x128xf32>
    %249 = vector.extract_strided_slice %247 {offsets = [0, 128], sizes = [32, 128], strides = [1, 1]} : vector<32x256xf32> to vector<32x128xf32>
    %c0_81 = arith.constant 0 : index
    %c0_82 = arith.constant 0 : index
    %c0_83 = arith.constant 0 : index
    %250 = vector.load %arg8[%c0_81, %c0_82, %c0_83] : memref<1x128x128xbf16, #tpu.memory_space<vmem>>, vector<1x128x128xbf16>
    %251 = vector.shape_cast %250 : vector<1x128x128xbf16> to vector<128x128xbf16>
    %252 = vector.extract_strided_slice %243 {offsets = [0, 0], sizes = [8, 128], strides = [1, 1]} : vector<16x128xf32> to vector<8x128xf32>
    %253 = vector.extract_strided_slice %248 {offsets = [0, 0], sizes = [16, 128], strides = [1, 1]} : vector<32x128xf32> to vector<16x128xf32>
    %254 = vector.extract_strided_slice %249 {offsets = [0, 0], sizes = [16, 128], strides = [1, 1]} : vector<32x128xf32> to vector<16x128xf32>
    %cst_84 = arith.constant 0.000000e+00 : f32
    %255 = vector.broadcast %cst_84 : f32 to vector<8x128xf32>
    %256 = vector.extract_strided_slice %252 {offsets = [0, 0], sizes = [8, 32], strides = [1, 1]} : vector<8x128xf32> to vector<8x32xf32>
    %257 = vector.extract_strided_slice %253 {offsets = [0, 0], sizes = [16, 32], strides = [1, 1]} : vector<16x128xf32> to vector<16x32xf32>
    %258 = vector.extract_strided_slice %254 {offsets = [0, 0], sizes = [16, 32], strides = [1, 1]} : vector<16x128xf32> to vector<16x32xf32>
    %cst_85 = arith.constant dense<0.000000e+00> : vector<8x16xf32>
    %259 = tpu.matmul %256, %257, %cst_85 {dimension_numbers = #tpu.dot_dimension_numbers<[1], [1], [0], [0], [0, 0, 1, 0], [], []>} : vector<8x32xf32>, vector<16x32xf32>, vector<8x16xf32> -> vector<8x16xf32>
    %cst_86 = arith.constant 0.176776692 : f32
    %260 = vector.broadcast %cst_86 : f32 to vector<8x16xf32>
    %261 = arith.mulf %259, %260 : vector<8x16xf32>
    %cst_87 = arith.constant dense<0xFF800000> : vector<8xf32>
    %262 = vector.multi_reduction <maximumf>, %261, %cst_87 [1] : vector<8x16xf32> to vector<8xf32>
    %263 = vector.shape_cast %262 : vector<8xf32> to vector<8x1xf32>
    %264 = vector.broadcast %263 : vector<8x1xf32> to vector<8x16xf32>
    %265 = arith.subf %261, %264 : vector<8x16xf32>
    %266 = math.exp %265 : vector<8x16xf32>
    %cst_88 = arith.constant dense<0.000000e+00> : vector<8xf32>
    %267 = vector.multi_reduction <add>, %266, %cst_88 [1] : vector<8x16xf32> to vector<8xf32>
    %268 = vector.shape_cast %267 : vector<8xf32> to vector<8x1xf32>
    %269 = tpu.reciprocal %268 {approx = true} : vector<8x1xf32> -> vector<8x1xf32>
    %270 = vector.broadcast %269 : vector<8x1xf32> to vector<8x16xf32>
    %271 = arith.mulf %266, %270 : vector<8x16xf32>
    %272 = arith.truncf %271 : vector<8x16xf32> to vector<8x16xbf16>
    %273 = arith.truncf %258 : vector<16x32xf32> to vector<16x32xbf16>
    %cst_89 = arith.constant dense<0.000000e+00> : vector<8x32xf32>
    %274 = tpu.matmul %272, %273, %cst_89 {dimension_numbers = #tpu.dot_dimension_numbers<[1], [0], [0], [1], [0, 0, 1, 1], [], []>} : vector<8x16xbf16>, vector<16x32xbf16>, vector<8x32xf32> -> vector<8x32xf32>
    %275 = arith.truncf %274 : vector<8x32xf32> to vector<8x32xbf16>
    %276 = vector.extract_strided_slice %251 {offsets = [0, 0], sizes = [32, 128], strides = [1, 1]} : vector<128x128xbf16> to vector<32x128xbf16>
    %cst_90 = arith.constant dense<0.000000e+00> : vector<8x128xf32>
    %277 = tpu.matmul %275, %276, %cst_90 {dimension_numbers = #tpu.dot_dimension_numbers<[1], [0], [0], [1], [0, 0, 1, 1], [], []>} : vector<8x32xbf16>, vector<32x128xbf16>, vector<8x128xf32> -> vector<8x128xf32>
    %278 = arith.addf %255, %277 : vector<8x128xf32>
    %279 = vector.extract_strided_slice %252 {offsets = [0, 32], sizes = [8, 32], strides = [1, 1]} : vector<8x128xf32> to vector<8x32xf32>
    %280 = vector.extract_strided_slice %253 {offsets = [0, 32], sizes = [16, 32], strides = [1, 1]} : vector<16x128xf32> to vector<16x32xf32>
    %281 = vector.extract_strided_slice %254 {offsets = [0, 32], sizes = [16, 32], strides = [1, 1]} : vector<16x128xf32> to vector<16x32xf32>
    %cst_91 = arith.constant dense<0.000000e+00> : vector<8x16xf32>
    %282 = tpu.matmul %279, %280, %cst_91 {dimension_numbers = #tpu.dot_dimension_numbers<[1], [1], [0], [0], [0, 0, 1, 0], [], []>} : vector<8x32xf32>, vector<16x32xf32>, vector<8x16xf32> -> vector<8x16xf32>
    %cst_92 = arith.constant 0.176776692 : f32
    %283 = vector.broadcast %cst_92 : f32 to vector<8x16xf32>
    %284 = arith.mulf %282, %283 : vector<8x16xf32>
    %cst_93 = arith.constant dense<0xFF800000> : vector<8xf32>
    %285 = vector.multi_reduction <maximumf>, %284, %cst_93 [1] : vector<8x16xf32> to vector<8xf32>
    %286 = vector.shape_cast %285 : vector<8xf32> to vector<8x1xf32>
    %287 = vector.broadcast %286 : vector<8x1xf32> to vector<8x16xf32>
    %288 = arith.subf %284, %287 : vector<8x16xf32>
    %289 = math.exp %288 : vector<8x16xf32>
    %cst_94 = arith.constant dense<0.000000e+00> : vector<8xf32>
    %290 = vector.multi_reduction <add>, %289, %cst_94 [1] : vector<8x16xf32> to vector<8xf32>
    %291 = vector.shape_cast %290 : vector<8xf32> to vector<8x1xf32>
    %292 = tpu.reciprocal %291 {approx = true} : vector<8x1xf32> -> vector<8x1xf32>
    %293 = vector.broadcast %292 : vector<8x1xf32> to vector<8x16xf32>
    %294 = arith.mulf %289, %293 : vector<8x16xf32>
    %295 = arith.truncf %294 : vector<8x16xf32> to vector<8x16xbf16>
    %296 = arith.truncf %281 : vector<16x32xf32> to vector<16x32xbf16>
    %cst_95 = arith.constant dense<0.000000e+00> : vector<8x32xf32>
    %297 = tpu.matmul %295, %296, %cst_95 {dimension_numbers = #tpu.dot_dimension_numbers<[1], [0], [0], [1], [0, 0, 1, 1], [], []>} : vector<8x16xbf16>, vector<16x32xbf16>, vector<8x32xf32> -> vector<8x32xf32>
    %298 = arith.truncf %297 : vector<8x32xf32> to vector<8x32xbf16>
    %299 = vector.extract_strided_slice %251 {offsets = [32, 0], sizes = [32, 128], strides = [1, 1]} : vector<128x128xbf16> to vector<32x128xbf16>
    %cst_96 = arith.constant dense<0.000000e+00> : vector<8x128xf32>
    %300 = tpu.matmul %298, %299, %cst_96 {dimension_numbers = #tpu.dot_dimension_numbers<[1], [0], [0], [1], [0, 0, 1, 1], [], []>} : vector<8x32xbf16>, vector<32x128xbf16>, vector<8x128xf32> -> vector<8x128xf32>
    %301 = arith.addf %278, %300 : vector<8x128xf32>
    %302 = vector.extract_strided_slice %252 {offsets = [0, 64], sizes = [8, 32], strides = [1, 1]} : vector<8x128xf32> to vector<8x32xf32>
    %303 = vector.extract_strided_slice %253 {offsets = [0, 64], sizes = [16, 32], strides = [1, 1]} : vector<16x128xf32> to vector<16x32xf32>
    %304 = vector.extract_strided_slice %254 {offsets = [0, 64], sizes = [16, 32], strides = [1, 1]} : vector<16x128xf32> to vector<16x32xf32>
    %cst_97 = arith.constant dense<0.000000e+00> : vector<8x16xf32>
    %305 = tpu.matmul %302, %303, %cst_97 {dimension_numbers = #tpu.dot_dimension_numbers<[1], [1], [0], [0], [0, 0, 1, 0], [], []>} : vector<8x32xf32>, vector<16x32xf32>, vector<8x16xf32> -> vector<8x16xf32>
    %cst_98 = arith.constant 0.176776692 : f32
    %306 = vector.broadcast %cst_98 : f32 to vector<8x16xf32>
    %307 = arith.mulf %305, %306 : vector<8x16xf32>
    %cst_99 = arith.constant dense<0xFF800000> : vector<8xf32>
    %308 = vector.multi_reduction <maximumf>, %307, %cst_99 [1] : vector<8x16xf32> to vector<8xf32>
    %309 = vector.shape_cast %308 : vector<8xf32> to vector<8x1xf32>
    %310 = vector.broadcast %309 : vector<8x1xf32> to vector<8x16xf32>
    %311 = arith.subf %307, %310 : vector<8x16xf32>
    %312 = math.exp %311 : vector<8x16xf32>
    %cst_100 = arith.constant dense<0.000000e+00> : vector<8xf32>
    %313 = vector.multi_reduction <add>, %312, %cst_100 [1] : vector<8x16xf32> to vector<8xf32>
    %314 = vector.shape_cast %313 : vector<8xf32> to vector<8x1xf32>
    %315 = tpu.reciprocal %314 {approx = true} : vector<8x1xf32> -> vector<8x1xf32>
    %316 = vector.broadcast %315 : vector<8x1xf32> to vector<8x16xf32>
    %317 = arith.mulf %312, %316 : vector<8x16xf32>
    %318 = arith.truncf %317 : vector<8x16xf32> to vector<8x16xbf16>
    %319 = arith.truncf %304 : vector<16x32xf32> to vector<16x32xbf16>
    %cst_101 = arith.constant dense<0.000000e+00> : vector<8x32xf32>
    %320 = tpu.matmul %318, %319, %cst_101 {dimension_numbers = #tpu.dot_dimension_numbers<[1], [0], [0], [1], [0, 0, 1, 1], [], []>} : vector<8x16xbf16>, vector<16x32xbf16>, vector<8x32xf32> -> vector<8x32xf32>
    %321 = arith.truncf %320 : vector<8x32xf32> to vector<8x32xbf16>
    %322 = vector.extract_strided_slice %251 {offsets = [64, 0], sizes = [32, 128], strides = [1, 1]} : vector<128x128xbf16> to vector<32x128xbf16>
    %cst_102 = arith.constant dense<0.000000e+00> : vector<8x128xf32>
    %323 = tpu.matmul %321, %322, %cst_102 {dimension_numbers = #tpu.dot_dimension_numbers<[1], [0], [0], [1], [0, 0, 1, 1], [], []>} : vector<8x32xbf16>, vector<32x128xbf16>, vector<8x128xf32> -> vector<8x128xf32>
    %324 = arith.addf %301, %323 : vector<8x128xf32>
    %325 = vector.extract_strided_slice %252 {offsets = [0, 96], sizes = [8, 32], strides = [1, 1]} : vector<8x128xf32> to vector<8x32xf32>
    %326 = vector.extract_strided_slice %253 {offsets = [0, 96], sizes = [16, 32], strides = [1, 1]} : vector<16x128xf32> to vector<16x32xf32>
    %327 = vector.extract_strided_slice %254 {offsets = [0, 96], sizes = [16, 32], strides = [1, 1]} : vector<16x128xf32> to vector<16x32xf32>
    %cst_103 = arith.constant dense<0.000000e+00> : vector<8x16xf32>
    %328 = tpu.matmul %325, %326, %cst_103 {dimension_numbers = #tpu.dot_dimension_numbers<[1], [1], [0], [0], [0, 0, 1, 0], [], []>} : vector<8x32xf32>, vector<16x32xf32>, vector<8x16xf32> -> vector<8x16xf32>
    %cst_104 = arith.constant 0.176776692 : f32
    %329 = vector.broadcast %cst_104 : f32 to vector<8x16xf32>
    %330 = arith.mulf %328, %329 : vector<8x16xf32>
    %cst_105 = arith.constant dense<0xFF800000> : vector<8xf32>
    %331 = vector.multi_reduction <maximumf>, %330, %cst_105 [1] : vector<8x16xf32> to vector<8xf32>
    %332 = vector.shape_cast %331 : vector<8xf32> to vector<8x1xf32>
    %333 = vector.broadcast %332 : vector<8x1xf32> to vector<8x16xf32>
    %334 = arith.subf %330, %333 : vector<8x16xf32>
    %335 = math.exp %334 : vector<8x16xf32>
    %cst_106 = arith.constant dense<0.000000e+00> : vector<8xf32>
    %336 = vector.multi_reduction <add>, %335, %cst_106 [1] : vector<8x16xf32> to vector<8xf32>
    %337 = vector.shape_cast %336 : vector<8xf32> to vector<8x1xf32>
    %338 = tpu.reciprocal %337 {approx = true} : vector<8x1xf32> -> vector<8x1xf32>
    %339 = vector.broadcast %338 : vector<8x1xf32> to vector<8x16xf32>
    %340 = arith.mulf %335, %339 : vector<8x16xf32>
    %341 = arith.truncf %340 : vector<8x16xf32> to vector<8x16xbf16>
    %342 = arith.truncf %327 : vector<16x32xf32> to vector<16x32xbf16>
    %cst_107 = arith.constant dense<0.000000e+00> : vector<8x32xf32>
    %343 = tpu.matmul %341, %342, %cst_107 {dimension_numbers = #tpu.dot_dimension_numbers<[1], [0], [0], [1], [0, 0, 1, 1], [], []>} : vector<8x16xbf16>, vector<16x32xbf16>, vector<8x32xf32> -> vector<8x32xf32>
    %344 = arith.truncf %343 : vector<8x32xf32> to vector<8x32xbf16>
    %345 = vector.extract_strided_slice %251 {offsets = [96, 0], sizes = [32, 128], strides = [1, 1]} : vector<128x128xbf16> to vector<32x128xbf16>
    %cst_108 = arith.constant dense<0.000000e+00> : vector<8x128xf32>
    %346 = tpu.matmul %344, %345, %cst_108 {dimension_numbers = #tpu.dot_dimension_numbers<[1], [0], [0], [1], [0, 0, 1, 1], [], []>} : vector<8x32xbf16>, vector<32x128xbf16>, vector<8x128xf32> -> vector<8x128xf32>
    %347 = arith.addf %324, %346 : vector<8x128xf32>
    %c0_109 = arith.constant 0 : index
    %c0_110 = arith.constant 0 : index
    %348 = vector.load %arg14[%c0_109, %c0_110] : memref<16x128xf32, #tpu.memory_space<vmem>>, vector<8x128xf32>
    tpu.vector_store %arg14[%c0_109, %c0_110], %347 {strides = array<i32>} : memref<16x128xf32, #tpu.memory_space<vmem>>, vector<8x128xf32>,
    %349 = vector.extract_strided_slice %243 {offsets = [8, 0], sizes = [8, 128], strides = [1, 1]} : vector<16x128xf32> to vector<8x128xf32>
    %350 = vector.extract_strided_slice %248 {offsets = [16, 0], sizes = [16, 128], strides = [1, 1]} : vector<32x128xf32> to vector<16x128xf32>
    %351 = vector.extract_strided_slice %249 {offsets = [16, 0], sizes = [16, 128], strides = [1, 1]} : vector<32x128xf32> to vector<16x128xf32>
    %cst_111 = arith.constant 0.000000e+00 : f32
    %352 = vector.broadcast %cst_111 : f32 to vector<8x128xf32>
    %353 = vector.extract_strided_slice %349 {offsets = [0, 0], sizes = [8, 32], strides = [1, 1]} : vector<8x128xf32> to vector<8x32xf32>
    %354 = vector.extract_strided_slice %350 {offsets = [0, 0], sizes = [16, 32], strides = [1, 1]} : vector<16x128xf32> to vector<16x32xf32>
    %355 = vector.extract_strided_slice %351 {offsets = [0, 0], sizes = [16, 32], strides = [1, 1]} : vector<16x128xf32> to vector<16x32xf32>
    %cst_112 = arith.constant dense<0.000000e+00> : vector<8x16xf32>
    %356 = tpu.matmul %353, %354, %cst_112 {dimension_numbers = #tpu.dot_dimension_numbers<[1], [1], [0], [0], [0, 0, 1, 0], [], []>} : vector<8x32xf32>, vector<16x32xf32>, vector<8x16xf32> -> vector<8x16xf32>
    %cst_113 = arith.constant 0.176776692 : f32
    %357 = vector.broadcast %cst_113 : f32 to vector<8x16xf32>
    %358 = arith.mulf %356, %357 : vector<8x16xf32>
    %cst_114 = arith.constant dense<0xFF800000> : vector<8xf32>
    %359 = vector.multi_reduction <maximumf>, %358, %cst_114 [1] : vector<8x16xf32> to vector<8xf32>
    %360 = vector.shape_cast %359 : vector<8xf32> to vector<8x1xf32>
    %361 = vector.broadcast %360 : vector<8x1xf32> to vector<8x16xf32>
    %362 = arith.subf %358, %361 : vector<8x16xf32>
    %363 = math.exp %362 : vector<8x16xf32>
    %cst_115 = arith.constant dense<0.000000e+00> : vector<8xf32>
    %364 = vector.multi_reduction <add>, %363, %cst_115 [1] : vector<8x16xf32> to vector<8xf32>
    %365 = vector.shape_cast %364 : vector<8xf32> to vector<8x1xf32>
    %366 = tpu.reciprocal %365 {approx = true} : vector<8x1xf32> -> vector<8x1xf32>
    %367 = vector.broadcast %366 : vector<8x1xf32> to vector<8x16xf32>
    %368 = arith.mulf %363, %367 : vector<8x16xf32>
    %369 = arith.truncf %368 : vector<8x16xf32> to vector<8x16xbf16>
    %370 = arith.truncf %355 : vector<16x32xf32> to vector<16x32xbf16>
    %cst_116 = arith.constant dense<0.000000e+00> : vector<8x32xf32>
    %371 = tpu.matmul %369, %370, %cst_116 {dimension_numbers = #tpu.dot_dimension_numbers<[1], [0], [0], [1], [0, 0, 1, 1], [], []>} : vector<8x16xbf16>, vector<16x32xbf16>, vector<8x32xf32> -> vector<8x32xf32>
    %372 = arith.truncf %371 : vector<8x32xf32> to vector<8x32xbf16>
    %373 = vector.extract_strided_slice %251 {offsets = [0, 0], sizes = [32, 128], strides = [1, 1]} : vector<128x128xbf16> to vector<32x128xbf16>
    %cst_117 = arith.constant dense<0.000000e+00> : vector<8x128xf32>
    %374 = tpu.matmul %372, %373, %cst_117 {dimension_numbers = #tpu.dot_dimension_numbers<[1], [0], [0], [1], [0, 0, 1, 1], [], []>} : vector<8x32xbf16>, vector<32x128xbf16>, vector<8x128xf32> -> vector<8x128xf32>
    %375 = arith.addf %352, %374 : vector<8x128xf32>
    %376 = vector.extract_strided_slice %349 {offsets = [0, 32], sizes = [8, 32], strides = [1, 1]} : vector<8x128xf32> to vector<8x32xf32>
    %377 = vector.extract_strided_slice %350 {offsets = [0, 32], sizes = [16, 32], strides = [1, 1]} : vector<16x128xf32> to vector<16x32xf32>
    %378 = vector.extract_strided_slice %351 {offsets = [0, 32], sizes = [16, 32], strides = [1, 1]} : vector<16x128xf32> to vector<16x32xf32>
    %cst_118 = arith.constant dense<0.000000e+00> : vector<8x16xf32>
    %379 = tpu.matmul %376, %377, %cst_118 {dimension_numbers = #tpu.dot_dimension_numbers<[1], [1], [0], [0], [0, 0, 1, 0], [], []>} : vector<8x32xf32>, vector<16x32xf32>, vector<8x16xf32> -> vector<8x16xf32>
    %cst_119 = arith.constant 0.176776692 : f32
    %380 = vector.broadcast %cst_119 : f32 to vector<8x16xf32>
    %381 = arith.mulf %379, %380 : vector<8x16xf32>
    %cst_120 = arith.constant dense<0xFF800000> : vector<8xf32>
    %382 = vector.multi_reduction <maximumf>, %381, %cst_120 [1] : vector<8x16xf32> to vector<8xf32>
    %383 = vector.shape_cast %382 : vector<8xf32> to vector<8x1xf32>
    %384 = vector.broadcast %383 : vector<8x1xf32> to vector<8x16xf32>
    %385 = arith.subf %381, %384 : vector<8x16xf32>
    %386 = math.exp %385 : vector<8x16xf32>
    %cst_121 = arith.constant dense<0.000000e+00> : vector<8xf32>
    %387 = vector.multi_reduction <add>, %386, %cst_121 [1] : vector<8x16xf32> to vector<8xf32>
    %388 = vector.shape_cast %387 : vector<8xf32> to vector<8x1xf32>
    %389 = tpu.reciprocal %388 {approx = true} : vector<8x1xf32> -> vector<8x1xf32>
    %390 = vector.broadcast %389 : vector<8x1xf32> to vector<8x16xf32>
    %391 = arith.mulf %386, %390 : vector<8x16xf32>
    %392 = arith.truncf %391 : vector<8x16xf32> to vector<8x16xbf16>
    %393 = arith.truncf %378 : vector<16x32xf32> to vector<16x32xbf16>
    %cst_122 = arith.constant dense<0.000000e+00> : vector<8x32xf32>
    %394 = tpu.matmul %392, %393, %cst_122 {dimension_numbers = #tpu.dot_dimension_numbers<[1], [0], [0], [1], [0, 0, 1, 1], [], []>} : vector<8x16xbf16>, vector<16x32xbf16>, vector<8x32xf32> -> vector<8x32xf32>
    %395 = arith.truncf %394 : vector<8x32xf32> to vector<8x32xbf16>
    %396 = vector.extract_strided_slice %251 {offsets = [32, 0], sizes = [32, 128], strides = [1, 1]} : vector<128x128xbf16> to vector<32x128xbf16>
    %cst_123 = arith.constant dense<0.000000e+00> : vector<8x128xf32>
    %397 = tpu.matmul %395, %396, %cst_123 {dimension_numbers = #tpu.dot_dimension_numbers<[1], [0], [0], [1], [0, 0, 1, 1], [], []>} : vector<8x32xbf16>, vector<32x128xbf16>, vector<8x128xf32> -> vector<8x128xf32>
    %398 = arith.addf %375, %397 : vector<8x128xf32>
    %399 = vector.extract_strided_slice %349 {offsets = [0, 64], sizes = [8, 32], strides = [1, 1]} : vector<8x128xf32> to vector<8x32xf32>
    %400 = vector.extract_strided_slice %350 {offsets = [0, 64], sizes = [16, 32], strides = [1, 1]} : vector<16x128xf32> to vector<16x32xf32>
    %401 = vector.extract_strided_slice %351 {offsets = [0, 64], sizes = [16, 32], strides = [1, 1]} : vector<16x128xf32> to vector<16x32xf32>
    %cst_124 = arith.constant dense<0.000000e+00> : vector<8x16xf32>
    %402 = tpu.matmul %399, %400, %cst_124 {dimension_numbers = #tpu.dot_dimension_numbers<[1], [1], [0], [0], [0, 0, 1, 0], [], []>} : vector<8x32xf32>, vector<16x32xf32>, vector<8x16xf32> -> vector<8x16xf32>
    %cst_125 = arith.constant 0.176776692 : f32
    %403 = vector.broadcast %cst_125 : f32 to vector<8x16xf32>
    %404 = arith.mulf %402, %403 : vector<8x16xf32>
    %cst_126 = arith.constant dense<0xFF800000> : vector<8xf32>
    %405 = vector.multi_reduction <maximumf>, %404, %cst_126 [1] : vector<8x16xf32> to vector<8xf32>
    %406 = vector.shape_cast %405 : vector<8xf32> to vector<8x1xf32>
    %407 = vector.broadcast %406 : vector<8x1xf32> to vector<8x16xf32>
    %408 = arith.subf %404, %407 : vector<8x16xf32>
    %409 = math.exp %408 : vector<8x16xf32>
    %cst_127 = arith.constant dense<0.000000e+00> : vector<8xf32>
    %410 = vector.multi_reduction <add>, %409, %cst_127 [1] : vector<8x16xf32> to vector<8xf32>
    %411 = vector.shape_cast %410 : vector<8xf32> to vector<8x1xf32>
    %412 = tpu.reciprocal %411 {approx = true} : vector<8x1xf32> -> vector<8x1xf32>
    %413 = vector.broadcast %412 : vector<8x1xf32> to vector<8x16xf32>
    %414 = arith.mulf %409, %413 : vector<8x16xf32>
    %415 = arith.truncf %414 : vector<8x16xf32> to vector<8x16xbf16>
    %416 = arith.truncf %401 : vector<16x32xf32> to vector<16x32xbf16>
    %cst_128 = arith.constant dense<0.000000e+00> : vector<8x32xf32>
    %417 = tpu.matmul %415, %416, %cst_128 {dimension_numbers = #tpu.dot_dimension_numbers<[1], [0], [0], [1], [0, 0, 1, 1], [], []>} : vector<8x16xbf16>, vector<16x32xbf16>, vector<8x32xf32> -> vector<8x32xf32>
    %418 = arith.truncf %417 : vector<8x32xf32> to vector<8x32xbf16>
    %419 = vector.extract_strided_slice %251 {offsets = [64, 0], sizes = [32, 128], strides = [1, 1]} : vector<128x128xbf16> to vector<32x128xbf16>
    %cst_129 = arith.constant dense<0.000000e+00> : vector<8x128xf32>
    %420 = tpu.matmul %418, %419, %cst_129 {dimension_numbers = #tpu.dot_dimension_numbers<[1], [0], [0], [1], [0, 0, 1, 1], [], []>} : vector<8x32xbf16>, vector<32x128xbf16>, vector<8x128xf32> -> vector<8x128xf32>
    %421 = arith.addf %398, %420 : vector<8x128xf32>
    %422 = vector.extract_strided_slice %349 {offsets = [0, 96], sizes = [8, 32], strides = [1, 1]} : vector<8x128xf32> to vector<8x32xf32>
    %423 = vector.extract_strided_slice %350 {offsets = [0, 96], sizes = [16, 32], strides = [1, 1]} : vector<16x128xf32> to vector<16x32xf32>
    %424 = vector.extract_strided_slice %351 {offsets = [0, 96], sizes = [16, 32], strides = [1, 1]} : vector<16x128xf32> to vector<16x32xf32>
    %cst_130 = arith.constant dense<0.000000e+00> : vector<8x16xf32>
    %425 = tpu.matmul %422, %423, %cst_130 {dimension_numbers = #tpu.dot_dimension_numbers<[1], [1], [0], [0], [0, 0, 1, 0], [], []>} : vector<8x32xf32>, vector<16x32xf32>, vector<8x16xf32> -> vector<8x16xf32>
    %cst_131 = arith.constant 0.176776692 : f32
    %426 = vector.broadcast %cst_131 : f32 to vector<8x16xf32>
    %427 = arith.mulf %425, %426 : vector<8x16xf32>
    %cst_132 = arith.constant dense<0xFF800000> : vector<8xf32>
    %428 = vector.multi_reduction <maximumf>, %427, %cst_132 [1] : vector<8x16xf32> to vector<8xf32>
    %429 = vector.shape_cast %428 : vector<8xf32> to vector<8x1xf32>
    %430 = vector.broadcast %429 : vector<8x1xf32> to vector<8x16xf32>
    %431 = arith.subf %427, %430 : vector<8x16xf32>
    %432 = math.exp %431 : vector<8x16xf32>
    %cst_133 = arith.constant dense<0.000000e+00> : vector<8xf32>
    %433 = vector.multi_reduction <add>, %432, %cst_133 [1] : vector<8x16xf32> to vector<8xf32>
    %434 = vector.shape_cast %433 : vector<8xf32> to vector<8x1xf32>
    %435 = tpu.reciprocal %434 {approx = true} : vector<8x1xf32> -> vector<8x1xf32>
    %436 = vector.broadcast %435 : vector<8x1xf32> to vector<8x16xf32>
    %437 = arith.mulf %432, %436 : vector<8x16xf32>
    %438 = arith.truncf %437 : vector<8x16xf32> to vector<8x16xbf16>
    %439 = arith.truncf %424 : vector<16x32xf32> to vector<16x32xbf16>
    %cst_134 = arith.constant dense<0.000000e+00> : vector<8x32xf32>
    %440 = tpu.matmul %438, %439, %cst_134 {dimension_numbers = #tpu.dot_dimension_numbers<[1], [0], [0], [1], [0, 0, 1, 1], [], []>} : vector<8x16xbf16>, vector<16x32xbf16>, vector<8x32xf32> -> vector<8x32xf32>
    %441 = arith.truncf %440 : vector<8x32xf32> to vector<8x32xbf16>
    %442 = vector.extract_strided_slice %251 {offsets = [96, 0], sizes = [32, 128], strides = [1, 1]} : vector<128x128xbf16> to vector<32x128xbf16>
    %cst_135 = arith.constant dense<0.000000e+00> : vector<8x128xf32>
    %443 = tpu.matmul %441, %442, %cst_135 {dimension_numbers = #tpu.dot_dimension_numbers<[1], [0], [0], [1], [0, 0, 1, 1], [], []>} : vector<8x32xbf16>, vector<32x128xbf16>, vector<8x128xf32> -> vector<8x128xf32>
    %444 = arith.addf %421, %443 : vector<8x128xf32>
    %c8_136 = arith.constant 8 : index
    %c0_137 = arith.constant 0 : index
    %445 = vector.load %arg14[%c8_136, %c0_137] : memref<16x128xf32, #tpu.memory_space<vmem>>, vector<8x128xf32>
    tpu.vector_store %arg14[%c8_136, %c0_137], %444 {strides = array<i32>} : memref<16x128xf32, #tpu.memory_space<vmem>>, vector<8x128xf32>,
    %c0_138 = arith.constant 0 : index
    %c0_139 = arith.constant 0 : index
    %446 = vector.load %arg14[%c0_138, %c0_139] : memref<16x128xf32, #tpu.memory_space<vmem>>, vector<16x128xf32>
    %447 = arith.addf %239, %446 : vector<16x128xf32>
    %cst_140 = arith.constant dense<0.000000e+00> : vector<16xf32>
    %448 = vector.multi_reduction <add>, %447, %cst_140 [1] : vector<16x128xf32> to vector<16xf32>
    %449 = vector.shape_cast %448 : vector<16xf32> to vector<16x1xf32>
    %cst_141 = arith.constant 1.280000e+02 : f32
    %450 = vector.broadcast %cst_141 : f32 to vector<16x1xf32>
    %451 = arith.divf %449, %450 : vector<16x1xf32>
    %452 = vector.broadcast %451 : vector<16x1xf32> to vector<16x128xf32>
    %453 = arith.subf %447, %452 : vector<16x128xf32>
    %454 = arith.mulf %453, %453 : vector<16x128xf32>
    %cst_142 = arith.constant dense<0.000000e+00> : vector<16xf32>
    %455 = vector.multi_reduction <add>, %454, %cst_142 [1] : vector<16x128xf32> to vector<16xf32>
    %456 = vector.shape_cast %455 : vector<16xf32> to vector<16x1xf32>
    %cst_143 = arith.constant 1.280000e+02 : f32
    %457 = vector.broadcast %cst_143 : f32 to vector<16x1xf32>
    %458 = arith.divf %456, %457 : vector<16x1xf32>
    %459 = vector.broadcast %451 : vector<16x1xf32> to vector<16x128xf32>
    %460 = arith.subf %447, %459 : vector<16x128xf32>
    %cst_144 = arith.constant 9.99999997E-7 : f32
    %461 = vector.broadcast %cst_144 : f32 to vector<16x1xf32>
    %462 = arith.addf %458, %461 : vector<16x1xf32>
    %463 = math.rsqrt %462 : vector<16x1xf32>
    %464 = vector.broadcast %463 : vector<16x1xf32> to vector<16x128xf32>
    %465 = arith.mulf %460, %464 : vector<16x128xf32>
    %466 = vector.broadcast %8 : vector<1x128xf32> to vector<16x128xf32>
    %467 = arith.mulf %465, %466 : vector<16x128xf32>
    %468 = vector.broadcast %9 : vector<1x128xf32> to vector<16x128xf32>
    %469 = arith.addf %467, %468 : vector<16x128xf32>
    %470 = arith.truncf %469 : vector<16x128xf32> to vector<16x128xbf16>
    %c0_145 = arith.constant 0 : index
    %c0_146 = arith.constant 0 : index
    %c0_147 = arith.constant 0 : index
    %471 = vector.load %arg9[%c0_145, %c0_146, %c0_147] : memref<1x128x256xbf16, #tpu.memory_space<vmem>>, vector<1x128x256xbf16>
    %472 = vector.shape_cast %471 : vector<1x128x256xbf16> to vector<128x256xbf16>
    %cst_148 = arith.constant dense<0.000000e+00> : vector<16x256xf32>
    %473 = tpu.matmul %470, %472, %cst_148 {dimension_numbers = #tpu.dot_dimension_numbers<[1], [0], [0], [1], [0, 0, 1, 1], [], []>} : vector<16x128xbf16>, vector<128x256xbf16>, vector<16x256xf32> -> vector<16x256xf32>
    %c0_149 = arith.constant 0 : index
    %c0_150 = arith.constant 0 : index
    %c0_151 = arith.constant 0 : index
    %474 = vector.load %arg10[%c0_149, %c0_150, %c0_151] : memref<1x1x256xf32, #tpu.memory_space<vmem>>, vector<1x1x256xf32>
    %475 = vector.shape_cast %474 : vector<1x1x256xf32> to vector<1x256xf32>
    %476 = vector.broadcast %475 : vector<1x256xf32> to vector<16x256xf32>
    %477 = arith.addf %473, %476 : vector<16x256xf32>
    %cst_152 = arith.constant 0.000000e+00 : f32
    %478 = vector.broadcast %cst_152 : f32 to vector<16x256xf32>
    %479 = arith.maximumf %477, %478 : vector<16x256xf32>
    %480 = arith.truncf %479 : vector<16x256xf32> to vector<16x256xbf16>
    %c0_153 = arith.constant 0 : index
    %c0_154 = arith.constant 0 : index
    %c0_155 = arith.constant 0 : index
    %481 = vector.load %arg11[%c0_153, %c0_154, %c0_155] : memref<1x256x128xbf16, #tpu.memory_space<vmem>>, vector<1x256x128xbf16>
    %482 = vector.shape_cast %481 : vector<1x256x128xbf16> to vector<256x128xbf16>
    %cst_156 = arith.constant dense<0.000000e+00> : vector<16x128xf32>
    %483 = tpu.matmul %480, %482, %cst_156 {dimension_numbers = #tpu.dot_dimension_numbers<[1], [0], [0], [1], [0, 0, 1, 1], [], []>} : vector<16x256xbf16>, vector<256x128xbf16>, vector<16x128xf32> -> vector<16x128xf32>
    %484 = vector.broadcast %10 : vector<1x128xf32> to vector<16x128xf32>
    %485 = arith.addf %483, %484 : vector<16x128xf32>
    %486 = arith.addf %485, %469 : vector<16x128xf32>
    %cst_157 = arith.constant dense<0.000000e+00> : vector<16xf32>
    %487 = vector.multi_reduction <add>, %486, %cst_157 [1] : vector<16x128xf32> to vector<16xf32>
    %488 = vector.shape_cast %487 : vector<16xf32> to vector<16x1xf32>
    %cst_158 = arith.constant 1.280000e+02 : f32
    %489 = vector.broadcast %cst_158 : f32 to vector<16x1xf32>
    %490 = arith.divf %488, %489 : vector<16x1xf32>
    %491 = vector.broadcast %490 : vector<16x1xf32> to vector<16x128xf32>
    %492 = arith.subf %486, %491 : vector<16x128xf32>
    %493 = arith.mulf %492, %492 : vector<16x128xf32>
    %cst_159 = arith.constant dense<0.000000e+00> : vector<16xf32>
    %494 = vector.multi_reduction <add>, %493, %cst_159 [1] : vector<16x128xf32> to vector<16xf32>
    %495 = vector.shape_cast %494 : vector<16xf32> to vector<16x1xf32>
    %cst_160 = arith.constant 1.280000e+02 : f32
    %496 = vector.broadcast %cst_160 : f32 to vector<16x1xf32>
    %497 = arith.divf %495, %496 : vector<16x1xf32>
    %498 = vector.broadcast %490 : vector<16x1xf32> to vector<16x128xf32>
    %499 = arith.subf %486, %498 : vector<16x128xf32>
    %cst_161 = arith.constant 9.99999997E-7 : f32
    %500 = vector.broadcast %cst_161 : f32 to vector<16x1xf32>
    %501 = arith.addf %497, %500 : vector<16x1xf32>
    %502 = math.rsqrt %501 : vector<16x1xf32>
    %503 = vector.broadcast %502 : vector<16x1xf32> to vector<16x128xf32>
    %504 = arith.mulf %499, %503 : vector<16x128xf32>
    %505 = vector.broadcast %11 : vector<1x128xf32> to vector<16x128xf32>
    %506 = arith.mulf %504, %505 : vector<16x128xf32>
    %507 = vector.broadcast %12 : vector<1x128xf32> to vector<16x128xf32>
    %508 = arith.addf %506, %507 : vector<16x128xf32>
    %c0_162 = arith.constant 0 : index
    %c0_163 = arith.constant 0 : index
    %509 = vector.load %arg13[%c0_162, %c0_163] : memref<16x128xf32, #tpu.memory_space<vmem>>, vector<16x128xf32>
    tpu.vector_store %arg13[%c0_162, %c0_163], %508 {strides = array<i32>} : memref<16x128xf32, #tpu.memory_space<vmem>>, vector<16x128xf32>,
    return
  }
  func.func @transform_0(%arg0: i32, %arg1: i32) -> (i32, i32) {
    %c0_i32 = arith.constant 0 : i32
    %c0_i32_0 = arith.constant 0 : i32
    return %arg0, %c0_i32 : i32, i32
  }
  func.func @transform_1(%arg0: i32, %arg1: i32) -> (i32, i32) {
    %c0_i32 = arith.constant 0 : i32
    %c0_i32_0 = arith.constant 0 : i32
    return %arg0, %c0_i32 : i32, i32
  }
  func.func @transform_2(%arg0: i32, %arg1: i32) -> (i32, i32, i32) {
    %c0_i32 = arith.constant 0 : i32
    %c0_i32_0 = arith.constant 0 : i32
    %c0_i32_1 = arith.constant 0 : i32
    return %arg1, %c0_i32, %c0_i32_0 : i32, i32, i32
  }
  func.func @transform_3(%arg0: i32, %arg1: i32) -> (i32, i32, i32) {
    %c0_i32 = arith.constant 0 : i32
    %c0_i32_0 = arith.constant 0 : i32
    %c0_i32_1 = arith.constant 0 : i32
    return %arg1, %c0_i32, %c0_i32_0 : i32, i32, i32
  }
  func.func @transform_4(%arg0: i32, %arg1: i32) -> (i32, i32, i32) {
    %c0_i32 = arith.constant 0 : i32
    %c0_i32_0 = arith.constant 0 : i32
    %c0_i32_1 = arith.constant 0 : i32
    return %arg1, %c0_i32, %c0_i32_0 : i32, i32, i32
  }
  func.func @transform_5(%arg0: i32, %arg1: i32) -> (i32, i32, i32) {
    %c0_i32 = arith.constant 0 : i32
    %c0_i32_0 = arith.constant 0 : i32
    %c0_i32_1 = arith.constant 0 : i32
    return %arg1, %c0_i32, %c0_i32_0 : i32, i32, i32
  }
  func.func @transform_6(%arg0: i32, %arg1: i32) -> (i32, i32, i32) {
    %c0_i32 = arith.constant 0 : i32
    %c0_i32_0 = arith.constant 0 : i32
    %c0_i32_1 = arith.constant 0 : i32
    return %arg1, %c0_i32, %c0_i32_0 : i32, i32, i32
  }
  func.func @transform_7(%arg0: i32, %arg1: i32) -> (i32, i32, i32) {
    %c0_i32 = arith.constant 0 : i32
    %c0_i32_0 = arith.constant 0 : i32
    %c0_i32_1 = arith.constant 0 : i32
    return %arg1, %c0_i32, %c0_i32_0 : i32, i32, i32
  }
  func.func @transform_8(%arg0: i32, %arg1: i32) -> (i32, i32, i32) {
    %c0_i32 = arith.constant 0 : i32
    %c0_i32_0 = arith.constant 0 : i32
    %c0_i32_1 = arith.constant 0 : i32
    return %arg1, %c0_i32, %c0_i32_0 : i32, i32, i32
  }
  func.func @transform_9(%arg0: i32, %arg1: i32) -> (i32, i32, i32) {
    %c0_i32 = arith.constant 0 : i32
    %c0_i32_0 = arith.constant 0 : i32
    %c0_i32_1 = arith.constant 0 : i32
    return %arg1, %c0_i32, %c0_i32_0 : i32, i32, i32
  }
  func.func @transform_10(%arg0: i32, %arg1: i32) -> (i32, i32, i32) {
    %c0_i32 = arith.constant 0 : i32
    %c0_i32_0 = arith.constant 0 : i32
    %c0_i32_1 = arith.constant 0 : i32
    return %arg1, %c0_i32, %c0_i32_0 : i32, i32, i32
  }
  func.func @transform_11(%arg0: i32, %arg1: i32) -> (i32, i32) {
    %c0_i32 = arith.constant 0 : i32
    %c0_i32_0 = arith.constant 0 : i32
    return %arg0, %c0_i32 : i32, i32
  }
}

</mosaic_0001>

<bundles_post_ra>
// kernel: decoder_forward.1
= control target key start
LH: loop header
LB: loop body
LE: loop exit
PB: predicated region body
PF: predicated region fallthrough
CT: control target
= control target key end

     0   :  { %s7285_s0 = inlined_call_operand.vmem [shape: f32[16,128], index: 0, kind: input, shape index: {}, may-alias: {0,11}]   ;;  %s7286_s1 = inlined_call_operand.vmem [shape: bf16[32,128], index: 1, kind: input, shape index: {}]   ;;  %s7287_s2 = inlined_call_operand.hbm [shape: bf16[2,128,384], index: 2, kind: input, shape index: {}]   ;;  %s7288_s3 = inlined_call_operand.hbm [shape: bf16[2,128,128], index: 3, kind: input, shape index: {}]   ;;  %s7289_s4 = inlined_call_operand.hbm [shape: bf16[2,128,128], index: 4, kind: input, shape index: {}]   ;;  %s7290_s5 = inlined_call_operand.vmem [shape: bf16[2,128,256], index: 5, kind: input, shape index: {}]   ;;  %s7291_s6 = inlined_call_operand.hbm [shape: bf16[2,128,128], index: 6, kind: input, shape index: {}]   ;;  %s7292_s7 = inlined_call_operand.hbm [shape: bf16[2,128,256], index: 7, kind: input, shape index: {}]   ;;  %s7293_s8 = inlined_call_operand.vmem [shape: f32[2,1,256], index: 8, kind: input, shape index: {}]   ;;  %s7294_s9 = inlined_call_operand.hbm [shape: bf16[2,256,128], index: 9, kind: input, shape index: {}]   ;;  %s7295_s10 = inlined_call_operand.vmem [shape: f32[2,8,128], index: 10, kind: input, shape index: {}]   ;;  %s7296_s11 = inlined_call_operand.vmem [shape: f32[16,128], index: 11, kind: output, shape index: {}, may-alias: {0,11}]  }
   0x1   :  { %7309 = sst [smem:[#allocation22_spill]] %s7285_s0 }
   0x2   :  { %7310 = sst [smem:[#allocation23_spill]] %s7286_s1 }
   0x3   :  { %7311 = sst [smem:[#allocation24_spill]] %s7287_s2 }
   0x4   :  { %7312 = sst [smem:[#allocation25_spill]] %s7288_s3 }
   0x5   :  { %7313 = sst [smem:[#allocation26_spill]] %s7290_s5 }
   0x6   :  { %7314 = sst [smem:[#allocation27_spill]] %s7291_s6 }
   0x7   :  { %7315 = sst [smem:[#allocation28_spill]] %s7293_s8 }
   0x8   :  { %7316 = sst [smem:[#allocation29_spill]] %s7295_s10 }
   0x9   :  { %7317 = sst [smem:[#allocation30_spill]] %s7296_s11 }
   0xa   :  { %16 = vsyncpa [#allocation4], 0 }
   0xb   :  { %18 = vsyncpa [#allocation4 + $0x1], 0 }
   0xc   :  { %19 = vsyncpa [#allocation6], 0 }
   0xd   :  { %21 = vsyncpa [#allocation6 + $0x1], 0 }
   0xe   :  { %22 = vsyncpa [#allocation9], 0 }
   0xf   :  { %24 = vsyncpa [#allocation9 + $0x1], 0 }
  0x10   :  { %25 = vsyncpa [#allocation12], 0 }
  0x11   :  { %27 = vsyncpa [#allocation12 + $0x1], 0  ;;  %s6347_s17 = smov 0   ;;  %s6349_s18 = smov 0  }
  0x12   :  { %s6351_s19 = smov 0   ;;  %s6353_s20 = smov 0  }
  0x13   :  { %s6355_s21 = smov 0   ;;  %s6357_s22 = smov 0  }
  0x14 LB: > { %7318 = sst [smem:[#allocation17_spill]] %s6255_s19  ;;  %s7297_s23 = sadd.s32 4294967295, %s6267_s22   ;;  %s6267_s22 = sphi %s6357_s22, %s33_s22   ;;  %s6263_s21 = sphi %s6355_s21, %s7350_s21   ;;  %s6259_s20 = sphi %s6353_s20, %s7349_s20   ;;  %s6255_s19 = sphi %s6351_s19, %s7345_s19   ;;  %s6251_s18 = sphi %s6349_s18, %s7348_s18   ;;  %s6247_s17 = sphi %s6347_s17, %s7347_s17  }
  0x15   : > { %7319 = sst [smem:[#allocation18_spill]] %s6259_s20  ;;  %s42_s24 = sadd.s32 1, %s6263_s21 }
  0x16   : > { %7320 = sst [smem:[#allocation19_spill]] %s6267_s22  ;;  %p43_p0 = scmp.ge.s32.totalorder %s42_s24, 2 }
  0x17   : > { %s104_s25 = sadd.s32 1, %s6255_s19  ;;  %p111_p1 = scmp.ne.s32.totalorder %s6255_s19, %s6251_s18 }
  0x18   : > { %p112_p2 = scmp.eq.s32.totalorder %s6267_s22, 0  ;;  %s7352_s24 = smov (%p43_p0, %s42_s24), 0 }
  0x19   : > { %7321 = sst [smem:[#allocation20_spill]] %s7352_s24  ;;  %p117_p4 = scmp.ne.s32.totalorder %s6251_s18, %s6247_s17 }
  0x1a   : > { %p113_p3 = por %p112_p2, %p111_p1  ;;  %s101_s26 = ssub.s32 %s6263_s21, %s7352_s24 }
  0x1b   : > { %p118_p5 = scmp.eq.s32.totalorder %s7297_s23, 0  ;;  %p102_p6 = scmp.eq.s32.totalorder %s101_s26, 0 }
  0x1c   : > { %p5776_p8 = scmp.lt.s32.totalorder %s6267_s22, 2  ;;  %s6397_s29 = sand.u32 1, %s6255_s19  }
  0x1d   : > { %p6388_p7 = por %p118_p5, %p117_p4  ;;  %s7299_s12 = sand.u32 1, %s6267_s22  }
  0x1e   : > { %s6394_s28 = scalar_select %p102_p6, %s6255_s19, %s104_s25  }
  0x1f   : > { %p6399_p9 = pnand %p5776_p8, %p113_p3  ;;  %s6405_s13 = sshll.u32 %s6397_s29, 6 }
  0x20   : > { %7323 = sst [smem:[#allocation21_spill]] %s6394_s28  ;;  %s6408_s14 = sshll.u32 %s6263_s21, 10 }
  0x21   : > { %s7325_s3 = sld [smem:[#allocation25_spill]]  ;;  %s418_s25 = scalar_lea.vmem [#allocation5], %s6405_s13 }
  0x22   : > { %s425_s26 = sshll.u32 %s418_s25, 4  ;;  %p5031_p10 = scmp.ge.s32.totalorder %s6267_s22, 1  ;;  %s426_s26 = int_to_ptr.vmem [resolvable:$true] %s425_s26 }
  0x23   : > { %s6418_s23 = scalar_lea.sflag [#allocation6], %s7299_s12  ;;  %p6422_p11 = pneg %p6399_p9 }
  0x24   : > { %s6050_s28 = scalar_lea.vmem %s426_s26, 1024  ;;  %s6269_s15 = smov [#allocation5]  }
  0x25   : > { %p6051_p12 = scmp.ne.s32.totalorder %s426_s26, %s6050_s28  ;;  %s6055_s16 = sshll.u32 %s6269_s15, 4  ;;  %s6056_s16 = int_to_ptr.vmem [resolvable:$false] %s6055_s16 }
  0x26   : > { %s6057_s25 = scalar_lea.vmem %s6056_s16, 2048  ;;  %p6058_p1 = scmp.lt.s32.totalorder %s426_s26, %s6056_s16 }
  0x27   : > { %s424_s17 = scalar_lea.hbm %s7325_s3, %s6408_s14  ;;  %p6053_p13 = pnand %p6051_p12, %p6422_p11 }
  0x28   : > { %p6059_p2 = scmp.lt.s32.totalorder %s6057_s25, %s6050_s28 }
  0x29   : > { %p6054_p0 = pneg %p6053_p13 }
  0x2a   : > { %p6060_p3 = por %p6059_p2, %p6058_p1 }
  0x2c   : > { %p6061_p4 = pnand %p6060_p3, %p6054_p0 }
  0x2e   : > { %6064 = shalt.err (!%p6061_p4)
}
  0x2f   : > { %s7307_s12 = smov 64   ;;  %s6271_s3 = smov 4  }
  0x30   : > { %5763 = dma.hbm_to_vmem [thread:$0]  (!%p6399_p9), %s424_s17, 1024, %s426_s26, %s6418_s23, %s7307_s12, %s7307_s12, %s6271_s3  }
  0x31   : > { %p539_p5 = scmp.lt.s32.totalorder %s6267_s22, 3  ;;  %s7327_s6 = sld [smem:[#allocation27_spill]] }
  0x32   : > { %s468_s19 = scalar_lea.vmem [#allocation8], %s6405_s13  ;;  %s7329_s11 = sand.u32 1, %s6267_s22  }
  0x33   : > { %p6441_p6 = pnand %p5031_p10, %p539_p5  ;;  %s475_s1 = sshll.u32 %s468_s19, 4  ;;  %s476_s1 = int_to_ptr.vmem [resolvable:$true] %s475_s1 }
  0x34   : > { %s6448_s0 = scalar_lea.sflag [#allocation9], %s7329_s11  ;;  %s6078_s10 = scalar_lea.vmem %s476_s1, 1024 }
  0x35   : > { %p6079_p8 = scmp.ne.s32.totalorder %s476_s1, %s6078_s10  ;;  %s6272_s17 = smov [#allocation8]  }
  0x36   : > { %s6083_s26 = sshll.u32 %s6272_s17, 4  ;;  %s6084_s26 = int_to_ptr.vmem [resolvable:$false] %s6083_s26 }
  0x37   : > { %s474_s16 = scalar_lea.hbm %s7327_s6, %s6408_s14  ;;  %p6081_p12 = pnand %p6079_p8, %p6422_p11 }
  0x38   : > { %s6085_s28 = scalar_lea.vmem %s6084_s26, 2048  ;;  %p6086_p0 = scmp.lt.s32.totalorder %s476_s1, %s6084_s26 }
  0x39   : > { %p6082_p13 = pneg %p6081_p12  ;;  %p6087_p10 = scmp.lt.s32.totalorder %s6085_s28, %s6078_s10 }
  0x3b   : > { %p6088_p1 = por %p6087_p10, %p6086_p0 }
  0x3d   : > { %p6089_p2 = pnand %p6088_p1, %p6082_p13 }
  0x3f   : > { %6092 = shalt.err (!%p6089_p2)
}
  0x40   : > { %5769 = dma.hbm_to_vmem [thread:$0]  (!%p6399_p9), %s474_s16, 1024, %s476_s1, %s6448_s0, %s7307_s12, %s7307_s12, %s6271_s3  }
  0x41   : > { %s5742_s11 = smul.u32 192, %s6397_s29  ;;  %s7330_s2 = sld [smem:[#allocation24_spill]] }
  0x42   : > { %s5743_s19 = smul.u32 3072, %s6263_s21  ;;  %s445_s5 = scalar_lea.hbm %s7289_s4, %s6408_s14 }
  0x43   : > { %s397_s26 = scalar_lea.vmem [#allocation3], %s5742_s11  ;;  %s394_s20 = scalar_lea.sflag [#allocation4], %s6397_s29 }
  0x44   : > { %s404_s28 = sshll.u32 %s397_s26, 4  ;;  %s6273_s1 = smov [#allocation3]   ;;  %s405_s28 = int_to_ptr.vmem [resolvable:$true] %s404_s28 }
  0x45   : > { %s6106_s22 = scalar_lea.vmem %s405_s28, 3072  ;;  %s6111_s16 = sshll.u32 %s6273_s1, 4  ;;  %s6112_s16 = int_to_ptr.vmem [resolvable:$false] %s6111_s16 }
  0x46   : > { %p6107_p3 = scmp.ne.s32.totalorder %s405_s28, %s6106_s22  ;;  %s6113_s12 = scalar_lea.vmem %s6112_s16, 6144 }
  0x47   : > { %s403_s10 = scalar_lea.hbm %s7330_s2, %s5743_s19  ;;  %p6114_p8 = scmp.lt.s32.totalorder %s405_s28, %s6112_s16 }
  0x48   : > { %p6109_p4 = pnand %p6107_p3, %p6422_p11  ;;  %p6115_p12 = scmp.lt.s32.totalorder %s6113_s12, %s6106_s22 }
  0x4a   : > { %p6110_p5 = pneg %p6109_p4  ;;  %p6116_p13 = por %p6115_p12, %p6114_p8 }
  0x4c   : > { %p6117_p0 = pnand %p6116_p13, %p6110_p5 }
  0x4e   : > { %6120 = shalt.err (!%p6117_p0)
}
  0x4f   : > { %s6274_s11 = smov 192   ;;  %s6275_s6 = smov 12  }
  0x50   : > { %5760 = dma.hbm_to_vmem [thread:$0]  (!%p6399_p9), %s403_s10, 3072, %s405_s28, %s394_s20, %s6274_s11, %s6274_s11, %s6275_s6  }
  0x51   : > { %s439_s8 = scalar_lea.vmem [#allocation7], %s6405_s13  ;;  %s5025_s15 = sshll.u32 %s6397_s29, 7 }
  0x52   : > { %s446_s19 = sshll.u32 %s439_s8, 4  ;;  %s6276_s22 = smov [#allocation7]   ;;  %s447_s19 = int_to_ptr.vmem [resolvable:$true] %s446_s19 }
  0x53   : > { %s6134_s17 = scalar_lea.vmem %s447_s19, 1024  ;;  %s6139_s12 = sshll.u32 %s6276_s22, 4  ;;  %s6140_s12 = int_to_ptr.vmem [resolvable:$false] %s6139_s12 }
  0x54   : > { %p6135_p10 = scmp.ne.s32.totalorder %s447_s19, %s6134_s17  ;;  %s6141_s26 = scalar_lea.vmem %s6140_s12, 2048 }
  0x55   : > { %p6142_p3 = scmp.lt.s32.totalorder %s447_s19, %s6140_s12  ;;  %p6143_p4 = scmp.lt.s32.totalorder %s6141_s26, %s6134_s17 }
  0x56   : > { %p6137_p1 = pnand %p6135_p10, %p6422_p11 }
  0x57   : > { %p6144_p5 = por %p6143_p4, %p6142_p3 }
  0x58   : > { %p6138_p2 = pneg %p6137_p1 }
  0x5a   : > { %p6145_p8 = pnand %p6144_p5, %p6138_p2 }
  0x5c   : > { %6148 = shalt.err (!%p6145_p8)
}
  0x5d   : > { %s7331_s20 = smov 64   ;;  %s5219_s28 = sshll.u32 %s6263_s21, 11 }
  0x5e   : > { %5766 = dma.hbm_to_vmem [thread:$0]  (!%p6399_p9), %s445_s5, 1024, %s447_s19, %s6418_s23, %s7331_s20, %s7331_s20, %s6271_s3  }
  0x5f   : > { %s489_s1 = scalar_lea.vmem [#allocation10], %s5025_s15  ;;  %s495_s8 = scalar_lea.hbm %s7292_s7, %s5219_s28 }
  0x60   : > { %s496_s16 = sshll.u32 %s489_s1, 4  ;;  %s6277_s22 = smov [#allocation10]   ;;  %s497_s16 = int_to_ptr.vmem [resolvable:$true] %s496_s16 }
  0x61   : > { %s6162_s17 = scalar_lea.vmem %s497_s16, 2048  ;;  %s6167_s14 = sshll.u32 %s6277_s22, 4  ;;  %s6168_s14 = int_to_ptr.vmem [resolvable:$false] %s6167_s14 }
  0x62   : > { %p6163_p12 = scmp.ne.s32.totalorder %s497_s16, %s6162_s17  ;;  %s6169_s12 = scalar_lea.vmem %s6168_s14, 4096 }
  0x63   : > { %p6170_p10 = scmp.lt.s32.totalorder %s497_s16, %s6168_s14  ;;  %p6171_p1 = scmp.lt.s32.totalorder %s6169_s12, %s6162_s17 }
  0x64   : > { %p6165_p13 = pnand %p6163_p12, %p6422_p11 }
  0x65   : > { %p6172_p2 = por %p6171_p1, %p6170_p10 }
  0x66   : > { %p6166_p0 = pneg %p6165_p13 }
  0x68   : > { %p6173_p3 = pnand %p6172_p2, %p6166_p0 }
  0x6a   : > { %6176 = shalt.err (!%p6173_p3)
}
  0x6b   : > { %s6278_s5 = smov 128   ;;  %s6279_s23 = smov 8  }
  0x6c   : > { %5772 = dma.hbm_to_vmem [thread:$0]  (!%p6399_p9), %s495_s8, 2048, %s497_s16, %s6448_s0, %s6278_s5, %s6278_s5, %s6279_s23  }
  0x6d   : > { %s523_s13 = scalar_lea.hbm %s7294_s9, %s5219_s28  ;;  %s517_s10 = scalar_lea.vmem [#allocation11], %s5025_s15 }
  0x6e   : > { %s524_s1 = sshll.u32 %s517_s10, 4  ;;  %s514_s11 = scalar_lea.sflag [#allocation12], %s6397_s29  ;;  %s525_s1 = int_to_ptr.vmem [resolvable:$true] %s524_s1 }
  0x6f   : > { %s6190_s6 = scalar_lea.vmem %s525_s1, 2048  ;;  %s6280_s17 = smov [#allocation11]  }
  0x70   : > { %p6191_p4 = scmp.ne.s32.totalorder %s525_s1, %s6190_s6  ;;  %s6195_s22 = sshll.u32 %s6280_s17, 4  ;;  %s6196_s22 = int_to_ptr.vmem [resolvable:$false] %s6195_s22 }
  0x71   : > { %s6197_s14 = scalar_lea.vmem %s6196_s22, 4096  ;;  %p6198_p12 = scmp.lt.s32.totalorder %s525_s1, %s6196_s22 }
  0x72   : > { %p6193_p5 = pnand %p6191_p4, %p6422_p11  ;;  %p6199_p13 = scmp.lt.s32.totalorder %s6197_s14, %s6190_s6 }
  0x74   : > { %p6194_p8 = pneg %p6193_p5  ;;  %p6200_p0 = por %p6199_p13, %p6198_p12 }
  0x76   : > { %p6201_p10 = pnand %p6200_p0, %p6194_p8 }
  0x78   : > { %6204 = shalt.err (!%p6201_p10)
}
  0x79   : > { %5775 = dma.hbm_to_vmem [thread:$0]  (!%p6399_p9), %s523_s13, 2048, %s525_s1, %s514_s11, %s7331_s20, %s7331_s20, %s6271_s3  }
  0x7a   : > { %543 = sbr.rel (%p6441_p6) target bundleno = 10509 (0x290d), region = 64  ;;  %s545_s0 = sand.u32 (!%p6441_p6), 1, %s6251_s18  }
  0x7b   : > { %s5744_s24 = smul.u32 (!%p6441_p6), 192, %s545_s0  ;;  %s546_s29 = scalar_lea.sflag (!%p6441_p6), [#allocation4], %s545_s0 }
  0x7d   : > { %s6514_s15 = scalar_lea.vmem (!%p6441_p6), [#allocation3], %s5744_s24 }
  0x7f   : > { %6230 = dma.done.wait (%p6388_p7), %s546_s29, 3072  }
  0x80   : > { %6232 = vsyncadd (%p6388_p7), %s546_s29, 4294964224  ;;  %s7332_s30 = sld [smem:[#allocation19_spill]]  ;;  %s5032_s3 = sshll.u32 %s545_s0, 6 }
  0x81   : > { %s6522_s25 = scalar_lea.vmem [#allocation5], %s5032_s3 }
  0x86   : > { %s7333_s28 = sadd.s32 4294967295, %s7332_s30  }
  0x87   : > { %s554_s16 = sand.u32 1, %s7333_s28  }
  0x88   : > { %s555_s20 = scalar_lea.sflag [#allocation6], %s554_s16 }
  0x89   : > { %6234 = dma.done.wait (%p6388_p7), %s555_s20, 2048  }
  0x8a   : > { %6236 = vsyncadd (%p6388_p7), %s555_s20, 4294965248  ;;  %s6528_s8 = scalar_lea.vmem [#allocation7], %s5032_s3  ;;  %s573_s12 = scalar_lea.sflag [#allocation9], %s554_s16 }
  0x8b   : > { %s6530_s5 = scalar_lea.vmem [#allocation8], %s5032_s3 }
  0x8c   : > { %6238 = dma.done.wait (%p6388_p7), %s573_s12, 3072  }
  0x8d   : > { %6240 = vsyncadd (%p6388_p7), %s573_s12, 4294964224  ;;  %s5035_s23 = sshll.u32 %s545_s0, 7  ;;  %s591_s26 = scalar_lea.sflag [#allocation12], %s545_s0 }
  0x8e   : > { %s6536_s19 = scalar_lea.vmem [#allocation10], %s5035_s23  ;;  %s6538_s13 = scalar_lea.vmem [#allocation11], %s5035_s23 }
  0x8f   : > { %6242 = dma.done.wait (%p6388_p7), %s591_s26, 2048  }
  0x90   : > { %6244 = vsyncadd (%p6388_p7), %s591_s26, 4294965248  ;;  %s7334_s10 = sld [smem:[#allocation18_spill]] }
  0x91   : > { %s7335_s14 = sld [smem:[#allocation26_spill]] }
  0x92   : > { %s7336_s30 = sld [smem:[#allocation28_spill]] }
  0x93   : > { %s7337_s20 = sld [smem:[#allocation29_spill]] }
  0x96   : > { %p693_p9 = scmp.lt.s32.totalorder %s7334_s10, 1  ;;  %p5041_p7 = scmp.ne.s32.totalorder %s7334_s10, 0 }
  0x97   : > { %s7338_s2 = sld [smem:[#allocation22_spill]] (!%p5041_p7) }
  0x98   : > { %s694_s1 = scalar_select %p693_p9, %s7334_s10, 1 }
  0x99   : > { %716 = sbr.rel (%p5041_p7) target bundleno = 163 (0xa3), region = 92 }
  0x9a   : > { %s5221_s11 = sshll.u32 %s694_s1, 7  ;;  %s5039_s6 = sshll.u32 %s694_s1, 1 }
  0x9b   : > { %s6549_s24 = scalar_lea.vmem %s7335_s14, %s5221_s11  ;;  %s6554_s28 = scalar_lea.vmem %s7336_s30, %s5039_s6 }
  0x9c   : > { %s5040_s16 = sshll.u32 %s694_s1, 3  ;;  %s7339_s14 = sld [smem:[#allocation30_spill]] (!%p5041_p7) }
  0x9d   : > { %s6559_s12 = scalar_lea.vmem %s7337_s20, %s5040_s16 }
  0x9e   : > { %v717_v0 = vld [vmem:[%s7338_s2] sm:$0xff]  ;;  %v718_v1 = vld [vmem:[%s7338_s2 + $0x8] sm:$0xff] }
  0xa2   : > { %719 = vst [vmem:[%s7339_s14] sm:$0xff] %v717_v0  ;;  %720 = vst [vmem:[%s7339_s14 + $0x8] sm:$0xff] %v718_v1 }
  0xa3 PF: > { %v5837_v2 = vld [vmem:[%s6514_s15 + $0xac] ss:$12 sps:$4 sm:$0xff]   ;;  %v5839_v3 = vld [vmem:[%s6514_s15 + $0xa8] ss:$12 sps:$4 sm:$0xff]   ;;  %v6281_v4 = vmov 0   ;;  %s7340_s30 = sld [smem:[#allocation30_spill]] }
  0xa4   : > { %917 = vmatprep.mubr.bf16.mxu0 %v6281_v4  ;;  %885 = vmatprep.subr.bf16.mxu0 %v5837_v2  ;;  %v5840_v5 = vld [vmem:[%s6514_s15 + $0x94] ss:$12 sps:$4 sm:$0xff]   ;;  %v5842_v6 = vld [vmem:[%s6514_s15 + $0x90] ss:$12 sps:$4 sm:$0xff]   ;;  %v5845_v8 = vld [vmem:[%s6514_s15 + $0x78] ss:$12 sps:$4 sm:$0xff]  }
  0xa5   : > { %886 = vmatpush1.bf16.msra.mxu0 %v5839_v3  ;;  %v5843_v7 = vld [vmem:[%s6514_s15 + $0x7c] ss:$12 sps:$4 sm:$0xff]   ;;  %v5846_v9 = vld [vmem:[%s6514_s15 + $0x64] ss:$12 sps:$4 sm:$0xff]   ;;  %v5848_v10 = vld [vmem:[%s6514_s15 + $0x60] ss:$12 sps:$4 sm:$0xff]  }
  0xa6   : > { %887 = vmatprep.subr.bf16.mxu0 %v5840_v5  ;;  %v5849_v11 = vld [vmem:[%s6514_s15 + $0x4c] ss:$12 sps:$4 sm:$0xff]   ;;  %v5851_v12 = vld [vmem:[%s6514_s15 + $0x48] ss:$12 sps:$4 sm:$0xff]   ;;  %v5854_v14 = vld [vmem:[%s6514_s15 + $0x30] ss:$12 sps:$4 sm:$0xff]  }
  0xa7   : > { %v5852_v13 = vld [vmem:[%s6514_s15 + $0x34] ss:$12 sps:$4 sm:$0xff]   ;;  %v5855_v15 = vld [vmem:[%s6514_s15 + $0x1c] ss:$12 sps:$4 sm:$0xff]   ;;  %v5857_v16 = vld [vmem:[%s6514_s15 + $0x18] ss:$12 sps:$4 sm:$0xff]  }
  0xa8   : > { %v5858_v17 = vld [vmem:[%s6514_s15 + $0x4] ss:$12 sps:$4 sm:$0xff]   ;;  %v5860_v18 = vld [vmem:[%s6514_s15] ss:$12 sps:$4 sm:$0xff]   ;;  %v6282_v22 = vmov 0.0   ;;  %vm6283_vm0 = vmmov 0  }
  0xa9   : > { %888 = vmatpush1.bf16.msra.mxu0 %v5842_v6  ;;  %v6594_v19 = vld [vmem:[%s7340_s30] sm:$0xff]  ;;  %v722_v20 = vld [vmem:[%s7340_s30 + $0x8] sm:$0xff]  ;;  %5382 = vmatprep.subr.bf16.mxu1 %v6282_v22  ;;  %vm985_vm1 = vcmask 261120   ;;  %s6284_s27 = smov 96   ;;  %v5861_v25 = vld [vmem:[%s6514_s15 + $0xb0] ss:$12 sps:$4 sm:$0xff]  }
  0xaa   : > { %889 = vmatprep.subr.bf16.mxu0 %v5843_v7  ;;  %v724_v21 = vpack.c.bf16 %v722_v20, %v6594_v19  ;;  %5398 = vmatprep.mubr.msk.bf16.mxu1 %vm6283_vm0, %v6282_v22  ;;  %v5862_v26 = vld [vmem:[%s6514_s15 + $0x98] ss:$12 sps:$4 sm:$0xff]   ;;  %v5863_v27 = vld [vmem:[%s6514_s15 + $0x80] ss:$12 sps:$4 sm:$0xff]   ;;  %v5864_v28 = vld [vmem:[%s6514_s15 + $0x68] ss:$12 sps:$4 sm:$0xff]  }
  0xab   : > { %5383 = vmatpush3.bf16.msra.mxu1 %v5861_v25  ;;  %v5865_v29 = vld [vmem:[%s6514_s15 + $0x50] ss:$12 sps:$4 sm:$0xff]   ;;  %v5866_v30 = vld [vmem:[%s6514_s15 + $0x38] ss:$12 sps:$4 sm:$0xff]   ;;  %v5867_v31 = vld [vmem:[%s6514_s15 + $0x20] ss:$12 sps:$4 sm:$0xff]  }
  0xac   : > { %5384 = vmatprep.subr.bf16.mxu1 %v6282_v22  ;;  %v5868_v32 = vld [vmem:[%s6514_s15 + $0x8] ss:$12 sps:$4 sm:$0xff]   ;;  %vm1063_vm2 = vcmask 64512   ;;  %vm1080_vm3 = vcmask 1043456   ;;  %s6285_s15 = smov 64   ;;  %s6286_s20 = smov 32  }
  0xad   : > { %890 = vmatpush1.bf16.msra.mxu0 %v5845_v8  ;;  %v6671_v3 = vld [vmem:[%s6522_s25 + $0x8] sm:$0xff]   ;;  %v6676_v8 = vld [vmem:[%s6522_s25 + $0x18] sm:$0xff]   ;;  %s7341_s17 = sld [smem:[#allocation23_spill]]  ;;  %vm2908_vm4 = vcmask 130048  }
  0xae   : > { %891 = vmatprep.subr.bf16.mxu0 %v5846_v9 }
  0xaf   : > { %5385 = vmatpush3.bf16.msra.mxu1 %v5862_v26 }
  0xb0   : > { %5386 = vmatprep.subr.bf16.mxu1 %v6282_v22 }
  0xb1   : > { %892 = vmatpush1.bf16.msra.mxu0 %v5848_v10  ;;  %v6681_v10 = vld [vmem:[%s6522_s25 + $0x10] sm:$0xff]  }
  0xb2   : > { %893 = vmatprep.subr.bf16.mxu0 %v5849_v11 }
  0xb3   : > { %5387 = vmatpush3.bf16.msra.mxu1 %v5863_v27  ;;  %s7342_s6 = smov %s7341_s17 }
  0xb4   : > { %5388 = vmatprep.subr.bf16.mxu1 %v6282_v22 }
  0xb5   : > { %894 = vmatpush1.bf16.msra.mxu0 %v5851_v12 }
  0xb6   : > { %895 = vmatprep.subr.bf16.mxu0 %v5852_v13 }
  0xb7   : > { %5389 = vmatpush3.bf16.msra.mxu1 %v5864_v28 }
  0xb8   : > { %5390 = vmatprep.subr.bf16.mxu1 %v6282_v22 }
  0xb9   : > { %896 = vmatpush1.bf16.msra.mxu0 %v5854_v14 }
  0xba   : > { %897 = vmatprep.subr.bf16.mxu0 %v5855_v15 }
  0xbb   : > { %5391 = vmatpush3.bf16.msra.mxu1 %v5865_v29 }
  0xbc   : > { %5392 = vmatprep.subr.bf16.mxu1 %v6282_v22 }
  0xbd   : > { %898 = vmatpush1.bf16.msra.mxu0 %v5857_v16 }
  0xbe   : > { %899 = vmatprep.subr.bf16.mxu0 %v5858_v17 }
  0xbf   : > { %5393 = vmatpush3.bf16.msra.mxu1 %v5866_v30 }
  0xc0   : > { %5394 = vmatprep.subr.bf16.mxu1 %v6282_v22 }
  0xc1   : > { %900 = vmatpush1.bf16.msra.mxu0 %v5860_v18  ;;  %v6697_v18 = vld [vmem:[%s6522_s25] sm:$0xff]  }
  0xc2   : > { %5402 = vmatprep.subr.mxu0 %v6282_v22 }
  0xc3   : > { %5395 = vmatpush3.bf16.msra.mxu1 %v5867_v31 }
  0xc4   : > { %918 = vmatmul.mubr.bf16.vlgmr.msra.gmra.mxu0 %v724_v21  ;;  %5396 = vmatprep.subr.bf16.mxu1 %v6282_v22 }
  0xc5   : > { %5404 = vmatprep.mubr.msk.f32.mxu0 %vm6283_vm0, %v6282_v22 }
  0xc7   : > { %5397 = vmatpush3.bf16.msra.mxu1 %v5868_v32 }
  0xc8   : > { %5407 = vmatprep.subr.bf16.mxu1 %v6282_v22 }
  0xca   : > { %5399 = vmatmul.mubr.bf16.vlgmr.msra.gmra.mxu1 %v724_v21 }
  0xcb   : > { %5409 = vmatprep.mubr.msk.bf16.mxu1 %vm6283_vm0, %v6282_v22 }
 0x184   : > { %v6606_v23 = vpop.f32.mrf.mxu0 }
 0x186   : > { %v6608_v24 = vpop.f32.mrf.mxu0 }
 0x187   : > { %1127 = vrot.lane.b32.xlu0 %v6608_v24, %s6284_s27  ;;  %5403 = vmatpush3.xpose.msk.msra.mxu0 %vm985_vm1, %v6608_v24 }
 0x188   : > { %5413 = vmatprep.subr.mxu0 %v6282_v22  ;;  %v6644_v35 = vpop.f32.mrf.mxu0 }
 0x18a   : > { %5405 = vmatmul.mubr.msk.f32.vlgmr.msra.gmra.mxu0 %vm985_vm1, %v6606_v23  ;;  %v6646_v36 = vpop.f32.mrf.mxu0  ;;  %v962_v43 = vpop.f32.mrf.mxu1 }
 0x18b   : > { %1125 = vrot.lane.b32.xlu0 %v6606_v23, %s6284_s27  ;;  %5415 = vmatprep.mubr.msk.f32.mxu0 %vm6283_vm0, %v6282_v22  ;;  %v6649_v44 = vpack.c.bf16 %v962_v43, %v962_v43 }
 0x18c   : > { %v5400_v45 = vpop.f32.mrf.mxu1 }
 0x18d   : > { %v1082_v46 = vsel %vm1080_vm3, %v6649_v44, 0 }
 0x18e   : > { %v6655_v47 = vpop.f32.mrf.mxu1  ;;  %5408 = vmatpush3.bf16.msra.mxu1 %v1082_v46 }
 0x18f   : > { %1217 = vrot.lane.b32.xlu0 %v6649_v44, %s6284_s27  ;;  %5424 = vmatprep.subr.bf16.mxu1 %v6282_v22 }
 0x190   : > { %v5401_v48 = vpop.f32.mrf.mxu1 }
 0x1f9   : > { %v1128_v33 = vpop.permute.xlu0 %1127 }
 0x1fa   : > { %5414 = vmatpush3.xpose.msk.msra.mxu0 %vm985_vm1, %v1128_v33 }
 0x1fb   : > { %5418 = vmatprep.subr.bf16.mxu0 %v6282_v22 }
 0x1fd   : > { %v1126_v34 = vpop.permute.xlu0 %1125 }
 0x1fe   : > { %5416 = vmatmul.mubr.msk.f32.vlgmr.msra.gmra.mxu0 %vm985_vm1, %v1126_v34 }
 0x1ff   : > { %5420 = vmatprep.mubr.msk.bf16.mxu0 %vm6283_vm0, %v6282_v22 }
 0x201   : > { %v1218_v56 = vpop.permute.xlu0 %1217 }
 0x202   : > { %v1223_v57 = vsel %vm1080_vm3, %v1218_v56, 0  ;;  %v6730_v56 = vld [vmem:[%s6522_s25 + $0x20] sm:$0xff]  }
 0x203   : > { %5419 = vmatpush3.bf16.msra.mxu0 %v1223_v57 }
 0x204   : > { %5432 = vmatprep.subr.bf16.mxu0 %v6282_v22 }
 0x24a   : > { %v1058_v37 = vpop.f32.mrf.mxu0 }
 0x24b   : > { %v1062_v53 = vmul.f32 0.17677669, %v1058_v37 }
 0x24c   : > { %v5406_v38 = vpop.f32.mrf.mxu0 }
 0x24d   : > { %v1064_v55 = vsel %vm1063_vm2, %v1062_v53, -inf }
 0x2be   : > { %v1199_v39 = vpop.f32.mrf.mxu0 }
 0x2bf   : > { %v1203_v40 = vmul.f32 0.17677669, %v1199_v39 }
 0x2c0   : > { %v5417_v41 = vpop.f32.mrf.mxu0 }
 0x2c1   : > { %v1204_v42 = vsel %vm1063_vm2, %v1203_v40, -inf }
 0x2c2   : > { %1205 = vmax.xlane.f32.xlu1 %v1204_v42 }
 0x34b   : > { %v1206_v49 = vpop.xlane.xlu1 %1205 }
 0x34c   : > { %v1207_v50 = vsub.f32 %v1203_v40, %v1206_v49  ;;  %v6715_v49 = vld [vmem:[%s6522_s25 + $0x28] sm:$0xff]  }
 0x34e   : > { %v1208_v51 = vmul.f32 1.442695, %v1207_v50 }
 0x350   : > { %5959 = vpow2.f32 %v1208_v51 }
 0x35d   : > { %v5960_v52 = vpop.eup %5959 }
 0x35e   : > { %v1210_v54 = vsel %vm1063_vm2, %v5960_v52, 0.0 }
 0x35f   : > { %1211 = vadd.xlane.f32.xlu1 %v1210_v54 }
 0x363   : > { %1065 = vmax.xlane.f32.xlu1 %v1064_v55 }
 0x374   : > { %1378 = vrot.lane.b32.xlu1 %v6608_v24, %s6285_s15 }
 0x378   : > { %1376 = vrot.lane.b32.xlu1 %v6606_v23, %s6285_s15 }
 0x3e8   : > { %v1212_v58 = vpop.xlane.xlu1 %1211 }
 0x3e9   : > { %5961 = vrcp.f32 %v1212_v58 }
 0x3ec   : > { %v1066_v59 = vpop.xlane.xlu1 %1065 }
 0x3ed   : > { %v1067_v60 = vsub.f32 %v1062_v53, %v1066_v59 }
 0x3ef   : > { %v1068_v61 = vmul.f32 1.442695, %v1067_v60 }
 0x3f0   : > { %v1379_v14 = vpop.permute.xlu1 %1378 }
 0x3f1   : > { %5963 = vpow2.f32 %v1068_v61 }
 0x3f4   : > { %v1377_v17 = vpop.permute.xlu1 %1376 }
 0x3f6   : > { %v5962_v62 = vpop.eup %5961 }
 0x3f7   : > { %v1214_v63 = vmul.f32 %v5962_v62, %v5960_v52 }
 0x3f9   : > { %v1215_v0 = vpack.c.bf16 %v1214_v63, %v1214_v63 }
 0x3fb   : > { %5421 = vmatmul.mubr.msk.bf16.vlgmr.msra.gmra.mxu0 %vm1063_vm2, %v1215_v0 }
 0x3fc   : > { %5436 = vmatprep.mubr.msk.bf16.mxu0 %vm6283_vm0, %v6282_v22  ;;  %5433 = vmatpush3.bf16.msra.mxu0 %v6671_v3 }
 0x3fd   : > { %5434 = vmatprep.subr.bf16.mxu0 %v6282_v22 }
 0x3fe   : > { %v5964_v1 = vpop.eup %5963 }
 0x3ff   : > { %v1070_v2 = vsel %vm1063_vm2, %v5964_v1, 0.0 }
 0x400   : > { %1071 = vadd.xlane.f32.xlu0 %v1070_v2  ;;  %5435 = vmatpush3.bf16.msra.mxu0 %v6697_v18 }
 0x401   : > { %5451 = vmatprep.subr.bf16.mxu0 %v6282_v22 }
 0x489   : > { %v1072_v5 = vpop.xlane.xlu0 %1071 }
 0x48a   : > { %5965 = vrcp.f32 %v1072_v5 }
 0x497   : > { %v5966_v6 = vpop.eup %5965 }
 0x498   : > { %v1074_v7 = vmul.f32 %v5966_v6, %v5964_v1 }
 0x49a   : > { %v1075_v9 = vpack.c.bf16 %v1074_v7, %v1074_v7 }
 0x49c   : > { %5410 = vmatmul.mubr.msk.bf16.vlgmr.msra.gmra.mxu1 %vm1063_vm2, %v1075_v9 }
 0x49d   : > { %5425 = vmatpush3.bf16.msra.mxu1 %v6676_v8  ;;  %5428 = vmatprep.mubr.msk.bf16.mxu1 %vm6283_vm0, %v6282_v22 }
 0x49e   : > { %5426 = vmatprep.subr.bf16.mxu1 %v6282_v22 }
 0x4a1   : > { %5427 = vmatpush3.bf16.msra.mxu1 %v6681_v10 }
 0x4a2   : > { %5440 = vmatprep.subr.mxu1 %v6282_v22 }
 0x4bb   : > { %v1259_v11 = vpop.f32.mrf.mxu0 }
 0x4bc   : > { %v1265_v12 = vpack.c.bf16 %v1259_v11, %v1259_v11 }
 0x4bd   : > { %v5422_v13 = vpop.f32.mrf.mxu0 }
 0x4be   : > { %5429 = vmatmul.mubr.msk.bf16.vlgmr.msra.gmra.mxu1 %vm985_vm1, %v1265_v12 }
 0x4bf   : > { %5441 = vmatpush3.xpose.msk.msra.mxu1 %vm985_vm1, %v1379_v14  ;;  %v1262_v15 = vpop.f32.mrf.mxu0  ;;  %5442 = vmatprep.mubr.msk.f32.mxu1 %vm6283_vm0, %v6282_v22 }
 0x4c0   : > { %5445 = vmatprep.subr.bf16.mxu1 %v6282_v22 }
 0x4c1   : > { %v5423_v16 = vpop.f32.mrf.mxu0 }
 0x4c6   : > { %5443 = vmatmul.mubr.msk.f32.vlgmr.msra.gmra.mxu1 %vm985_vm1, %v1377_v17 }
 0x4c7   : > { %5447 = vmatprep.mubr.msk.bf16.mxu1 %vm6283_vm0, %v6282_v22 }
 0x55c   : > { %v1118_v20 = vpop.f32.mrf.mxu1 }
 0x55d   : > { %v1124_v21 = vpack.c.bf16 %v1118_v20, %v1118_v20  ;;  %v6749_v20 = vld [vmem:[%s6522_s25 + $0x38] sm:$0xff]  }
 0x55e   : > { %v5411_v25 = vpop.f32.mrf.mxu1 }
 0x55f   : > { %5437 = vmatmul.mubr.msk.bf16.vlgmr.msra.gmra.mxu0 %vm985_vm1, %v1124_v21  ;;  %v6753_v21 = vld [vmem:[%s6522_s25 + $0x30] sm:$0xff]  }
 0x560   : > { %v1121_v26 = vpop.f32.mrf.mxu1  ;;  %5455 = vmatprep.mubr.msk.bf16.mxu0 %vm6283_vm0, %v6282_v22  ;;  %5452 = vmatpush3.bf16.msra.mxu0 %v6715_v49 }
 0x561   : > { %5453 = vmatprep.subr.bf16.mxu0 %v6282_v22 }
 0x562   : > { %v5412_v27 = vpop.f32.mrf.mxu1 }
 0x564   : > { %5454 = vmatpush3.bf16.msra.mxu0 %v6730_v56 }
 0x565   : > { %5464 = vmatprep.subr.bf16.mxu0 %v6282_v22 }
 0x57e   : > { %v6704_v28 = vpop.f32.mrf.mxu1 }
 0x580   : > { %v5430_v29 = vpop.f32.mrf.mxu1 }
 0x581   : > { %v6766_v29 = vpack.c.bf16 %v6655_v47, %v6655_v47 }
 0x582   : > { %v1318_v30 = vpop.f32.mrf.mxu1 }
 0x583   : > { %v1863_v30 = vsel %vm1080_vm3, %v6766_v29, 0 }
 0x584   : > { %v5431_v31 = vpop.f32.mrf.mxu1 }
 0x586   : > { %v1450_v32 = vpop.f32.mrf.mxu1 }
 0x587   : > { %v1454_v33 = vmul.f32 0.17677669, %v1450_v32 }
 0x588   : > { %v5444_v34 = vpop.f32.mrf.mxu1 }
 0x589   : > { %v1455_v37 = vsel %vm1063_vm2, %v1454_v33, -inf }
 0x58a   : > { %1456 = vmax.xlane.f32.xlu1 %v1455_v37 }
 0x59b   : > { %1572 = vrot.lane.b32.xlu1 %v6606_v23, %s6286_s20 }
 0x613   : > { %v1457_v38 = vpop.xlane.xlu1 %1456 }
 0x614   : > { %v1458_v39 = vsub.f32 %v1454_v33, %v1457_v38 }
 0x616   : > { %v1459_v40 = vmul.f32 1.442695, %v1458_v39 }
 0x618   : > { %5967 = vpow2.f32 %v1459_v40 }
 0x61f   : > { %v1370_v41 = vpop.f32.mrf.mxu0 }
 0x621   : > { %v5438_v42 = vpop.f32.mrf.mxu0 }
 0x623   : > { %v1373_v43 = vpop.f32.mrf.mxu0 }
 0x625   : > { %v5968_v45 = vpop.eup %5967  ;;  %v5439_v46 = vpop.f32.mrf.mxu0 }
 0x626   : > { %v1461_v48 = vsel %vm1063_vm2, %v5968_v45, 0.0 }
 0x627   : > { %1462 = vadd.xlane.f32.xlu0 %v1461_v48 }
 0x63d   : > { %1467 = vrot.lane.b32.xlu0 %v6649_v44, %s6285_s15 }
 0x641   : > { %1574 = vrot.lane.b32.xlu0 %v6608_v24, %s6286_s20  ;;  %v1573_v24 = vpop.permute.xlu1 %1572 }
 0x6b0   : > { %v1463_v23 = vpop.xlane.xlu0 %1462 }
 0x6b1   : > { %5969 = vrcp.f32 %v1463_v23 }
 0x6b4   : > { %v1468_v50 = vpop.permute.xlu0 %1467 }
 0x6b5   : > { %v1473_v51 = vsel %vm1080_vm3, %v1468_v50, 0 }
 0x6b6   : > { %5446 = vmatpush3.bf16.msra.mxu1 %v1473_v51 }
 0x6b7   : > { %5459 = vmatprep.subr.mxu1 %v6282_v22 }
 0x6b8   : > { %v1575_v55 = vpop.permute.xlu0 %1574 }
 0x6be   : > { %v5970_v52 = vpop.eup %5969 }
 0x6bf   : > { %v1465_v53 = vmul.f32 %v5970_v52, %v5968_v45 }
 0x6c1   : > { %v1466_v54 = vpack.c.bf16 %v1465_v53, %v1465_v53 }
 0x6c3   : > { %5448 = vmatmul.mubr.msk.bf16.vlgmr.msra.gmra.mxu1 %vm1063_vm2, %v1466_v54 }
 0x6c4   : > { %5460 = vmatpush3.xpose.msk.msra.mxu1 %vm985_vm1, %v1575_v55  ;;  %5461 = vmatprep.mubr.msk.f32.mxu1 %vm6283_vm0, %v6282_v22 }
 0x6c5   : > { %5470 = vmatprep.subr.bf16.mxu1 %v6282_v22 }
 0x6cb   : > { %5462 = vmatmul.mubr.msk.f32.vlgmr.msra.gmra.mxu1 %vm985_vm1, %v1573_v24 }
 0x6cc   : > { %5474 = vmatprep.mubr.msk.bf16.mxu1 %vm6283_vm0, %v6282_v22  ;;  %5471 = vmatpush3.bf16.msra.mxu1 %v6749_v20 }
 0x6cd   : > { %5472 = vmatprep.subr.bf16.mxu1 %v6282_v22 }
 0x6d0   : > { %5473 = vmatpush3.bf16.msra.mxu1 %v6753_v21 }
 0x6d1   : > { %5489 = vmatprep.subr.mxu1 %v6282_v22 }
 0x783   : > { %v1509_v57 = vpop.f32.mrf.mxu1 }
 0x784   : > { %v1515_v58 = vpack.c.bf16 %v1509_v57, %v1509_v57 }
 0x785   : > { %v5449_v59 = vpop.f32.mrf.mxu1 }
 0x786   : > { %5456 = vmatmul.mubr.msk.bf16.vlgmr.msra.gmra.mxu0 %vm985_vm1, %v1515_v58 }
 0x787   : > { %v1512_v60 = vpop.f32.mrf.mxu1  ;;  %5466 = vmatprep.mubr.msk.bf16.mxu0 %vm6283_vm0, %v6282_v22 }
 0x789   : > { %v5450_v61 = vpop.f32.mrf.mxu1 }
 0x78b   : > { %v1646_v62 = vpop.f32.mrf.mxu1 }
 0x78c   : > { %v1650_v63 = vmul.f32 0.17677669, %v1646_v62 }
 0x78d   : > { %v5463_v0 = vpop.f32.mrf.mxu1 }
 0x78e   : > { %v1651_v1 = vsel %vm1063_vm2, %v1650_v63, -inf }
 0x78f   : > { %1652 = vmax.xlane.f32.xlu0 %v1651_v1 }
 0x7a5   : > { %1663 = vrot.lane.b32.xlu0 %v6649_v44, %s6286_s20  ;;  %v1371_v44 = vadd.f32 %v1370_v41, %v6704_v28 }
 0x7a9   : > { %1906 = vrot.lane.b32.xlu0 %v6644_v35, %s6284_s27 }
 0x818   : > { %v1653_v2 = vpop.xlane.xlu0 %1652 }
 0x819   : > { %v1654_v5 = vsub.f32 %v1650_v63, %v1653_v2 }
 0x81b   : > { %v1655_v6 = vmul.f32 1.442695, %v1654_v5 }
 0x81c   : > { %v1664_v7 = vpop.permute.xlu0 %1663 }
 0x81d   : > { %5971 = vpow2.f32 %v1655_v6  ;;  %v1669_v9 = vsel %vm1080_vm3, %v1664_v7, 0 }
 0x81e   : > { %5465 = vmatpush3.bf16.msra.mxu0 %v1669_v9 }
 0x81f   : > { %5478 = vmatprep.subr.mxu0 %v6282_v22 }
 0x820   : > { %v1907_v39 = vpop.permute.xlu0 %1906 }
 0x82a   : > { %v5972_v11 = vpop.eup %5971 }
 0x82b   : > { %v1657_v12 = vsel %vm1063_vm2, %v5972_v11, 0.0 }
 0x82c   : > { %1658 = vadd.xlane.f32.xlu1 %v1657_v12 }
 0x83d   : > { %1908 = vrot.lane.b32.xlu1 %v6646_v36, %s6284_s27 }
 0x846   : > { %v1565_v13 = vpop.f32.mrf.mxu0 }
 0x847   : > { %v1571_v14 = vadd.f32 %v1565_v13, %v1371_v44 }
 0x848   : > { %v5457_v15 = vpop.f32.mrf.mxu0 }
 0x84a   : > { %v1568_v16 = vpop.f32.mrf.mxu0 }
 0x84c   : > { %v5458_v17 = vpop.f32.mrf.mxu0 }
 0x8b5   : > { %v1659_v25 = vpop.xlane.xlu1 %1658 }
 0x8b6   : > { %5973 = vrcp.f32 %v1659_v25 }
 0x8b9   : > { %v1909_v34 = vpop.permute.xlu1 %1908 }
 0x8c3   : > { %v5974_v26 = vpop.eup %5973 }
 0x8c4   : > { %v1661_v27 = vmul.f32 %v5974_v26, %v5972_v11 }
 0x8c6   : > { %v1662_v28 = vpack.c.bf16 %v1661_v27, %v1661_v27 }
 0x8c8   : > { %5467 = vmatmul.mubr.msk.bf16.vlgmr.msra.gmra.mxu0 %vm1063_vm2, %v1662_v28 }
 0x8c9   : > { %5479 = vmatpush3.xpose.msk.msra.mxu0 %vm985_vm1, %v6646_v36  ;;  %5480 = vmatprep.mubr.msk.f32.mxu0 %vm6283_vm0, %v6282_v22 }
 0x8ca   : > { %5483 = vmatprep.subr.bf16.mxu0 %v6282_v22 }
 0x8d0   : > { %5481 = vmatmul.mubr.msk.f32.vlgmr.msra.gmra.mxu0 %vm985_vm1, %v6644_v35 }
 0x8d1   : > { %5484 = vmatpush3.bf16.msra.mxu0 %v1863_v30  ;;  %5485 = vmatprep.mubr.msk.bf16.mxu0 %vm6283_vm0, %v6282_v22 }
 0x8d2   : > { %5500 = vmatprep.subr.bf16.mxu0 %v6282_v22 }
 0x988   : > { %v1705_v31 = vpop.f32.mrf.mxu0 }
 0x989   : > { %v1711_v32 = vpack.c.bf16 %v1705_v31, %v1705_v31 }
 0x98a   : > { %v5468_v33 = vpop.f32.mrf.mxu0 }
 0x98b   : > { %5475 = vmatmul.mubr.msk.bf16.vlgmr.msra.gmra.mxu1 %vm985_vm1, %v1711_v32 }
 0x98c   : > { %5490 = vmatpush3.xpose.msk.msra.mxu1 %vm985_vm1, %v1909_v34  ;;  %v1708_v47 = vpop.f32.mrf.mxu0  ;;  %5491 = vmatprep.mubr.msk.f32.mxu1 %vm6283_vm0, %v6282_v22 }
 0x98d   : > { %5494 = vmatprep.subr.bf16.mxu1 %v6282_v22 }
 0x98e   : > { %v5469_v37 = vpop.f32.mrf.mxu0 }
 0x990   : > { %v1841_v38 = vpop.f32.mrf.mxu0 }
 0x991   : > { %v1845_v58 = vmul.f32 0.17677669, %v1841_v38 }
 0x992   : > { %v5482_v40 = vpop.f32.mrf.mxu0 }
 0x993   : > { %5492 = vmatmul.mubr.msk.f32.vlgmr.msra.gmra.mxu1 %vm985_vm1, %v1907_v39  ;;  %v1846_v60 = vsel %vm1063_vm2, %v1845_v58, -inf }
 0x994   : > { %5496 = vmatprep.mubr.msk.bf16.mxu1 %vm6283_vm0, %v6282_v22 }
 0xa4b   : > { %v1761_v41 = vpop.f32.mrf.mxu1 }
 0xa4c   : > { %v6783_v42 = vadd.f32 %v1761_v41, %v1571_v14 }
 0xa4d   : > { %v5476_v43 = vpop.f32.mrf.mxu1 }
 0xa4f   : > { %v1764_v45 = vpop.f32.mrf.mxu1 }
 0xa51   : > { %v5477_v46 = vpop.f32.mrf.mxu1 }
 0xa53   : > { %v1980_v48 = vpop.f32.mrf.mxu1 }
 0xa54   : > { %v1984_v23 = vmul.f32 0.17677669, %v1980_v48 }
 0xa55   : > { %v5493_v50 = vpop.f32.mrf.mxu1 }
 0xa56   : > { %v1985_v51 = vsel %vm1063_vm2, %v1984_v23, -inf }
 0xa57   : > { %1986 = vmax.xlane.f32.xlu0 %v1985_v51 }
 0xa6d   : > { %1998 = vrot.lane.b32.xlu0 %v6766_v29, %s6284_s27 }
 0xa71   : > { %2135 = vrot.lane.b32.xlu0 %v6646_v36, %s6285_s15 }
 0xae0   : > { %v1987_v52 = vpop.xlane.xlu0 %1986 }
 0xae1   : > { %v1988_v53 = vsub.f32 %v1984_v23, %v1987_v52 }
 0xae3   : > { %v1989_v54 = vmul.f32 1.442695, %v1988_v53 }
 0xae4   : > { %v1999_v55 = vpop.permute.xlu0 %1998 }
 0xae5   : > { %5975 = vpow2.f32 %v1989_v54  ;;  %v2004_v24 = vsel %vm1080_vm3, %v1999_v55, 0 }
 0xae6   : > { %5495 = vmatpush3.bf16.msra.mxu1 %v2004_v24 }
 0xae7   : > { %5508 = vmatprep.subr.bf16.mxu1 %v6282_v22 }
 0xae8   : > { %v2136_v14 = vpop.permute.xlu0 %2135 }
 0xaf2   : > { %v5976_v57 = vpop.eup %5975 }
 0xaf3   : > { %v1991_v59 = vsel %vm1063_vm2, %v5976_v57, 0.0 }
 0xaf4   : > { %1992 = vadd.xlane.f32.xlu1 %v1991_v59 }
 0xaf8   : > { %1847 = vmax.xlane.f32.xlu1 %v1846_v60 }
 0xb7d   : > { %v1993_v61 = vpop.xlane.xlu1 %1992 }
 0xb7e   : > { %5977 = vrcp.f32 %v1993_v61 }
 0xb81   : > { %v1848_v62 = vpop.xlane.xlu1 %1847 }
 0xb82   : > { %v1849_v63 = vsub.f32 %v1845_v58, %v1848_v62 }
 0xb84   : > { %v1850_v0 = vmul.f32 1.442695, %v1849_v63 }
 0xb86   : > { %5979 = vpow2.f32 %v1850_v0 }
 0xb8b   : > { %v5978_v1 = vpop.eup %5977 }
 0xb8c   : > { %v1995_v2 = vmul.f32 %v5978_v1, %v5976_v57 }
 0xb8e   : > { %v1996_v5 = vpack.c.bf16 %v1995_v2, %v1995_v2 }
 0xb90   : > { %5497 = vmatmul.mubr.msk.bf16.vlgmr.msra.gmra.mxu1 %vm1063_vm2, %v1996_v5 }
 0xb91   : > { %5509 = vmatpush3.bf16.msra.mxu1 %v6671_v3  ;;  %5512 = vmatprep.mubr.msk.bf16.mxu1 %vm6283_vm0, %v6282_v22 }
 0xb92   : > { %5510 = vmatprep.subr.bf16.mxu1 %v6282_v22 }
 0xb93   : > { %v5980_v6 = vpop.eup %5979 }
 0xb94   : > { %v1852_v7 = vsel %vm1063_vm2, %v5980_v6, 0.0 }
 0xb95   : > { %1853 = vadd.xlane.f32.xlu1 %v1852_v7  ;;  %5511 = vmatpush3.bf16.msra.mxu1 %v6697_v18 }
 0xb96   : > { %5527 = vmatprep.subr.bf16.mxu1 %v6282_v22 }
 0xba6   : > { %2133 = vrot.lane.b32.xlu1 %v6644_v35, %s6285_s15 }
 0xc1e   : > { %v1854_v9 = vpop.xlane.xlu1 %1853 }
 0xc1f   : > { %5981 = vrcp.f32 %v1854_v9 }
 0xc22   : > { %v2134_v16 = vpop.permute.xlu1 %2133 }
 0xc2c   : > { %v5982_v11 = vpop.eup %5981 }
 0xc2d   : > { %v1856_v3 = vmul.f32 %v5982_v11, %v5980_v6  ;;  %v2504_v6 = vadd.f32 %v6783_v42, %v6594_v19 }
 0xc2f   : > { %v1857_v12 = vpack.c.bf16 %v1856_v3, %v1856_v3 }
 0xc31   : > { %5486 = vmatmul.mubr.msk.bf16.vlgmr.msra.gmra.mxu0 %vm1063_vm2, %v1857_v12 }
 0xc32   : > { %5501 = vmatpush3.bf16.msra.mxu0 %v6676_v8  ;;  %5504 = vmatprep.mubr.msk.bf16.mxu0 %vm6283_vm0, %v6282_v22 }
 0xc33   : > { %5502 = vmatprep.subr.bf16.mxu0 %v6282_v22 }
 0xc36   : > { %5503 = vmatpush3.bf16.msra.mxu0 %v6681_v10 }
 0xc37   : > { %5516 = vmatprep.subr.mxu0 %v6282_v22 }
 0xc50   : > { %v2040_v18 = vpop.f32.mrf.mxu1 }
 0xc51   : > { %v2046_v44 = vpack.c.bf16 %v2040_v18, %v2040_v18 }
 0xc52   : > { %v5498_v13 = vpop.f32.mrf.mxu1 }
 0xc53   : > { %5505 = vmatmul.mubr.msk.bf16.vlgmr.msra.gmra.mxu0 %vm985_vm1, %v2046_v44 }
 0xc54   : > { %5517 = vmatpush3.xpose.msk.msra.mxu0 %vm985_vm1, %v2136_v14  ;;  %v2043_v15 = vpop.f32.mrf.mxu1  ;;  %5518 = vmatprep.mubr.msk.f32.mxu0 %vm6283_vm0, %v6282_v22 }
 0xc55   : > { %5521 = vmatprep.subr.bf16.mxu0 %v6282_v22 }
 0xc56   : > { %v5499_v8 = vpop.f32.mrf.mxu1 }
 0xc5b   : > { %5519 = vmatmul.mubr.msk.f32.vlgmr.msra.gmra.mxu0 %vm985_vm1, %v2134_v16 }
 0xc5c   : > { %5523 = vmatprep.mubr.msk.bf16.mxu0 %vm6283_vm0, %v6282_v22 }
 0xcf1   : > { %v1899_v10 = vpop.f32.mrf.mxu0 }
 0xcf2   : > { %v1905_v17 = vpack.c.bf16 %v1899_v10, %v1899_v10 }
 0xcf3   : > { %v5487_v25 = vpop.f32.mrf.mxu0 }
 0xcf4   : > { %5513 = vmatmul.mubr.msk.bf16.vlgmr.msra.gmra.mxu1 %vm985_vm1, %v1905_v17 }
 0xcf5   : > { %v1902_v26 = vpop.f32.mrf.mxu0  ;;  %5528 = vmatpush3.bf16.msra.mxu1 %v6715_v49  ;;  %5531 = vmatprep.mubr.msk.bf16.mxu1 %vm6283_vm0, %v6282_v22 }
 0xcf6   : > { %5529 = vmatprep.subr.bf16.mxu1 %v6282_v22 }
 0xcf7   : > { %v5488_v27 = vpop.f32.mrf.mxu0 }
 0xcf9   : > { %5530 = vmatpush3.bf16.msra.mxu1 %v6730_v56 }
 0xcfa   : > { %5540 = vmatprep.subr.bf16.mxu1 %v6282_v22 }
 0xd13   : > { %v6826_v28 = vpop.f32.mrf.mxu0 }
 0xd15   : > { %v5506_v30 = vpop.f32.mrf.mxu0 }
 0xd17   : > { %v2087_v31 = vpop.f32.mrf.mxu0 }
 0xd18   : > { %v6035_v31 = vld [vmem:[%s7340_s30 + $0x8] sm:$0xff] }
 0xd19   : > { %v5507_v32 = vpop.f32.mrf.mxu0 }
 0xd1b   : > { %v2207_v33 = vpop.f32.mrf.mxu0 }
 0xd1c   : > { %v2211_v34 = vmul.f32 0.17677669, %v2207_v33 }
 0xd1d   : > { %v5520_v47 = vpop.f32.mrf.mxu0 }
 0xd1e   : > { %v2212_v49 = vsel %vm1063_vm2, %v2211_v34, -inf  ;;  %v5877_v47 = vld [vmem:[%s6549_s24 + $0x70] ss:$8 sps:$4 sm:$0xff]  }
 0xd1f   : > { %2213 = vmax.xlane.f32.xlu0 %v2212_v49  ;;  %v5879_v49 = vld [vmem:[%s6549_s24 + $0x74] ss:$8 sps:$4 sm:$0xff]  }
 0xd35   : > { %2224 = vrot.lane.b32.xlu0 %v6766_v29, %s6285_s15 }
 0xd39   : > { %2317 = vrot.lane.b32.xlu0 %v6644_v35, %s6286_s20 }
 0xda8   : > { %v2214_v56 = vpop.xlane.xlu0 %2213 }
 0xda9   : > { %v2215_v37 = vsub.f32 %v2211_v34, %v2214_v56  ;;  %v5882_v56 = vld [vmem:[%s6549_s24 + $0x64] ss:$8 sps:$4 sm:$0xff]  }
 0xdab   : > { %v2216_v38 = vmul.f32 1.442695, %v2215_v37  ;;  %v5880_v37 = vld [vmem:[%s6549_s24 + $0x60] ss:$8 sps:$4 sm:$0xff]  }
 0xdac   : > { %v2225_v39 = vpop.permute.xlu0 %2224 }
 0xdad   : > { %5983 = vpow2.f32 %v2216_v38  ;;  %v2230_v40 = vsel %vm1080_vm3, %v2225_v39, 0  ;;  %v5885_v38 = vld [vmem:[%s6549_s24 + $0x54] ss:$8 sps:$4 sm:$0xff]  }
 0xdae   : > { %5522 = vmatpush3.bf16.msra.mxu0 %v2230_v40  ;;  %v5895_v39 = vld [vmem:[%s6528_s8 + $0x38] sm:$0xff]   ;;  %v5899_v40 = vld [vmem:[%s6528_s8 + $0x30] sm:$0xff]  }
 0xdaf   : > { %5535 = vmatprep.subr.mxu0 %v6282_v22 }
 0xdb0   : > { %v2318_v54 = vpop.permute.xlu0 %2317 }
 0xdb4   : > { %v2127_v41 = vpop.f32.mrf.mxu1 }
 0xdb6   : > { %v5514_v43 = vpop.f32.mrf.mxu1 }
 0xdb7   : > { %v5888_v43 = vld [vmem:[%s6549_s24 + $0x44] ss:$8 sps:$4 sm:$0xff]  }
 0xdb8   : > { %v2130_v45 = vpop.f32.mrf.mxu1 }
 0xdb9   : > { %v5886_v45 = vld [vmem:[%s6549_s24 + $0x40] ss:$8 sps:$4 sm:$0xff]  }
 0xdba   : > { %v5984_v46 = vpop.eup %5983  ;;  %v5515_v48 = vpop.f32.mrf.mxu1 }
 0xdbb   : > { %v2218_v23 = vsel %vm1063_vm2, %v5984_v46, 0.0  ;;  %v5889_v48 = vld [vmem:[%s6549_s24 + $0x30] ss:$8 sps:$4 sm:$0xff]  }
 0xdbc   : > { %2219 = vadd.xlane.f32.xlu1 %v2218_v23  ;;  %v5894_v23 = vld [vmem:[%s6549_s24 + $0x24] ss:$8 sps:$4 sm:$0xff]  }
 0xdcd   : > { %2319 = vrot.lane.b32.xlu1 %v6646_v36, %s6286_s20 }
 0xe45   : > { %v2220_v35 = vpop.xlane.xlu1 %2219 }
 0xe46   : > { %5985 = vrcp.f32 %v2220_v35  ;;  %v5892_v35 = vld [vmem:[%s6549_s24 + $0x20] ss:$8 sps:$4 sm:$0xff]  }
 0xe49   : > { %v2320_v53 = vpop.permute.xlu1 %2319 }
 0xe53   : > { %v5986_v50 = vpop.eup %5985 }
 0xe54   : > { %v2222_v51 = vmul.f32 %v5986_v50, %v5984_v46  ;;  %v5891_v46 = vld [vmem:[%s6549_s24 + $0x34] ss:$8 sps:$4 sm:$0xff]  }
 0xe55   : > { %v5898_v50 = vld [vmem:[%s6549_s24 + $0x14] ss:$8 sps:$4 sm:$0xff]  }
 0xe56   : > { %v2223_v52 = vpack.c.bf16 %v2222_v51, %v2222_v51  ;;  %v5896_v51 = vld [vmem:[%s6549_s24 + $0x10] ss:$8 sps:$4 sm:$0xff]  }
 0xe58   : > { %5524 = vmatmul.mubr.msk.bf16.vlgmr.msra.gmra.mxu0 %vm1063_vm2, %v2223_v52 }
 0xe59   : > { %5536 = vmatpush3.xpose.msk.msra.mxu0 %vm985_vm1, %v2320_v53  ;;  %5537 = vmatprep.mubr.msk.f32.mxu0 %vm6283_vm0, %v6282_v22 }
 0xe5a   : > { %5546 = vmatprep.subr.bf16.mxu0 %v6282_v22 }
 0xe60   : > { %5538 = vmatmul.mubr.msk.f32.vlgmr.msra.gmra.mxu0 %vm985_vm1, %v2318_v54 }
 0xe61   : > { %5547 = vmatpush3.bf16.msra.mxu0 %v6749_v20  ;;  %5550 = vmatprep.mubr.msk.bf16.mxu0 %vm6283_vm0, %v6282_v22 }
 0xe62   : > { %5548 = vmatprep.subr.bf16.mxu0 %v6282_v22 }
 0xe65   : > { %5549 = vmatpush3.bf16.msra.mxu0 %v6753_v21 }
 0xe66   : > { %2759 = vmatprep.subr.bf16.mxu0 %v5879_v49 }
 0xf18   : > { %v2266_v36 = vpop.f32.mrf.mxu0 }
 0xf19   : > { %v2272_v55 = vpack.c.bf16 %v2266_v36, %v2266_v36 }
 0xf1a   : > { %v5525_v24 = vpop.f32.mrf.mxu0 }
 0xf1b   : > { %5532 = vmatmul.mubr.msk.bf16.vlgmr.msra.gmra.mxu1 %vm985_vm1, %v2272_v55  ;;  %v5902_v55 = vld [vmem:[%s6549_s24 + $0x4] ss:$8 sps:$4 sm:$0xff]  }
 0xf1c   : > { %v2269_v57 = vpop.f32.mrf.mxu0  ;;  %5542 = vmatprep.mubr.msk.bf16.mxu1 %vm6283_vm0, %v6282_v22  ;;  %v5903_v24 = vld [vmem:[%s6528_s8 + $0x28] sm:$0xff]  }
 0xf1d   : > { %v5900_v57 = vld [vmem:[%s6549_s24] ss:$8 sps:$4 sm:$0xff]  }
 0xf1e   : > { %v5526_v58 = vpop.f32.mrf.mxu0 }
 0xf1f   : > { %v5904_v58 = vld [vmem:[%s7341_s17] sm:$0xff]  }
 0xf20   : > { %v2391_v59 = vpop.f32.mrf.mxu0 }
 0xf21   : > { %v2395_v60 = vmul.f32 0.17677669, %v2391_v59  ;;  %v5905_v59 = vld [vmem:[%s6528_s8 + $0x20] sm:$0xff]  }
 0xf22   : > { %v5539_v20 = vpop.f32.mrf.mxu0 }
 0xf23   : > { %v2396_v61 = vsel %vm1063_vm2, %v2395_v60, -inf  ;;  %v5907_v20 = vld [vmem:[%s6528_s8 + $0x10] sm:$0xff]  }
 0xf24   : > { %2397 = vmax.xlane.f32.xlu0 %v2396_v61  ;;  %v5908_v61 = vld [vmem:[%s6528_s8 + $0x8] sm:$0xff]  }
 0xf3a   : > { %2408 = vrot.lane.b32.xlu0 %v6766_v29, %s6286_s20  ;;  %v2128_v29 = vadd.f32 %v2127_v41, %v6826_v28  ;;  %v5883_v41 = vld [vmem:[%s6549_s24 + $0x50] ss:$8 sps:$4 sm:$0xff]  }
 0xfad   : > { %v2398_v21 = vpop.xlane.xlu0 %2397 }
 0xfae   : > { %v2399_v62 = vsub.f32 %v2395_v60, %v2398_v21  ;;  %v5906_v60 = vld [vmem:[%s6528_s8 + $0x18] sm:$0xff]   ;;  %v5909_v21 = vld [vmem:[%s6528_s8] sm:$0xff]  }
 0xfb0   : > { %v2400_v63 = vmul.f32 1.442695, %v2399_v62 }
 0xfb1   : > { %v2409_v0 = vpop.permute.xlu0 %2408 }
 0xfb2   : > { %5987 = vpow2.f32 %v2400_v63  ;;  %v2414_v1 = vsel %vm1080_vm3, %v2409_v0, 0 }
 0xfb3   : > { %5541 = vmatpush3.bf16.msra.mxu1 %v2414_v1 }
 0xfb4   : > { %5554 = vmatprep.subr.bf16.mxu1 %v6282_v22 }
 0xfbf   : > { %v5988_v2 = vpop.eup %5987 }
 0xfc0   : > { %v2402_v5 = vsel %vm1063_vm2, %v5988_v2, 0.0 }
 0xfc1   : > { %2403 = vadd.xlane.f32.xlu1 %v2402_v5 }
 0xfc5   : > { %2506 = vadd.xlane.f32.xlu1 %v2504_v6 }
 0xfdb   : > { %v2310_v7 = vpop.f32.mrf.mxu1 }
 0xfdc   : > { %v2316_v9 = vadd.f32 %v2310_v7, %v2128_v29 }
 0xfdd   : > { %v5533_v11 = vpop.f32.mrf.mxu1 }
 0xfde   : > { %v6914_v11 = vld [vmem:[%s6559_s12] sm:$0xff] }
 0xfdf   : > { %v2313_v3 = vpop.f32.mrf.mxu1 }
 0xfe1   : > { %v5534_v12 = vpop.f32.mrf.mxu1 }
0x104a   : > { %v2404_v18 = vpop.xlane.xlu1 %2403 }
0x104b   : > { %5989 = vrcp.f32 %v2404_v18 }
0x104e   : > { %v2507_v44 = vpop.xlane.xlu1 %2506 }
0x104f   : > { %v2511_v13 = vmul.f32 0.0078125, %v2507_v44 }
0x1051   : > { %v6861_v14 = vsub.f32 %v2504_v6, %v2511_v13  ;;  %v2529_v6 = vlaneseq }
0x1053   : > { %v2515_v15 = vmul.f32 %v6861_v14, %v6861_v14  ;;  %v6910_v29 = vshrl.u32 %v2529_v6, 7 }
0x1055   : > { %2517 = vadd.xlane.f32.xlu0 %v2515_v15  ;;  %v2531_v7 = vsub.s32 0, %v6910_v29  ;;  %v2537_v18 = vsub.s32 1, %v6910_v29 }
0x1057   : > { %v2532_v12 = vrot.slane %v6914_v11, %v2531_v7 }
0x1058   : > { %v5990_v8 = vpop.eup %5989 }
0x1059   : > { %v2406_v19 = vmul.f32 %v5990_v8, %v5988_v2  ;;  %v2538_v8 = vrot.slane %v6914_v11, %v2537_v18 }
0x105b   : > { %v2407_v42 = vpack.c.bf16 %v2406_v19, %v2406_v19 }
0x105d   : > { %5543 = vmatmul.mubr.msk.bf16.vlgmr.msra.gmra.mxu1 %vm1063_vm2, %v2407_v42 }
0x105e   : > { %5570 = vmatprep.mubr.msk.bf16.mxu1 %vm6283_vm0, %v6282_v22  ;;  %5555 = vmatpush3.bf16.msra.mxu1 %v5895_v39 }
0x105f   : > { %5556 = vmatprep.subr.bf16.mxu1 %v6282_v22 }
0x1062   : > { %5557 = vmatpush3.bf16.msra.mxu1 %v5899_v40 }
0x1063   : > { %5558 = vmatprep.subr.bf16.mxu1 %v6282_v22 }
0x1066   : > { %5559 = vmatpush3.bf16.msra.mxu1 %v5903_v24 }
0x1067   : > { %5560 = vmatprep.subr.bf16.mxu1 %v6282_v22 }
0x106a   : > { %5561 = vmatpush3.bf16.msra.mxu1 %v5905_v59 }
0x106b   : > { %5562 = vmatprep.subr.bf16.mxu1 %v6282_v22 }
0x106e   : > { %5563 = vmatpush3.bf16.msra.mxu1 %v5906_v60 }
0x106f   : > { %5564 = vmatprep.subr.bf16.mxu1 %v6282_v22 }
0x1072   : > { %5565 = vmatpush3.bf16.msra.mxu1 %v5907_v20 }
0x1073   : > { %5566 = vmatprep.subr.bf16.mxu1 %v6282_v22 }
0x1076   : > { %5567 = vmatpush3.bf16.msra.mxu1 %v5908_v61 }
0x1077   : > { %5568 = vmatprep.subr.bf16.mxu1 %v6282_v22 }
0x107a   : > { %5569 = vmatpush3.bf16.msra.mxu1 %v5909_v21  ;;  %v5910_v21 = vld [vmem:[%s7342_s6 + $0x8] sm:$0xff]  }
0x107b   : > { %5574 = vmatprep.subr.mxu1 %v6282_v22 }
0x10de   : > { %v2518_v62 = vpop.xlane.xlu0 %2517 }
0x10df   : > { %v2521_v63 = vmul.f32 0.0078125, %v2518_v62  ;;  %v6989_v62 = vld [vmem:[%s6530_s5 + $0x18] sm:$0xff]  }
0x10e1   : > { %v2523_v0 = vadd.f32 1e-06, %v2521_v63  ;;  %v6993_v63 = vld [vmem:[%s6530_s5 + $0x10] sm:$0xff]  }
0x10e3   : > { %5991 = vrsqrt.f32 %v2523_v0 }
0x111d   : > { %v2450_v16 = vpop.f32.mrf.mxu1 }
0x111e   : > { %v2456_v10 = vpack.c.bf16 %v2450_v16, %v2450_v16 }
0x111f   : > { %v5544_v17 = vpop.f32.mrf.mxu1 }
0x1120   : > { %5551 = vmatmul.mubr.msk.bf16.vlgmr.msra.gmra.mxu0 %vm985_vm1, %v2456_v10 }
0x1121   : > { %v2453_v25 = vpop.f32.mrf.mxu1  ;;  %2791 = vmatprep.mubr.bf16.mxu0 %v6281_v4  ;;  %2760 = vmatpush1.bf16.msra.mxu0 %v5877_v47 }
0x1122   : > { %2761 = vmatprep.subr.bf16.mxu0 %v5882_v56 }
0x1123   : > { %v5545_v26 = vpop.f32.mrf.mxu1 }
0x1125   : > { %2762 = vmatpush1.bf16.msra.mxu0 %v5880_v37 }
0x1126   : > { %2763 = vmatprep.subr.bf16.mxu0 %v5885_v38 }
0x1129   : > { %2764 = vmatpush1.bf16.msra.mxu0 %v5883_v41 }
0x112a   : > { %2765 = vmatprep.subr.bf16.mxu0 %v5888_v43 }
0x112d   : > { %2766 = vmatpush1.bf16.msra.mxu0 %v5886_v45 }
0x112e   : > { %2767 = vmatprep.subr.bf16.mxu0 %v5891_v46 }
0x1131   : > { %2768 = vmatpush1.bf16.msra.mxu0 %v5889_v48 }
0x1132   : > { %2769 = vmatprep.subr.bf16.mxu0 %v5894_v23 }
0x1135   : > { %2770 = vmatpush1.bf16.msra.mxu0 %v5892_v35 }
0x1136   : > { %2771 = vmatprep.subr.bf16.mxu0 %v5898_v50 }
0x1139   : > { %2772 = vmatpush1.bf16.msra.mxu0 %v5896_v51 }
0x113a   : > { %2773 = vmatprep.subr.bf16.mxu0 %v5902_v55 }
0x113d   : > { %2774 = vmatpush1.bf16.msra.mxu0 %v5900_v57 }
0x113e   : > { %5594 = vmatprep.subr.bf16.mxu0 %v6282_v22 }
0x1140   : > { %2792 = vmatmul.mubr.bf16.vlgmr.msra.gmra.mxu0 %v5904_v58 }
0x1141   : > { %2801 = vmatprep.mubr.bf16.mxu0 %v6281_v4 }
0x1148   : > { %2802 = vmatmul.mubr.bf16.gmra.mxu0 %v5910_v21 }
0x1149   : > { %5596 = vmatprep.mubr.msk.bf16.mxu0 %vm6283_vm0, %v6282_v22 }
0x11e0   : > { %v2494_v27 = vpop.f32.mrf.mxu0 }
0x11e1   : > { %v2500_v28 = vadd.f32 %v2494_v27, %v2316_v9  ;;  %v5992_v9 = vpop.eup %5991 }
0x11e2   : > { %v5552_v30 = vpop.f32.mrf.mxu0  ;;  %v2527_v3 = vmul.f32 %v5992_v9, %v6861_v14  ;;  %v7004_v9 = vld [vmem:[%s6530_s5] sm:$0xff]  }
0x11e3   : > { %v2505_v32 = vadd.f32 %v6035_v31, %v2500_v28 }
0x11e4   : > { %v2497_v33 = vpop.f32.mrf.mxu0  ;;  %v2533_v15 = vmul.f32 %v2532_v12, %v2527_v3 }
0x11e5   : > { %2508 = vadd.xlane.f32.xlu1 %v2505_v32 }
0x11e6   : > { %v5553_v34 = vpop.f32.mrf.mxu0  ;;  %v6924_v42 = vadd.f32 %v2538_v8, %v2533_v15 }
0x1200   : > { %v6932_v10 = vpop.f32.mrf.mxu0 }
0x1202   : > { %v2795_v17 = vpop.f32.mrf.mxu0 }
0x1204   : > { %v6934_v25 = vpop.f32.mrf.mxu0 }
0x1206   : > { %v2799_v26 = vpop.f32.mrf.mxu0 }
0x1207   : > { %v6942_v27 = vpack.c.bf16 %v2799_v26, %v2795_v17 }
0x126e   : > { %v2509_v52 = vpop.xlane.xlu1 %2508 }
0x126f   : > { %v2512_v53 = vmul.f32 0.0078125, %v2509_v52 }
0x1271   : > { %v2514_v54 = vsub.f32 %v2505_v32, %v2512_v53 }
0x1273   : > { %v2516_v36 = vmul.f32 %v2514_v54, %v2514_v54 }
0x1275   : > { %2519 = vadd.xlane.f32.xlu1 %v2516_v36 }
0x12fe   : > { %v2520_v1 = vpop.xlane.xlu1 %2519 }
0x12ff   : > { %v2522_v2 = vmul.f32 0.0078125, %v2520_v1 }
0x1301   : > { %v2524_v5 = vadd.f32 1e-06, %v2522_v2 }
0x1303   : > { %5993 = vrsqrt.f32 %v2524_v5  ;;  %v6999_v5 = vld [vmem:[%s6530_s5 + $0x8] sm:$0xff]  }
0x1310   : > { %v5994_v44 = vpop.eup %5993 }
0x1311   : > { %v2528_v13 = vmul.f32 %v5994_v44, %v2514_v54 }
0x1313   : > { %v2534_v19 = vmul.f32 %v2532_v12, %v2528_v13  ;;  %v7014_v12 = vpop.f32.mrf.mxu0 }
0x1315   : > { %v6926_v16 = vadd.f32 %v2538_v8, %v2534_v19  ;;  %v7016_v44 = vpop.f32.mrf.mxu0 }
0x1317   : > { %v2541_v14 = vpack.c.bf16 %v6926_v16, %v6924_v42  ;;  %v7018_v13 = vpop.f32.mrf.mxu0 }
0x1319   : > { %5571 = vmatmul.mubr.bf16.vlgmr.msra.gmra.mxu1 %v2541_v14  ;;  %v7020_v15 = vpop.f32.mrf.mxu0 }
0x131a   : > { %5578 = vmatprep.mubr.msk.f32.mxu1 %vm6283_vm0, %v6282_v22  ;;  %5575 = vmatpush3.xpose.msk.msra.mxu1 %vm985_vm1, %v6934_v25 }
0x131b   : > { %5576 = vmatprep.subr.mxu1 %v6282_v22 }
0x131e   : > { %5577 = vmatpush3.xpose.msk.msra.mxu1 %vm985_vm1, %v6932_v10 }
0x131f   : > { %5581 = vmatprep.subr.bf16.mxu1 %v6282_v22 }
0x13d9   : > { %v6944_v28 = vpop.f32.mrf.mxu1 }
0x13da   : > { %2966 = vrot.lane.b32.xlu0 %v6944_v28, %s6284_s27  ;;  %5579 = vmatmul.mubr.msk.f32.vlgmr.msra.gmra.mxu1 %vm985_vm1, %v6944_v28 }
0x13db   : > { %5582 = vmatpush3.bf16.msra.mxu1 %v6942_v27  ;;  %v5572_v30 = vpop.f32.mrf.mxu1  ;;  %5583 = vmatprep.mubr.msk.bf16.mxu1 %vm6283_vm0, %v6282_v22 }
0x13dc   : > { %5587 = vmatprep.subr.mxu1 %v6282_v22 }
0x13dd   : > { %v6954_v31 = vpop.f32.mrf.mxu1 }
0x13df   : > { %v5573_v32 = vpop.f32.mrf.mxu1 }
0x144c   : > { %v2967_v35 = vpop.permute.xlu0 %2966 }
0x149a   : > { %v2903_v33 = vpop.f32.mrf.mxu1 }
0x149b   : > { %v2907_v34 = vmul.f32 0.17677669, %v2903_v33 }
0x149c   : > { %v5580_v47 = vpop.f32.mrf.mxu1 }
0x149d   : > { %v2909_v49 = vsel %vm2908_vm4, %v2907_v34, -inf }
0x149e   : > { %2910 = vmax.xlane.f32.xlu1 %v2909_v49 }
0x14af   : > { %2970 = vrot.lane.b32.xlu1 %v6934_v25, %s6284_s27 }
0x1527   : > { %v2911_v56 = vpop.xlane.xlu1 %2910 }
0x1528   : > { %v2912_v37 = vsub.f32 %v2907_v34, %v2911_v56 }
0x152a   : > { %v2913_v38 = vmul.f32 1.442695, %v2912_v37 }
0x152b   : > { %v2971_v41 = vpop.permute.xlu1 %2970 }
0x152c   : > { %5995 = vpow2.f32 %v2913_v38 }
0x1539   : > { %v5996_v39 = vpop.eup %5995 }
0x153a   : > { %v2915_v40 = vsel %vm2908_vm4, %v5996_v39, 0.0 }
0x153b   : > { %2916 = vadd.xlane.f32.xlu1 %v2915_v40 }
0x154c   : > { %2968 = vrot.lane.b32.xlu1 %v6932_v10, %s6284_s27 }
0x15c4   : > { %v2917_v43 = vpop.xlane.xlu1 %2916 }
0x15c5   : > { %5997 = vrcp.f32 %v2917_v43 }
0x15c8   : > { %v2969_v23 = vpop.permute.xlu1 %2968 }
0x15d2   : > { %v5998_v45 = vpop.eup %5997 }
0x15d3   : > { %v2919_v46 = vmul.f32 %v5998_v45, %v5996_v39 }
0x15d5   : > { %v2920_v48 = vpack.c.bf16 %v2919_v46, %v2919_v46 }
0x15d7   : > { %5584 = vmatmul.mubr.msk.bf16.vlgmr.msra.gmra.mxu1 %vm2908_vm4, %v2920_v48 }
0x15d8   : > { %5588 = vmatpush3.xpose.msk.msra.mxu1 %vm985_vm1, %v2971_v41  ;;  %5591 = vmatprep.mubr.msk.f32.mxu1 %vm6283_vm0, %v6282_v22 }
0x15d9   : > { %5589 = vmatprep.subr.mxu1 %v6282_v22 }
0x15dc   : > { %5590 = vmatpush3.xpose.msk.msra.mxu1 %vm985_vm1, %v2969_v23 }
0x15dd   : > { %5600 = vmatprep.subr.bf16.mxu1 %v6282_v22 }
0x15df   : > { %5592 = vmatmul.mubr.msk.f32.vlgmr.msra.gmra.mxu1 %vm985_vm1, %v2967_v35 }
0x15e0   : > { %5604 = vmatprep.mubr.msk.bf16.mxu1 %vm6283_vm0, %v6282_v22  ;;  %5601 = vmatpush3.bf16.msra.mxu1 %v6989_v62 }
0x15e1   : > { %5602 = vmatprep.subr.bf16.mxu1 %v6282_v22 }
0x15e4   : > { %5603 = vmatpush3.bf16.msra.mxu1 %v6993_v63 }
0x15e5   : > { %5616 = vmatprep.subr.mxu1 %v6282_v22 }
0x1697   : > { %v2959_v50 = vpop.f32.mrf.mxu1 }
0x1698   : > { %v2965_v3 = vpack.c.bf16 %v2959_v50, %v2959_v50 }
0x1699   : > { %v5585_v51 = vpop.f32.mrf.mxu1 }
0x169b   : > { %v2962_v52 = vpop.f32.mrf.mxu1 }
0x169d   : > { %v5586_v53 = vpop.f32.mrf.mxu1 }
0x169e   : > { %v7048_v53 = vld [vmem:[%s6530_s5 + $0x28] sm:$0xff]  }
0x169f   : > { %v3044_v54 = vpop.f32.mrf.mxu1 }
0x16a0   : > { %v3048_v36 = vmul.f32 0.17677669, %v3044_v54 }
0x16a1   : > { %v5593_v55 = vpop.f32.mrf.mxu1 }
0x16a2   : > { %v3049_v24 = vsel %vm2908_vm4, %v3048_v36, -inf }
0x16a3   : > { %3050 = vmax.xlane.f32.xlu1 %v3049_v24 }
0x16b4   : > { %3062 = vrot.lane.b32.xlu1 %v6942_v27, %s6284_s27 }
0x16b8   : > { %3221 = vrot.lane.b32.xlu1 %v6932_v10, %s6285_s15 }
0x16bc   : > { %3219 = vrot.lane.b32.xlu1 %v6944_v28, %s6285_s15 }
0x172c   : > { %v3051_v57 = vpop.xlane.xlu1 %3050 }
0x172d   : > { %v3052_v58 = vsub.f32 %v3048_v36, %v3051_v57  ;;  %v7063_v57 = vld [vmem:[%s6530_s5 + $0x20] sm:$0xff]  }
0x172f   : > { %v3053_v59 = vmul.f32 1.442695, %v3052_v58 }
0x1730   : > { %v3063_v60 = vpop.permute.xlu1 %3062 }
0x1731   : > { %5999 = vpow2.f32 %v3053_v59  ;;  %5595 = vmatpush3.bf16.msra.mxu0 %v3063_v60 }
0x1732   : > { %5608 = vmatprep.subr.bf16.mxu0 %v6282_v22 }
0x1734   : > { %v3222_v26 = vpop.permute.xlu1 %3221 }
0x1738   : > { %v3220_v34 = vpop.permute.xlu1 %3219 }
0x173e   : > { %v6000_v20 = vpop.eup %5999 }
0x173f   : > { %v3055_v61 = vsel %vm2908_vm4, %v6000_v20, 0.0 }
0x1740   : > { %3056 = vadd.xlane.f32.xlu0 %v3055_v61 }
0x1756   : > { %3223 = vrot.lane.b32.xlu0 %v6934_v25, %s6285_s15 }
0x17c9   : > { %v3057_v0 = vpop.xlane.xlu0 %3056 }
0x17ca   : > { %6001 = vrcp.f32 %v3057_v0 }
0x17cd   : > { %v3224_v17 = vpop.permute.xlu0 %3223 }
0x17d7   : > { %v6002_v1 = vpop.eup %6001 }
0x17d8   : > { %v3059_v2 = vmul.f32 %v6002_v1, %v6000_v20 }
0x17da   : > { %v3060_v6 = vpack.c.bf16 %v3059_v2, %v3059_v2 }
0x17dc   : > { %5597 = vmatmul.mubr.msk.bf16.vlgmr.msra.gmra.mxu0 %vm2908_vm4, %v3060_v6 }
0x17dd   : > { %5609 = vmatpush3.bf16.msra.mxu0 %v6999_v5  ;;  %5612 = vmatprep.mubr.msk.bf16.mxu0 %vm6283_vm0, %v6282_v22 }
0x17de   : > { %5610 = vmatprep.subr.bf16.mxu0 %v6282_v22 }
0x17e1   : > { %5611 = vmatpush3.bf16.msra.mxu0 %v7004_v9 }
0x17e2   : > { %5623 = vmatprep.subr.bf16.mxu0 %v6282_v22 }
0x17e4   : > { %5613 = vmatmul.mubr.msk.bf16.vlgmr.msra.gmra.mxu0 %vm985_vm1, %v2965_v3 }
0x17e5   : > { %5625 = vmatprep.mubr.msk.bf16.mxu0 %vm6283_vm0, %v6282_v22 }
0x189c   : > { %v3102_v8 = vpop.f32.mrf.mxu0 }
0x189d   : > { %v3108_v19 = vpack.c.bf16 %v3102_v8, %v3102_v8 }
0x189e   : > { %v5598_v14 = vpop.f32.mrf.mxu0 }
0x189f   : > { %5605 = vmatmul.mubr.msk.bf16.vlgmr.msra.gmra.mxu1 %vm985_vm1, %v3108_v19 }
0x18a0   : > { %5617 = vmatpush3.xpose.msk.msra.mxu1 %vm985_vm1, %v3224_v17  ;;  %v3105_v30 = vpop.f32.mrf.mxu0  ;;  %5620 = vmatprep.mubr.msk.f32.mxu1 %vm6283_vm0, %v6282_v22 }
0x18a1   : > { %5618 = vmatprep.subr.mxu1 %v6282_v22 }
0x18a2   : > { %v5599_v32 = vpop.f32.mrf.mxu0 }
0x18a4   : > { %5619 = vmatpush3.xpose.msk.msra.mxu1 %vm985_vm1, %v3222_v26  ;;  %v7028_v33 = vpop.f32.mrf.mxu0 }
0x18a5   : > { %5629 = vmatprep.subr.bf16.mxu1 %v6282_v22 }
0x18a6   : > { %v5614_v47 = vpop.f32.mrf.mxu0 }
0x18a7   : > { %5621 = vmatmul.mubr.msk.f32.vlgmr.msra.gmra.mxu1 %vm985_vm1, %v3220_v34 }
0x18a8   : > { %v3216_v49 = vpop.f32.mrf.mxu0  ;;  %5633 = vmatprep.mubr.msk.bf16.mxu1 %vm6283_vm0, %v6282_v22  ;;  %5630 = vmatpush3.bf16.msra.mxu1 %v7048_v53 }
0x18a9   : > { %5631 = vmatprep.subr.bf16.mxu1 %v6282_v22  ;;  %v7085_v49 = vld [vmem:[%s6530_s5 + $0x38] sm:$0xff]  }
0x18aa   : > { %v5615_v56 = vpop.f32.mrf.mxu0 }
0x18ab   : > { %v7089_v56 = vld [vmem:[%s6530_s5 + $0x30] sm:$0xff]  }
0x18ac   : > { %5632 = vmatpush3.bf16.msra.mxu1 %v7063_v57 }
0x18ad   : > { %5650 = vmatprep.subr.bf16.mxu1 %v6282_v22 }
0x195f   : > { %v7034_v37 = vpop.f32.mrf.mxu1 }
0x1960   : > { %v3214_v17 = vadd.f32 %v7028_v33, %v7034_v37 }
0x1961   : > { %v5606_v38 = vpop.f32.mrf.mxu1 }
0x1963   : > { %v3161_v39 = vpop.f32.mrf.mxu1 }
0x1965   : > { %v5607_v40 = vpop.f32.mrf.mxu1 }
0x1967   : > { %v3297_v41 = vpop.f32.mrf.mxu1 }
0x1968   : > { %v3301_v43 = vmul.f32 0.17677669, %v3297_v41 }
0x1969   : > { %v5622_v45 = vpop.f32.mrf.mxu1 }
0x196a   : > { %v3302_v46 = vsel %vm2908_vm4, %v3301_v43, -inf }
0x196b   : > { %3303 = vmax.xlane.f32.xlu1 %v3302_v46 }
0x197c   : > { %3314 = vrot.lane.b32.xlu1 %v6942_v27, %s6285_s15 }
0x1980   : > { %3419 = vrot.lane.b32.xlu1 %v6932_v10, %s6286_s20 }
0x1984   : > { %3417 = vrot.lane.b32.xlu1 %v6944_v28, %s6286_s20 }
0x19f4   : > { %v3304_v48 = vpop.xlane.xlu1 %3303 }
0x19f5   : > { %v3305_v23 = vsub.f32 %v3301_v43, %v3304_v48  ;;  %v7121_v48 = vpack.c.bf16 %v7020_v15, %v7016_v44 }
0x19f7   : > { %v3306_v35 = vmul.f32 1.442695, %v3305_v23 }
0x19f8   : > { %v3315_v50 = vpop.permute.xlu1 %3314 }
0x19f9   : > { %6003 = vpow2.f32 %v3306_v35  ;;  %5624 = vmatpush3.bf16.msra.mxu0 %v3315_v50 }
0x19fa   : > { %5637 = vmatprep.subr.mxu0 %v6282_v22 }
0x19fc   : > { %v3420_v24 = vpop.permute.xlu1 %3419 }
0x1a06   : > { %v6004_v51 = vpop.eup %6003 }
0x1a07   : > { %v3308_v52 = vsel %vm2908_vm4, %v6004_v51, 0.0 }
0x1a08   : > { %3309 = vadd.xlane.f32.xlu0 %v3308_v52 }
0x1a1e   : > { %3421 = vrot.lane.b32.xlu0 %v6934_v25, %s6286_s20  ;;  %v3418_v25 = vpop.permute.xlu1 %3417 }
0x1a91   : > { %v3310_v10 = vpop.xlane.xlu0 %3309 }
0x1a92   : > { %6005 = vrcp.f32 %v3310_v10 }
0x1a95   : > { %v3422_v55 = vpop.permute.xlu0 %3421 }
0x1a9f   : > { %v6006_v28 = vpop.eup %6005 }
0x1aa0   : > { %v3312_v54 = vmul.f32 %v6006_v28, %v6004_v51 }
0x1aa2   : > { %v3313_v36 = vpack.c.bf16 %v3312_v54, %v3312_v54 }
0x1aa4   : > { %5626 = vmatmul.mubr.msk.bf16.vlgmr.msra.gmra.mxu0 %vm2908_vm4, %v3313_v36 }
0x1aa5   : > { %5638 = vmatpush3.xpose.msk.msra.mxu0 %vm985_vm1, %v3422_v55  ;;  %5641 = vmatprep.mubr.msk.f32.mxu0 %vm6283_vm0, %v6282_v22 }
0x1aa6   : > { %5639 = vmatprep.subr.mxu0 %v6282_v22 }
0x1aa9   : > { %5640 = vmatpush3.xpose.msk.msra.mxu0 %vm985_vm1, %v3420_v24 }
0x1aaa   : > { %5644 = vmatprep.subr.bf16.mxu0 %v6282_v22 }
0x1aac   : > { %5642 = vmatmul.mubr.msk.f32.vlgmr.msra.gmra.mxu0 %vm985_vm1, %v3418_v25 }
0x1aad   : > { %5646 = vmatprep.mubr.msk.bf16.mxu0 %vm6283_vm0, %v6282_v22 }
0x1b64   : > { %v3354_v58 = vpop.f32.mrf.mxu0 }
0x1b65   : > { %v3360_v59 = vpack.c.bf16 %v3354_v58, %v3354_v58 }
0x1b66   : > { %v5627_v60 = vpop.f32.mrf.mxu0 }
0x1b67   : > { %5634 = vmatmul.mubr.msk.bf16.vlgmr.msra.gmra.mxu1 %vm985_vm1, %v3360_v59 }
0x1b68   : > { %v3357_v20 = vpop.f32.mrf.mxu0  ;;  %5654 = vmatprep.mubr.msk.bf16.mxu1 %vm6283_vm0, %v6282_v22  ;;  %5651 = vmatpush3.bf16.msra.mxu1 %v7085_v49 }
0x1b69   : > { %5652 = vmatprep.subr.bf16.mxu1 %v6282_v22 }
0x1b6a   : > { %v5628_v61 = vpop.f32.mrf.mxu0 }
0x1b6c   : > { %v3495_v21 = vpop.f32.mrf.mxu0  ;;  %5653 = vmatpush3.bf16.msra.mxu1 %v7089_v56 }
0x1b6d   : > { %v3499_v0 = vmul.f32 0.17677669, %v3495_v21  ;;  %5665 = vmatprep.subr.bf16.mxu1 %v6282_v22 }
0x1b6e   : > { %v5643_v1 = vpop.f32.mrf.mxu0 }
0x1b6f   : > { %v3500_v2 = vsel %vm2908_vm4, %v3499_v0, -inf }
0x1b70   : > { %3501 = vmax.xlane.f32.xlu1 %v3500_v2 }
0x1b81   : > { %3757 = vrot.lane.b32.xlu1 %v7018_v13, %s6284_s27 }
0x1b85   : > { %3755 = vrot.lane.b32.xlu1 %v7014_v12, %s6284_s27 }
0x1bf9   : > { %v3502_v6 = vpop.xlane.xlu1 %3501 }
0x1bfa   : > { %v3503_v3 = vsub.f32 %v3499_v0, %v3502_v6 }
0x1bfc   : > { %v3504_v8 = vmul.f32 1.442695, %v3503_v3 }
0x1bfd   : > { %v3758_v40 = vpop.permute.xlu1 %3757 }
0x1bfe   : > { %6007 = vpow2.f32 %v3504_v8 }
0x1c01   : > { %v3756_v41 = vpop.permute.xlu1 %3755 }
0x1c0b   : > { %v6008_v19 = vpop.eup %6007 }
0x1c0c   : > { %v3506_v14 = vsel %vm2908_vm4, %v6008_v19, 0.0 }
0x1c0d   : > { %3507 = vadd.xlane.f32.xlu0 %v3506_v14 }
0x1c23   : > { %3512 = vrot.lane.b32.xlu0 %v6942_v27, %s6286_s20 }
0x1c27   : > { %v3410_v26 = vpop.f32.mrf.mxu1  ;;  %3753 = vrot.lane.b32.xlu0 %v6954_v31, %s6284_s27 }
0x1c28   : > { %v7082_v30 = vadd.f32 %v3410_v26, %v3214_v17 }
0x1c29   : > { %v5635_v32 = vpop.f32.mrf.mxu1 }
0x1c2b   : > { %v3413_v34 = vpop.f32.mrf.mxu1 }
0x1c2d   : > { %v5636_v47 = vpop.f32.mrf.mxu1 }
0x1c96   : > { %v3508_v27 = vpop.xlane.xlu0 %3507 }
0x1c97   : > { %6009 = vrcp.f32 %v3508_v27 }
0x1c9a   : > { %v3513_v33 = vpop.permute.xlu0 %3512 }
0x1c9b   : > { %5645 = vmatpush3.bf16.msra.mxu0 %v3513_v33 }
0x1c9c   : > { %5658 = vmatprep.subr.mxu0 %v6282_v22 }
0x1c9e   : > { %v3754_v43 = vpop.permute.xlu0 %3753 }
0x1ca4   : > { %v6010_v37 = vpop.eup %6009 }
0x1ca5   : > { %v3510_v38 = vmul.f32 %v6010_v37, %v6008_v19 }
0x1ca7   : > { %v3511_v39 = vpack.c.bf16 %v3510_v38, %v3510_v38 }
0x1ca9   : > { %5647 = vmatmul.mubr.msk.bf16.vlgmr.msra.gmra.mxu0 %vm2908_vm4, %v3511_v39 }
0x1caa   : > { %5659 = vmatpush3.xpose.msk.msra.mxu0 %vm985_vm1, %v7018_v13  ;;  %5662 = vmatprep.mubr.msk.f32.mxu0 %vm6283_vm0, %v6282_v22 }
0x1cab   : > { %5660 = vmatprep.subr.mxu0 %v6282_v22 }
0x1cae   : > { %5661 = vmatpush3.xpose.msk.msra.mxu0 %vm985_vm1, %v7014_v12 }
0x1caf   : > { %5671 = vmatprep.subr.mxu0 %v6282_v22 }
0x1cb1   : > { %5663 = vmatmul.mubr.msk.f32.vlgmr.msra.gmra.mxu0 %vm985_vm1, %v6954_v31 }
0x1cb2   : > { %5672 = vmatpush3.xpose.msk.msra.mxu0 %vm985_vm1, %v3758_v40  ;;  %5675 = vmatprep.mubr.msk.f32.mxu0 %vm6283_vm0, %v6282_v22 }
0x1cb3   : > { %5673 = vmatprep.subr.mxu0 %v6282_v22 }
0x1cb6   : > { %5674 = vmatpush3.xpose.msk.msra.mxu0 %vm985_vm1, %v3756_v41 }
0x1cb7   : > { %5684 = vmatprep.subr.bf16.mxu0 %v6282_v22 }
0x1cb9   : > { %5676 = vmatmul.mubr.msk.f32.vlgmr.msra.gmra.mxu0 %vm985_vm1, %v3754_v43 }
0x1cba   : > { %5685 = vmatpush3.bf16.msra.mxu0 %v6989_v62  ;;  %5688 = vmatprep.mubr.msk.bf16.mxu0 %vm6283_vm0, %v6282_v22 }
0x1cbb   : > { %5686 = vmatprep.subr.bf16.mxu0 %v6282_v22 }
0x1cbe   : > { %5687 = vmatpush3.bf16.msra.mxu0 %v6993_v63 }
0x1cbf   : > { %5700 = vmatprep.subr.mxu0 %v6282_v22 }
0x1d69   : > { %v3552_v45 = vpop.f32.mrf.mxu0 }
0x1d6a   : > { %v3558_v46 = vpack.c.bf16 %v3552_v45, %v3552_v45 }
0x1d6b   : > { %v5648_v23 = vpop.f32.mrf.mxu0 }
0x1d6c   : > { %5655 = vmatmul.mubr.msk.bf16.vlgmr.msra.gmra.mxu1 %vm985_vm1, %v3558_v46 }
0x1d6d   : > { %5666 = vmatpush3.bf16.msra.mxu1 %v7121_v48  ;;  %v3555_v62 = vpop.f32.mrf.mxu0  ;;  %5667 = vmatprep.mubr.msk.bf16.mxu1 %vm6283_vm0, %v6282_v22 }
0x1d6e   : > { %5678 = vmatprep.subr.bf16.mxu1 %v6282_v22 }
0x1d6f   : > { %v5649_v63 = vpop.f32.mrf.mxu0 }
0x1d71   : > { %v3691_v35 = vpop.f32.mrf.mxu0 }
0x1d72   : > { %v3695_v50 = vmul.f32 0.17677669, %v3691_v35 }
0x1d73   : > { %v5664_v51 = vpop.f32.mrf.mxu0 }
0x1d74   : > { %v3696_v52 = vsel %vm2908_vm4, %v3695_v50, -inf }
0x1d75   : > { %3697 = vmax.xlane.f32.xlu1 %v3696_v52 }
0x1d79   : > { %v3831_v44 = vpop.f32.mrf.mxu0 }
0x1d7a   : > { %v3835_v15 = vmul.f32 0.17677669, %v3831_v44 }
0x1d7b   : > { %v5677_v10 = vpop.f32.mrf.mxu0 }
0x1d7c   : > { %v3836_v28 = vsel %vm2908_vm4, %v3835_v15, -inf }
0x1d7d   : > { %3837 = vmax.xlane.f32.xlu0 %v3836_v28 }
0x1dfe   : > { %v3698_v54 = vpop.xlane.xlu1 %3697 }
0x1dff   : > { %v3699_v36 = vsub.f32 %v3695_v50, %v3698_v54 }
0x1e01   : > { %v3700_v55 = vmul.f32 1.442695, %v3699_v36 }
0x1e03   : > { %6011 = vpow2.f32 %v3700_v55 }
0x1e06   : > { %v3838_v24 = vpop.xlane.xlu0 %3837 }
0x1e07   : > { %v3839_v25 = vsub.f32 %v3835_v15, %v3838_v24 }
0x1e09   : > { %v3840_v58 = vmul.f32 1.442695, %v3839_v25 }
0x1e0b   : > { %6013 = vpow2.f32 %v3840_v58 }
0x1e10   : > { %v6012_v59 = vpop.eup %6011 }
0x1e11   : > { %v3702_v60 = vsel %vm2908_vm4, %v6012_v59, 0.0 }
0x1e12   : > { %3703 = vadd.xlane.f32.xlu0 %v3702_v60 }
0x1e18   : > { %v6014_v20 = vpop.eup %6013 }
0x1e19   : > { %v3842_v61 = vsel %vm2908_vm4, %v6014_v20, 0.0 }
0x1e1a   : > { %3843 = vadd.xlane.f32.xlu1 %v3842_v61 }
0x1e28   : > { %3849 = vrot.lane.b32.xlu0 %v7121_v48, %s6284_s27 }
0x1e2b   : > { %3986 = vrot.lane.b32.xlu1 %v7018_v13, %s6285_s15 }
0x1e2c   : > { %v3608_v21 = vpop.f32.mrf.mxu1  ;;  %3982 = vrot.lane.b32.xlu0 %v6954_v31, %s6285_s15 }
0x1e2d   : > { %v7139_v0 = vadd.f32 %v3608_v21, %v7082_v30 }
0x1e2e   : > { %v5656_v1 = vpop.f32.mrf.mxu1 }
0x1e2f   : > { %3984 = vrot.lane.b32.xlu1 %v7014_v12, %s6285_s15 }
0x1e30   : > { %v3611_v2 = vpop.f32.mrf.mxu1 }
0x1e32   : > { %v5657_v6 = vpop.f32.mrf.mxu1 }
0x1e9b   : > { %v3704_v3 = vpop.xlane.xlu0 %3703 }
0x1e9c   : > { %6015 = vrcp.f32 %v3704_v3 }
0x1e9f   : > { %v3850_v26 = vpop.permute.xlu0 %3849 }
0x1ea3   : > { %v3844_v8 = vpop.xlane.xlu1 %3843  ;;  %v3983_v46 = vpop.permute.xlu0 %3982 }
0x1ea4   : > { %6017 = vrcp.f32 %v3844_v8 }
0x1ea7   : > { %v3987_v39 = vpop.permute.xlu1 %3986 }
0x1ea9   : > { %v6016_v19 = vpop.eup %6015 }
0x1eaa   : > { %v3706_v14 = vmul.f32 %v6016_v19, %v6012_v59 }
0x1eab   : > { %v3985_v45 = vpop.permute.xlu1 %3984 }
0x1eac   : > { %v3707_v17 = vpack.c.bf16 %v3706_v14, %v3706_v14 }
0x1eae   : > { %5668 = vmatmul.mubr.msk.bf16.vlgmr.msra.gmra.mxu1 %vm2908_vm4, %v3707_v17 }
0x1eaf   : > { %5679 = vmatpush3.bf16.msra.mxu1 %v3850_v26  ;;  %5680 = vmatprep.mubr.msk.bf16.mxu1 %vm6283_vm0, %v6282_v22  ;;  %v4357_v26 = vadd.f32 %v7139_v0, %v6924_v42 }
0x1eb0   : > { %5692 = vmatprep.subr.bf16.mxu1 %v6282_v22 }
0x1eb1   : > { %v6018_v30 = vpop.eup %6017 }
0x1eb2   : > { %v3846_v32 = vmul.f32 %v6018_v30, %v6014_v20 }
0x1eb4   : > { %v3847_v34 = vpack.c.bf16 %v3846_v32, %v3846_v32 }
0x1eb6   : > { %5681 = vmatmul.mubr.msk.bf16.vlgmr.msra.gmra.mxu1 %vm2908_vm4, %v3847_v34 }
0x1eb7   : > { %5693 = vmatpush3.bf16.msra.mxu1 %v6999_v5  ;;  %5696 = vmatprep.mubr.msk.bf16.mxu1 %vm6283_vm0, %v6282_v22 }
0x1eb8   : > { %5694 = vmatprep.subr.bf16.mxu1 %v6282_v22 }
0x1ebb   : > { %5695 = vmatpush3.bf16.msra.mxu1 %v7004_v9 }
0x1ebc   : > { %5707 = vmatprep.subr.bf16.mxu1 %v6282_v22 }
0x1f6e   : > { %v3746_v47 = vpop.f32.mrf.mxu1 }
0x1f6f   : > { %v3752_v27 = vpack.c.bf16 %v3746_v47, %v3746_v47 }
0x1f70   : > { %v5669_v33 = vpop.f32.mrf.mxu1 }
0x1f71   : > { %5697 = vmatmul.mubr.msk.bf16.vlgmr.msra.gmra.mxu1 %vm985_vm1, %v3752_v27 }
0x1f72   : > { %v3749_v37 = vpop.f32.mrf.mxu1  ;;  %5709 = vmatprep.mubr.msk.bf16.mxu1 %vm6283_vm0, %v6282_v22 }
0x1f74   : > { %v5670_v38 = vpop.f32.mrf.mxu1 }
0x1f76   : > { %v3889_v5 = vpop.f32.mrf.mxu1 }
0x1f77   : > { %v3895_v40 = vpack.c.bf16 %v3889_v5, %v3889_v5 }
0x1f78   : > { %v5682_v41 = vpop.f32.mrf.mxu1 }
0x1f79   : > { %5689 = vmatmul.mubr.msk.bf16.vlgmr.msra.gmra.mxu0 %vm985_vm1, %v3895_v40 }
0x1f7a   : > { %5701 = vmatpush3.xpose.msk.msra.mxu0 %vm985_vm1, %v3987_v39  ;;  %v3892_v9 = vpop.f32.mrf.mxu1  ;;  %5704 = vmatprep.mubr.msk.f32.mxu0 %vm6283_vm0, %v6282_v22 }
0x1f7b   : > { %5702 = vmatprep.subr.mxu0 %v6282_v22 }
0x1f7c   : > { %v5683_v43 = vpop.f32.mrf.mxu1 }
0x1f7e   : > { %5703 = vmatpush3.xpose.msk.msra.mxu0 %vm985_vm1, %v3985_v45 }
0x1f7f   : > { %5713 = vmatprep.subr.bf16.mxu0 %v6282_v22 }
0x1f81   : > { %5705 = vmatmul.mubr.msk.f32.vlgmr.msra.gmra.mxu0 %vm985_vm1, %v3983_v46 }
0x1f82   : > { %5714 = vmatpush3.bf16.msra.mxu0 %v7048_v53  ;;  %5717 = vmatprep.mubr.msk.bf16.mxu0 %vm6283_vm0, %v6282_v22 }
0x1f83   : > { %5715 = vmatprep.subr.bf16.mxu0 %v6282_v22 }
0x1f86   : > { %5716 = vmatpush3.bf16.msra.mxu0 %v7063_v57 }
0x1f87   : > { %5734 = vmatprep.subr.bf16.mxu0 %v6282_v22 }
0x2031   : > { %v3976_v23 = vpop.f32.mrf.mxu1 }
0x2033   : > { %v5698_v62 = vpop.f32.mrf.mxu1 }
0x2035   : > { %v3979_v63 = vpop.f32.mrf.mxu1 }
0x2037   : > { %v5699_v35 = vpop.f32.mrf.mxu1 }
0x2039   : > { %v3933_v50 = vpop.f32.mrf.mxu0 }
0x203a   : > { %v7171_v51 = vadd.f32 %v3976_v23, %v3933_v50 }
0x203b   : > { %v5690_v52 = vpop.f32.mrf.mxu0 }
0x203d   : > { %v3936_v44 = vpop.f32.mrf.mxu0 }
0x203e   : > { %v5919_v44 = vld [vmem:[%s6536_s19 + $0x70] ss:$8 sps:$4 sm:$0xff]  }
0x203f   : > { %v5691_v15 = vpop.f32.mrf.mxu0 }
0x2040   : > { %v5921_v15 = vld [vmem:[%s6536_s19 + $0x74] ss:$8 sps:$4 sm:$0xff]  }
0x2041   : > { %v4060_v53 = vpop.f32.mrf.mxu0 }
0x2042   : > { %v4064_v10 = vmul.f32 0.17677669, %v4060_v53  ;;  %v5924_v53 = vld [vmem:[%s6536_s19 + $0x64] ss:$8 sps:$4 sm:$0xff]  }
0x2043   : > { %v5706_v28 = vpop.f32.mrf.mxu0 }
0x2044   : > { %v4065_v54 = vsel %vm2908_vm4, %v4064_v10, -inf }
0x2045   : > { %4066 = vmax.xlane.f32.xlu1 %v4065_v54 }
0x2056   : > { %4172 = vrot.lane.b32.xlu1 %v7018_v13, %s6286_s20 }
0x205a   : > { %4170 = vrot.lane.b32.xlu1 %v7014_v12, %s6286_s20 }
0x20ce   : > { %v4067_v57 = vpop.xlane.xlu1 %4066 }
0x20cf   : > { %v4068_v36 = vsub.f32 %v4064_v10, %v4067_v57  ;;  %v5922_v10 = vld [vmem:[%s6536_s19 + $0x60] ss:$8 sps:$4 sm:$0xff]  }
0x20d1   : > { %v4069_v55 = vmul.f32 1.442695, %v4068_v36  ;;  %v5927_v36 = vld [vmem:[%s6536_s19 + $0x54] ss:$8 sps:$4 sm:$0xff]  }
0x20d2   : > { %v4173_v60 = vpop.permute.xlu1 %4172 }
0x20d3   : > { %6019 = vpow2.f32 %v4069_v55  ;;  %v5925_v55 = vld [vmem:[%s6536_s19 + $0x50] ss:$8 sps:$4 sm:$0xff]  }
0x20e0   : > { %v6020_v24 = vpop.eup %6019 }
0x20e1   : > { %v4071_v25 = vsel %vm2908_vm4, %v6020_v24, 0.0 }
0x20e2   : > { %4072 = vadd.xlane.f32.xlu0 %v4071_v25  ;;  %v5930_v25 = vld [vmem:[%s6536_s19 + $0x44] ss:$8 sps:$4 sm:$0xff]  }
0x20f8   : > { %4077 = vrot.lane.b32.xlu0 %v7121_v48, %s6285_s15 }
0x20fc   : > { %4168 = vrot.lane.b32.xlu0 %v6954_v31, %s6286_s20  ;;  %v4171_v31 = vpop.permute.xlu1 %4170 }
0x216b   : > { %v4073_v58 = vpop.xlane.xlu0 %4072 }
0x216c   : > { %6021 = vrcp.f32 %v4073_v58  ;;  %v5933_v58 = vld [vmem:[%s6536_s19 + $0x34] ss:$8 sps:$4 sm:$0xff]  }
0x216f   : > { %v4078_v13 = vpop.permute.xlu0 %4077 }
0x2170   : > { %5708 = vmatpush3.bf16.msra.mxu1 %v4078_v13  ;;  %v5931_v13 = vld [vmem:[%s6536_s19 + $0x30] ss:$8 sps:$4 sm:$0xff]  }
0x2171   : > { %5721 = vmatprep.subr.mxu1 %v6282_v22 }
0x2173   : > { %v4169_v61 = vpop.permute.xlu0 %4168 }
0x2179   : > { %v6022_v12 = vpop.eup %6021 }
0x217a   : > { %v4075_v59 = vmul.f32 %v6022_v12, %v6020_v24  ;;  %v5928_v24 = vld [vmem:[%s6536_s19 + $0x40] ss:$8 sps:$4 sm:$0xff]   ;;  %v5936_v12 = vld [vmem:[%s6536_s19 + $0x24] ss:$8 sps:$4 sm:$0xff]  }
0x217c   : > { %v4076_v20 = vpack.c.bf16 %v4075_v59, %v4075_v59  ;;  %v5934_v59 = vld [vmem:[%s6536_s19 + $0x20] ss:$8 sps:$4 sm:$0xff]  }
0x217e   : > { %5710 = vmatmul.mubr.msk.bf16.vlgmr.msra.gmra.mxu1 %vm2908_vm4, %v4076_v20  ;;  %v5937_v20 = vld [vmem:[%s6536_s19 + $0x10] ss:$8 sps:$4 sm:$0xff]  }
0x217f   : > { %5722 = vmatpush3.xpose.msk.msra.mxu1 %vm985_vm1, %v4173_v60  ;;  %5725 = vmatprep.mubr.msk.f32.mxu1 %vm6283_vm0, %v6282_v22  ;;  %v5939_v60 = vld [vmem:[%s6536_s19 + $0x14] ss:$8 sps:$4 sm:$0xff]  }
0x2180   : > { %5723 = vmatprep.subr.mxu1 %v6282_v22 }
0x2183   : > { %5724 = vmatpush3.xpose.msk.msra.mxu1 %vm985_vm1, %v4171_v31  ;;  %v5942_v31 = vld [vmem:[%s6536_s19 + $0x4] ss:$8 sps:$4 sm:$0xff]  }
0x2184   : > { %5728 = vmatprep.subr.bf16.mxu1 %v6282_v22 }
0x2186   : > { %5726 = vmatmul.mubr.msk.f32.vlgmr.msra.gmra.mxu1 %vm985_vm1, %v4169_v61  ;;  %v5940_v61 = vld [vmem:[%s6536_s19] ss:$8 sps:$4 sm:$0xff]  }
0x2187   : > { %5730 = vmatprep.mubr.msk.bf16.mxu1 %vm6283_vm0, %v6282_v22 }
0x223e   : > { %v4117_v21 = vpop.f32.mrf.mxu1 }
0x223f   : > { %v4123_v1 = vpack.c.bf16 %v4117_v21, %v4117_v21  ;;  %v5943_v21 = vld [vmem:[%s6538_s13 + $0x78] sm:$0xff]  }
0x2240   : > { %v5711_v2 = vpop.f32.mrf.mxu1 }
0x2241   : > { %5718 = vmatmul.mubr.msk.bf16.vlgmr.msra.gmra.mxu0 %vm985_vm1, %v4123_v1  ;;  %v5944_v1 = vld [vmem:[%s6538_s13 + $0x38] sm:$0xff]   ;;  %v5945_v2 = vld [vmem:[%s6538_s13 + $0x70] sm:$0xff]  }
0x2242   : > { %v4120_v6 = vpop.f32.mrf.mxu1  ;;  %5735 = vmatpush3.bf16.msra.mxu0 %v7085_v49  ;;  %5738 = vmatprep.mubr.msk.bf16.mxu0 %vm6283_vm0, %v6282_v22 }
0x2243   : > { %5736 = vmatprep.subr.bf16.mxu0 %v6282_v22  ;;  %v5946_v6 = vld [vmem:[%s6538_s13 + $0x30] sm:$0xff]  }
0x2244   : > { %v5712_v3 = vpop.f32.mrf.mxu1 }
0x2245   : > { %v5947_v3 = vld [vmem:[%s6538_s13 + $0x68] sm:$0xff]  }
0x2246   : > { %v4246_v8 = vpop.f32.mrf.mxu1  ;;  %5737 = vmatpush3.bf16.msra.mxu0 %v7089_v56 }
0x2247   : > { %v4250_v19 = vmul.f32 0.17677669, %v4246_v8  ;;  %5360 = vmatprep.subr.bf16.mxu0 %v5943_v21  ;;  %v5948_v8 = vld [vmem:[%s6538_s13 + $0x28] sm:$0xff]  }
0x2248   : > { %v5727_v14 = vpop.f32.mrf.mxu1 }
0x2249   : > { %v4251_v17 = vsel %vm2908_vm4, %v4250_v19, -inf  ;;  %v5950_v14 = vld [vmem:[%s6538_s13 + $0x20] sm:$0xff]  }
0x224a   : > { %4252 = vmax.xlane.f32.xlu1 %v4251_v17  ;;  %v5951_v17 = vld [vmem:[%s6538_s13 + $0x58] sm:$0xff]  }
0x224e   : > { %4359 = vadd.xlane.f32.xlu1 %v4357_v26 }
0x22d3   : > { %v4253_v30 = vpop.xlane.xlu1 %4252 }
0x22d4   : > { %v4254_v49 = vsub.f32 %v4250_v19, %v4253_v30  ;;  %v5949_v19 = vld [vmem:[%s6538_s13 + $0x60] sm:$0xff]  }
0x22d6   : > { %v4255_v32 = vmul.f32 1.442695, %v4254_v49 }
0x22d7   : > { %v4360_v45 = vpop.xlane.xlu1 %4359 }
0x22d8   : > { %6023 = vpow2.f32 %v4255_v32  ;;  %v4363_v46 = vmul.f32 0.0078125, %v4360_v45  ;;  %v5954_v45 = vld [vmem:[%s6538_s13 + $0x10] sm:$0xff]  }
0x22da   : > { %v7210_v35 = vsub.f32 %v4357_v26, %v4363_v46  ;;  %v5952_v26 = vld [vmem:[%s6538_s13 + $0x18] sm:$0xff]   ;;  %v5955_v46 = vld [vmem:[%s6538_s13 + $0x48] sm:$0xff]  }
0x22dc   : > { %v4367_v52 = vmul.f32 %v7210_v35, %v7210_v35 }
0x22e5   : > { %v6024_v34 = vpop.eup %6023 }
0x22e6   : > { %v4257_v22 = vsel %vm2908_vm4, %v6024_v34, 0.0 }
0x22e7   : > { %4258 = vadd.xlane.f32.xlu0 %v4257_v22 }
0x22fd   : > { %4263 = vrot.lane.b32.xlu0 %v7121_v48, %s6286_s20 }
0x2301   : > { %v4161_v56 = vpop.f32.mrf.mxu0 }
0x2302   : > { %v4167_v47 = vadd.f32 %v4161_v56, %v7171_v51 }
0x2303   : > { %v5719_v27 = vpop.f32.mrf.mxu0 }
0x2305   : > { %v4164_v33 = vpop.f32.mrf.mxu0 }
0x2307   : > { %v5720_v37 = vpop.f32.mrf.mxu0 }
0x2370   : > { %v4259_v38 = vpop.xlane.xlu0 %4258 }
0x2371   : > { %6025 = vrcp.f32 %v4259_v38  ;;  %v4389_v38 = vsub.s32 3, %v6910_v29 }
0x2374   : > { %v4264_v42 = vpop.permute.xlu0 %4263 }
0x2375   : > { %5729 = vmatpush3.bf16.msra.mxu1 %v4264_v42 }
0x2376   : > { %4502 = vmatprep.subr.bf16.mxu1 %v5921_v15 }
0x237e   : > { %v6026_v0 = vpop.eup %6025 }
0x237f   : > { %v4261_v5 = vmul.f32 %v6026_v0, %v6024_v34 }
0x2381   : > { %v4262_v39 = vpack.c.bf16 %v4261_v5, %v4261_v5 }
0x2383   : > { %5731 = vmatmul.mubr.msk.bf16.vlgmr.msra.gmra.mxu1 %vm2908_vm4, %v4262_v39  ;;  %v4390_v39 = vrot.slane %v6914_v11, %v4389_v38 }
0x2384   : > { %4534 = vmatprep.mubr.bf16.mxu1 %v6281_v4  ;;  %4503 = vmatpush1.bf16.msra.mxu1 %v5919_v44 }
0x2385   : > { %4504 = vmatprep.subr.bf16.mxu1 %v5924_v53 }
0x2388   : > { %4505 = vmatpush1.bf16.msra.mxu1 %v5922_v10 }
0x2389   : > { %4506 = vmatprep.subr.bf16.mxu1 %v5927_v36 }
0x238c   : > { %4507 = vmatpush1.bf16.msra.mxu1 %v5925_v55 }
0x238d   : > { %4508 = vmatprep.subr.bf16.mxu1 %v5930_v25 }
0x2390   : > { %4509 = vmatpush1.bf16.msra.mxu1 %v5928_v24 }
0x2391   : > { %4510 = vmatprep.subr.bf16.mxu1 %v5933_v58 }
0x2394   : > { %4511 = vmatpush1.bf16.msra.mxu1 %v5931_v13 }
0x2395   : > { %4512 = vmatprep.subr.bf16.mxu1 %v5936_v12 }
0x2398   : > { %4513 = vmatpush1.bf16.msra.mxu1 %v5934_v59 }
0x2399   : > { %4514 = vmatprep.subr.bf16.mxu1 %v5939_v60 }
0x239c   : > { %4515 = vmatpush1.bf16.msra.mxu1 %v5937_v20 }
0x239d   : > { %4516 = vmatprep.subr.bf16.mxu1 %v5942_v31 }
0x23a0   : > { %4517 = vmatpush1.bf16.msra.mxu1 %v5940_v61 }
0x2443   : > { %v4303_v40 = vpop.f32.mrf.mxu1 }
0x2444   : > { %v4309_v41 = vpack.c.bf16 %v4303_v40, %v4303_v40 }
0x2445   : > { %v5732_v48 = vpop.f32.mrf.mxu1 }
0x2446   : > { %5739 = vmatmul.mubr.msk.bf16.vlgmr.msra.gmra.mxu0 %vm985_vm1, %v4309_v41 }
0x2447   : > { %v4306_v9 = vpop.f32.mrf.mxu1  ;;  %5361 = vmatpush3.bf16.msra.mxu0 %v5944_v1 }
0x2448   : > { %5362 = vmatprep.subr.bf16.mxu0 %v5945_v2 }
0x2449   : > { %v5733_v43 = vpop.f32.mrf.mxu1 }
0x244a   : > { %v5953_v43 = vld [vmem:[%s6538_s13 + $0x50] sm:$0xff]  }
0x244b   : > { %5363 = vmatpush3.bf16.msra.mxu0 %v5946_v6 }
0x244c   : > { %5364 = vmatprep.subr.bf16.mxu0 %v5947_v3 }
0x244f   : > { %5365 = vmatpush3.bf16.msra.mxu0 %v5948_v8 }
0x2450   : > { %5366 = vmatprep.subr.bf16.mxu0 %v5949_v19 }
0x2453   : > { %5367 = vmatpush3.bf16.msra.mxu0 %v5950_v14 }
0x2454   : > { %5368 = vmatprep.subr.bf16.mxu0 %v5951_v17 }
0x2457   : > { %5369 = vmatpush3.bf16.msra.mxu0 %v5952_v26 }
0x2458   : > { %5370 = vmatprep.subr.bf16.mxu0 %v5953_v43 }
0x245b   : > { %5371 = vmatpush3.bf16.msra.mxu0 %v5954_v45 }
0x245c   : > { %5372 = vmatprep.subr.bf16.mxu0 %v5955_v46 }
0x2506   : > { %v4347_v23 = vpop.f32.mrf.mxu0 }
0x2507   : > { %v4353_v62 = vadd.f32 %v4347_v23, %v4167_v47  ;;  %v4383_v47 = vsub.s32 2, %v6910_v29  ;;  %v5956_v23 = vld [vmem:[%s6538_s13 + $0x8] sm:$0xff]  }
0x2508   : > { %v5740_v63 = vpop.f32.mrf.mxu0  ;;  %5373 = vmatpush3.bf16.msra.mxu0 %v5956_v23 }
0x2509   : > { %v4358_v4 = vadd.f32 %v4353_v62, %v6926_v16  ;;  %v4384_v37 = vrot.slane %v6914_v11, %v4383_v47  ;;  %v5957_v62 = vld [vmem:[%s6538_s13 + $0x40] sm:$0xff]   ;;  %v4750_v47 = vsub.s32 5, %v6910_v29 }
0x250a   : > { %v4350_v50 = vpop.f32.mrf.mxu0  ;;  %v5958_v63 = vld [vmem:[%s6538_s13] sm:$0xff]   ;;  %5374 = vmatprep.subr.bf16.mxu0 %v5957_v62 }
0x250b   : > { %4361 = vadd.xlane.f32.xlu1 %v4358_v4 }
0x250c   : > { %v5741_v51 = vpop.f32.mrf.mxu0  ;;  %5375 = vmatpush3.bf16.msra.mxu0 %v5958_v63 }
0x250f   : > { %4369 = vadd.xlane.f32.xlu1 %v4367_v52 }
0x2594   : > { %v4362_v16 = vpop.xlane.xlu1 %4361 }
0x2595   : > { %v4364_v28 = vmul.f32 0.0078125, %v4362_v16 }
0x2597   : > { %v4366_v54 = vsub.f32 %v4358_v4, %v4364_v28 }
0x2598   : > { %v4370_v30 = vpop.xlane.xlu1 %4369 }
0x2599   : > { %v4368_v57 = vmul.f32 %v4366_v54, %v4366_v54  ;;  %v4373_v49 = vmul.f32 0.0078125, %v4370_v30 }
0x259b   : > { %4371 = vadd.xlane.f32.xlu1 %v4368_v57  ;;  %v4375_v32 = vadd.f32 1e-06, %v4373_v49 }
0x259d   : > { %6027 = vrsqrt.f32 %v4375_v32 }
0x25aa   : > { %v6028_v27 = vpop.eup %6027 }
0x25ab   : > { %v4379_v33 = vmul.f32 %v6028_v27, %v7210_v35  ;;  %v4410_v35 = vld [vmem:[%s6554_s28] sm:$0x3]  ;;  %v4756_v27 = vsub.s32 6, %v6910_v29 }
0x25ac   : > { %v4419_v4 = vrot.slane %v4410_v35, %v2537_v18  ;;  %v4415_v50 = vrot.slane %v4410_v35, %v2531_v7  ;;  %v4585_v18 = vsub.s32 4, %v6910_v29  ;;  %v6036_v7 = vld [vmem:[%s6559_s12] sm:$0xff] }
0x25ad   : > { %v4385_v5 = vmul.f32 %v4384_v37, %v4379_v33  ;;  %v4751_v33 = vrot.slane %v6036_v7, %v4750_v47  ;;  %v4757_v38 = vrot.slane %v6036_v7, %v4756_v27 }
0x25ae   : > { %v4586_v58 = vrot.slane %v6036_v7, %v4585_v18 }
0x25af   : > { %v4391_v41 = vadd.f32 %v4390_v39, %v4385_v5 }
0x2624   : > { %v4372_v34 = vpop.xlane.xlu1 %4371 }
0x2625   : > { %v4374_v22 = vmul.f32 0.0078125, %v4372_v34 }
0x2627   : > { %v4376_v56 = vadd.f32 1e-06, %v4374_v22 }
0x2629   : > { %6029 = vrsqrt.f32 %v4376_v56 }
0x2636   : > { %v6030_v42 = vpop.eup %6029 }
0x2637   : > { %v4380_v0 = vmul.f32 %v6030_v42, %v4366_v54 }
0x2639   : > { %v4386_v40 = vmul.f32 %v4384_v37, %v4380_v0 }
0x263b   : > { %v4392_v48 = vadd.f32 %v4390_v39, %v4386_v40 }
0x263d   : > { %v4393_v9 = vpack.c.bf16 %v4392_v48, %v4391_v41 }
0x263f   : > { %4535 = vmatmul.mubr.bf16.vlgmr.msra.gmra.mxu1 %v4393_v9 }
0x26ff   : > { %v4536_v11 = vpop.f32.mrf.mxu1 }
0x2700   : > { %v4537_v53 = vadd.f32 %v4536_v11, %v4415_v50 }
0x2701   : > { %v4538_v51 = vpop.f32.mrf.mxu1 }
0x2702   : > { %v4539_v44 = vadd.f32 %v4538_v51, %v4419_v4  ;;  %v4545_v36 = vmax.f32 %v4537_v53, 0.0 }
0x2703   : > { %v4540_v52 = vpop.f32.mrf.mxu1 }
0x2704   : > { %v4541_v15 = vadd.f32 %v4540_v52, %v4415_v50  ;;  %v4546_v54 = vmax.f32 %v4539_v44, 0.0 }
0x2705   : > { %v4542_v10 = vpop.f32.mrf.mxu1 }
0x2706   : > { %v4543_v16 = vadd.f32 %v4542_v10, %v4419_v4  ;;  %v4547_v28 = vmax.f32 %v4541_v15, 0.0 }
0x2708   : > { %v4548_v57 = vmax.f32 %v4543_v16, 0.0  ;;  %v4549_v24 = vpack.c.bf16 %v4547_v28, %v4545_v36 }
0x270a   : > { %v4550_v55 = vpack.c.bf16 %v4548_v57, %v4546_v54 }
0x270c   : > { %4715 = vmatprep.mubr.bf16.mxu0 %v4550_v55 }
0x270d   : > { %4716 = vmatmul.mubr.bf16.vlgmr.msra.gmra.mxu0 %v4549_v24 }
0x27cd   : > { %v5376_v25 = vpop.f32.mrf.mxu0 }
0x27cf   : > { %v5377_v13 = vpop.f32.mrf.mxu0 }
0x27d0   : > { %v5378_v12 = vadd.f32 %v5377_v13, %v5376_v25 }
0x27d1   : > { %v5379_v59 = vpop.f32.mrf.mxu0 }
0x27d2   : > { %v4718_v60 = vadd.f32 %v5378_v12, %v4586_v58 }
0x27d3   : > { %v5380_v20 = vpop.f32.mrf.mxu0 }
0x27d4   : > { %v5381_v31 = vadd.f32 %v5380_v20, %v5379_v59  ;;  %v4724_v61 = vadd.f32 %v4718_v60, %v4391_v41 }
0x27d6   : > { %v4721_v21 = vadd.f32 %v5381_v31, %v4586_v58  ;;  %4726 = vadd.xlane.f32.xlu1 %v4724_v61 }
0x27d8   : > { %v4725_v1 = vadd.f32 %v4721_v21, %v4392_v48 }
0x27da   : > { %4728 = vadd.xlane.f32.xlu1 %v4725_v1 }
0x285f   : > { %v4727_v2 = vpop.xlane.xlu1 %4726 }
0x2860   : > { %v4730_v6 = vmul.f32 0.0078125, %v4727_v2 }
0x2862   : > { %v4732_v3 = vsub.f32 %v4724_v61, %v4730_v6 }
0x2863   : > { %v4729_v8 = vpop.xlane.xlu1 %4728 }
0x2864   : > { %v4731_v19 = vmul.f32 0.0078125, %v4729_v8  ;;  %v4734_v14 = vmul.f32 %v4732_v3, %v4732_v3 }
0x2866   : > { %v4733_v17 = vsub.f32 %v4725_v1, %v4731_v19  ;;  %4736 = vadd.xlane.f32.xlu0 %v4734_v14 }
0x2868   : > { %v4735_v26 = vmul.f32 %v4733_v17, %v4733_v17 }
0x286a   : > { %4738 = vadd.xlane.f32.xlu1 %v4735_v26 }
0x28ef   : > { %v4737_v30 = vpop.xlane.xlu0 %4736 }
0x28f0   : > { %v4740_v49 = vmul.f32 0.0078125, %v4737_v30 }
0x28f2   : > { %v4742_v32 = vadd.f32 1e-06, %v4740_v49 }
0x28f3   : > { %v4739_v34 = vpop.xlane.xlu1 %4738 }
0x28f4   : > { %6031 = vrsqrt.f32 %v4742_v32  ;;  %v4741_v22 = vmul.f32 0.0078125, %v4739_v34 }
0x28f6   : > { %v4743_v56 = vadd.f32 1e-06, %v4741_v22 }
0x28f8   : > { %6033 = vrsqrt.f32 %v4743_v56 }
0x2901   : > { %v6032_v37 = vpop.eup %6031 }
0x2902   : > { %v4746_v42 = vmul.f32 %v6032_v37, %v4732_v3 }
0x2904   : > { %v4752_v0 = vmul.f32 %v4751_v33, %v4746_v42 }
0x2905   : > { %v6034_v5 = vpop.eup %6033 }
0x2906   : > { %v4758_v39 = vadd.f32 %v4757_v38, %v4752_v0  ;;  %v4747_v40 = vmul.f32 %v6034_v5, %v4733_v17 }
0x2908   : > { %4760 = vst [vmem:[%s7340_s30] sm:$0xff] %v4758_v39  ;;  %v4753_v41 = vmul.f32 %v4751_v33, %v4747_v40 }
0x290a   : > { %v4759_v48 = vadd.f32 %v4757_v38, %v4753_v41 }
0x290c   : > { %4761 = vst [vmem:[%s7340_s30 + $0x8] sm:$0xff] %v4759_v48 }
0x290d PF: > { %s7343_s12 = sld [smem:[#allocation19_spill]]  ;;  %s7347_s17 = smov %s6251_s18 }
0x290e   : > { %s7344_s14 = sld [smem:[#allocation17_spill]]  ;;  %s7349_s20 = smov %s6263_s21 }
0x290f   : > { %s7345_s19 = sld [smem:[#allocation21_spill]] }
0x2910   : > { %s7346_s1 = sld [smem:[#allocation20_spill]] }
0x2913   : > { %s33_s22 = sadd.s32 1, %s7343_s12  }
0x2914   : > { %p30_p11 = scmp.ge.s32.totalorder %s33_s22, 4   ;;  %s7348_s18 = smov %s7344_s14 }
0x2916   : > { %s7350_s21 = smov %s7346_s1  ;;  %32 = sbr.rel (!%p30_p11) target bundleno = 20 (0x14), region = 184 }
0x291b   :  { %4784 = vsyncpa [#allocation4], 1 }
0x291c   :  { %4786 = vsyncpa [#allocation4 + $0x1], 1 }
0x291d   :  { %4787 = vsyncpa [#allocation6], 1 }
0x291e   :  { %4789 = vsyncpa [#allocation6 + $0x1], 1 }
0x291f   :  { %4790 = vsyncpa [#allocation9], 1 }
0x2920   :  { %4792 = vsyncpa [#allocation9 + $0x1], 1 }
0x2921   :  { %4793 = vsyncpa [#allocation12], 1 }
0x2922   :  { %4795 = vsyncpa [#allocation12 + $0x1], 1 }

</bundles_post_ra>
